<compile_context>
chip_gen: v7x
topology: tpu7x:2x2x1
jax: 0.10.0
libtpu: 0.0.40
codegen_flags: <defaults>
</compile_context>

<pallas_src>
import functools

import numpy as np
import jax
import jax.numpy as jnp
from jax import lax
from jax.experimental import pallas as pl
from jax.experimental.pallas import tpu as pltpu

C_STATE = 16     # state channels (module hard-codes 16)
HIDDEN = 128     # hidden channels of the 1x1 conv stack
_OFF = 8         # sublane-aligned column offset of the interior inside the padded scratch


def _make_nca_kernel(H, W, steps):
    C, HID, OFF = C_STATE, HIDDEN, _OFF

    def kernel(x_ref, w1_ref, b1_ref, w2_ref, b2_ref, o_ref, state_ref, feat_ref):
        # ---- seed the padded state for this batch element (border columns/rows stay 0) ----
        state_ref[...] = jnp.zeros(state_ref.shape, state_ref.dtype)
        state_ref[1:H + 1, OFF:OFF + W, :] = x_ref[0]

        c0 = OFF - 1   # column where the dj=0 window of the 3x3 stencil starts

        def win(di, dj):                        # (H, W, C) shifted window of the padded state
            return state_ref[di:di + H, c0 + dj:c0 + dj + W, :]

        def win_alpha(di, dj):                  # (H, W, 1) alpha channel of the window
            return state_ref[di:di + H, c0 + dj:c0 + dj + W, 3:4]

        def step(_, carry):
            # --- fixed depthwise 3x3 perception (identity / sobel_x / sobel_y) ---
            x = win(1, 1)
            gx = (win(0, 2) + 2.0 * win(1, 2) + win(2, 2)
                  - win(0, 0) - 2.0 * win(1, 0) - win(2, 0)) * 0.125
            gy = (win(2, 0) + 2.0 * win(2, 1) + win(2, 2)
                  - win(0, 0) - 2.0 * win(0, 1) - win(0, 2)) * 0.125
            x2 = x.reshape(H * W, C)

            # --- assemble (H*W, 48) features -> single MXU matmul (48 -> 128) + ReLU ---
            feat_ref[:, 0:C] = x2
            feat_ref[:, C:2 * C] = gx.reshape(H * W, C)
            feat_ref[:, 2 * C:3 * C] = gy.reshape(H * W, C)
            feat = feat_ref[...].astype(w1_ref.dtype)
            h = jnp.dot(feat, w1_ref[...], preferred_element_type=jnp.float32) + b1_ref[...]
            h = jnp.maximum(h, 0.0)

            # --- 1x1 conv (128 -> 16) ---
            delta = (jnp.dot(h.astype(w2_ref.dtype), w2_ref[...],
                             preferred_element_type=jnp.float32) + b2_ref[...])

            # --- living mask: 3x3 max-pool (stride 1, zero pad) on alpha channel > 0.1 ---
            a = x[:, :, 3:4]
            for di in range(3):
                for dj in range(3):
                    if (di, dj) != (1, 1):
                        a = jnp.maximum(a, win_alpha(di, dj))
            alive = (a > 0.1).astype(jnp.float32).reshape(H * W, 1)

            # --- residual update, written back into the interior of the padded state ---
            new = x2 + delta * alive
            state_ref[1:H + 1, OFF:OFF + W, :] = new.reshape(H, W, C)
            return carry

        lax.fori_loop(0, steps, step, 0)

        # final state -> output block (one HBM writeback per batch element)
        o_ref[0] = state_ref[1:H + 1, OFF:OFF + W, :]

    return kernel


@functools.lru_cache(maxsize=None)
def _make_fused_call(B, H, W, steps):
    C, HID = C_STATE, HIDDEN
    kernel = _make_nca_kernel(H, W, steps)
    call = pl.pallas_call(
        kernel,
        out_shape=jax.ShapeDtypeStruct((B, H, W, C), jnp.float32),
        grid=(B,),
        in_specs=[
            pl.BlockSpec((1, H, W, C), lambda b: (b, 0, 0, 0)),   # state (NHWC)
            pl.BlockSpec((3 * C, HID), lambda b: (0, 0)),         # w1: rows = [id|sobel_x|sobel_y]
            pl.BlockSpec((1, HID), lambda b: (0, 0)),             # b1
            pl.BlockSpec((HID, C), lambda b: (0, 0)),             # w2
            pl.BlockSpec((1, C), lambda b: (0, 0)),               # b2
        ],
        out_specs=pl.BlockSpec((1, H, W, C), lambda b: (b, 0, 0, 0)),
        scratch_shapes=[
            pltpu.VMEM((H + 2, _OFF + W + 1, C), jnp.float32),    # padded state, VMEM-resident
            pltpu.VMEM((H * W, 3 * C), jnp.float32),              # feature assembly buffer
        ],
        compiler_params=pltpu.CompilerParams(dimension_semantics=("parallel",)),
    )
    return jax.jit(call)


def init_params(key, *, zero_init_last=True, matmul_dtype=jnp.bfloat16):
    """Parameters mirroring the module's __init__.

    Returns (w1, b1, w2, b2):
      w1: (48, 128)  rows grouped as [identity | sobel_x | sobel_y] x 16 channels
      b1: (1, 128) f32
      w2: (128, 16)  zeroed when zero_init_last (module does `weight.data *= 0`)
      b2: (1, 16)  f32
    The fixed depthwise perception kernels (id / sobel_x / sobel_y) are hard-coded
    in the Pallas kernel.
    """
    k1, k2, k3, k4 = jax.random.split(key, 4)
    bound1 = 1.0 / np.sqrt(48.0)
    w1_t = jax.random.uniform(k1, (HIDDEN, 3 * C_STATE), jnp.float32, -bound1, bound1)  # torch (out, in)
    b1 = jax.random.uniform(k2, (HIDDEN,), jnp.float32, -bound1, bound1)
    # torch grouped-conv channel order: input channel of conv#2 is 3*c + k (k: 0=id, 1=sx, 2=sy)
    w1 = jnp.concatenate([w1_t[:, 0::3].T, w1_t[:, 1::3].T, w1_t[:, 2::3].T], axis=0)   # (48, 128)

    bound2 = 1.0 / np.sqrt(float(HIDDEN))
    if zero_init_last:
        w2 = jnp.zeros((HIDDEN, C_STATE), jnp.float32)
    else:  # PyTorch-default init for the last conv (used only for the numeric self-check)
        w2 = jax.random.uniform(k4, (C_STATE, HIDDEN), jnp.float32, -bound2, bound2).T
    b2 = jax.random.uniform(k3, (C_STATE,), jnp.float32, -bound2, bound2)

    return (w1.astype(matmul_dtype), b1.reshape(1, HIDDEN),
            w2.astype(matmul_dtype), b2.reshape(1, C_STATE))


def nca_forward(params, input_states_nchw, steps, return_all_frames=False):
    """Forward pass. input_states_nchw: (B, 16, H, W) float32 (NCHW, like PyTorch)."""
    w1, b1, w2, b2 = params
    B, C, H, W = input_states_nchw.shape
    assert C == C_STATE
    x = jnp.transpose(input_states_nchw, (0, 2, 3, 1)).astype(jnp.float32)   # NHWC

    if return_all_frames:
        # Uncommon debug path: fused 1-step rollouts so every frame is materialized.
        step1 = _make_fused_call(B, H, W, 1)
        frames = [x]
        for _ in range(steps):
            x = step1(x, w1, b1, w2, b2)
            frames.append(x)
        out = jnp.stack(frames)                                # (steps+1, B, H, W, C)
        return jnp.transpose(out, (0, 1, 4, 2, 3))             # (steps+1, B, C, H, W)

    out = _make_fused_call(B, H, W, steps)(x, w1, b1, w2, b2)  # (B, H, W, C)
    return jnp.transpose(out, (0, 3, 1, 2))                    # (B, C, H, W)


def _nca_reference(params, x_nchw, steps):
    """Pure-JAX reference with the same bf16 matmul-operand precision as the kernel."""
    w1, b1, w2, b2 = params
    x = jnp.transpose(x_nchw, (0, 2, 3, 1)).astype(jnp.float32)
    B, H, W, C = x.shape
    for _ in range(steps):
        xp = jnp.pad(x, ((0, 0), (1, 1), (1, 1), (0, 0)))
        s = lambda di, dj: xp[:, di:di + H, dj:dj + W, :]
        ident = s(1, 1)
        gx = (s(0, 2) + 2.0 * s(1, 2) + s(2, 2) - s(0, 0) - 2.0 * s(1, 0) - s(2, 0)) * 0.125
        gy = (s(2, 0) + 2.0 * s(2, 1) + s(2, 2) - s(0, 0) - 2.0 * s(0, 1) - s(0, 2)) * 0.125
        feat = jnp.concatenate([ident, gx, gy], axis=-1).astype(w1.dtype).reshape(B * H * W, 3 * C)
        h = jnp.maximum(jnp.dot(feat, w1, preferred_element_type=jnp.float32) + b1, 0.0)
        delta = (jnp.dot(h.astype(w2.dtype), w2, preferred_element_type=jnp.float32)
                 + b2).reshape(B, H, W, C)
        pooled = ident[..., 3:4]
        for di in range(3):
            for dj in range(3):
                pooled = jnp.maximum(pooled, s(di, dj)[..., 3:4])
        alive = (pooled > 0.1).astype(jnp.float32)
        x = x + delta * alive
    return jnp.transpose(x, (0, 3, 1, 2))


if __name__ == "__main__":
    key = jax.random.PRNGKey(0)
    pkey, ckey, xkey = jax.random.split(key, 3)

    B, C, H, W = 2, C_STATE, 16, 16
    steps = 3
    x = 0.5 * jax.random.normal(xkey, (B, C, H, W), jnp.float32)   # NCHW, like the PyTorch module

    # Numeric self-check against a pure-JAX reference (non-zero last-layer weights so the
    # full perception -> matmul -> mask path is exercised; same compiled kernel is reused).
    chk_params = init_params(ckey, zero_init_last=False)
    got = jax.block_until_ready(nca_forward(chk_params, x, steps))
    want = jax.block_until_ready(_nca_reference(chk_params, x, steps))
    np.testing.assert_allclose(np.asarray(got), np.asarray(want), rtol=2e-2, atol=2e-2)

    # Module-faithful parameters (last conv weight zeroed, as in the module's __init__).
    params = init_params(pkey)
    out = jax.block_until_ready(nca_forward(params, x, steps))
    assert out.shape == (B, C, H, W)
    assert bool(jnp.all(jnp.isfinite(out)))
    print("KERNEL_OK")
</pallas_src>

<mosaic_0001>
module attributes {stable_mosaic.version = 11 : i64} {
  func.func @kernel(%arg0: i32, %arg1: memref<1x16x16x16xf32, #tpu.memory_space<vmem>>, %arg2: memref<48x128xbf16, #tpu.memory_space<vmem>>, %arg3: memref<1x128xf32, #tpu.memory_space<vmem>>, %arg4: memref<128x16xbf16, #tpu.memory_space<vmem>>, %arg5: memref<1x16xf32, #tpu.memory_space<vmem>>, %arg6: memref<1x16x16x16xf32, #tpu.memory_space<vmem>>, %arg7: memref<18x25x16xf32, #tpu.memory_space<vmem>>, %arg8: memref<256x48xf32, #tpu.memory_space<vmem>>) attributes {dimension_semantics = [#tpu.dimension_semantics<parallel>], iteration_bounds = array<i64: 2>, scalar_prefetch = 0 : i64, scratch_operands = 2 : i64, tpu.core_type = #tpu.core_type<tc>, window_params = [{transform_indices = @transform_0, window_bounds = array<i64: 1, 16, 16, 16>}, {pipeline_mode = #tpu.pipeline_mode<synchronous>, transform_indices = @transform_1, window_bounds = array<i64: 48, 128>}, {pipeline_mode = #tpu.pipeline_mode<synchronous>, transform_indices = @transform_2, window_bounds = array<i64: 1, 128>}, {pipeline_mode = #tpu.pipeline_mode<synchronous>, transform_indices = @transform_3, window_bounds = array<i64: 128, 16>}, {pipeline_mode = #tpu.pipeline_mode<synchronous>, transform_indices = @transform_4, window_bounds = array<i64: 1, 16>}, {transform_indices = @transform_5, window_bounds = array<i64: 1, 16, 16, 16>}]} {
    %cst = arith.constant 0.000000e+00 : f32
    %0 = vector.broadcast %cst : f32 to vector<18x25x16xf32>
    %c0 = arith.constant 0 : index
    %c0_0 = arith.constant 0 : index
    %c0_1 = arith.constant 0 : index
    %1 = vector.load %arg7[%c0, %c0_0, %c0_1] : memref<18x25x16xf32, #tpu.memory_space<vmem>>, vector<18x25x16xf32>
    tpu.vector_store %arg7[%c0, %c0_0, %c0_1], %0 {strides = array<i32>} : memref<18x25x16xf32, #tpu.memory_space<vmem>>, vector<18x25x16xf32>,
    %c0_2 = arith.constant 0 : index
    %c0_3 = arith.constant 0 : index
    %c0_4 = arith.constant 0 : index
    %c0_5 = arith.constant 0 : index
    %2 = vector.load %arg1[%c0_2, %c0_3, %c0_4, %c0_5] : memref<1x16x16x16xf32, #tpu.memory_space<vmem>>, vector<1x16x16x16xf32>
    %3 = vector.shape_cast %2 : vector<1x16x16x16xf32> to vector<16x16x16xf32>
    %c1 = arith.constant 1 : index
    %c8 = arith.constant 8 : index
    %c0_6 = arith.constant 0 : index
    %4 = vector.load %arg7[%c1, %c8, %c0_6] : memref<18x25x16xf32, #tpu.memory_space<vmem>>, vector<16x16x16xf32>
    tpu.vector_store %arg7[%c1, %c8, %c0_6], %3 {strides = array<i32>} : memref<18x25x16xf32, #tpu.memory_space<vmem>>, vector<16x16x16xf32>,
    %c0_i32 = arith.constant 0 : i32
    %c3_i32 = arith.constant 3 : i32
    %5 = arith.addi %c0_i32, %c3_i32 : i32
    %c1_i32 = arith.constant 1 : i32
    scf.for %arg9 = %c0_i32 to %5 step %c1_i32  : i32 {
      %c1_14 = arith.constant 1 : index
      %c8_15 = arith.constant 8 : index
      %c0_16 = arith.constant 0 : index
      %10 = vector.load %arg7[%c1_14, %c8_15, %c0_16] : memref<18x25x16xf32, #tpu.memory_space<vmem>>, vector<16x16x16xf32>
      %c0_17 = arith.constant 0 : index
      %c9 = arith.constant 9 : index
      %c0_18 = arith.constant 0 : index
      %11 = vector.load %arg7[%c0_17, %c9, %c0_18] : memref<18x25x16xf32, #tpu.memory_space<vmem>>, vector<16x16x16xf32>
      %c1_19 = arith.constant 1 : index
      %c9_20 = arith.constant 9 : index
      %c0_21 = arith.constant 0 : index
      %12 = vector.load %arg7[%c1_19, %c9_20, %c0_21] : memref<18x25x16xf32, #tpu.memory_space<vmem>>, vector<16x16x16xf32>
      %cst_22 = arith.constant 2.000000e+00 : f32
      %13 = vector.broadcast %cst_22 : f32 to vector<16x16x16xf32>
      %14 = arith.mulf %13, %12 : vector<16x16x16xf32>
      %15 = arith.addf %11, %14 : vector<16x16x16xf32>
      %c2 = arith.constant 2 : index
      %c9_23 = arith.constant 9 : index
      %c0_24 = arith.constant 0 : index
      %16 = vector.load %arg7[%c2, %c9_23, %c0_24] : memref<18x25x16xf32, #tpu.memory_space<vmem>>, vector<16x16x16xf32>
      %17 = arith.addf %15, %16 : vector<16x16x16xf32>
      %c0_25 = arith.constant 0 : index
      %c7 = arith.constant 7 : index
      %c0_26 = arith.constant 0 : index
      %18 = vector.load %arg7[%c0_25, %c7, %c0_26] : memref<18x25x16xf32, #tpu.memory_space<vmem>>, vector<16x16x16xf32>
      %19 = arith.subf %17, %18 : vector<16x16x16xf32>
      %c1_27 = arith.constant 1 : index
      %c7_28 = arith.constant 7 : index
      %c0_29 = arith.constant 0 : index
      %20 = vector.load %arg7[%c1_27, %c7_28, %c0_29] : memref<18x25x16xf32, #tpu.memory_space<vmem>>, vector<16x16x16xf32>
      %cst_30 = arith.constant 2.000000e+00 : f32
      %21 = vector.broadcast %cst_30 : f32 to vector<16x16x16xf32>
      %22 = arith.mulf %21, %20 : vector<16x16x16xf32>
      %23 = arith.subf %19, %22 : vector<16x16x16xf32>
      %c2_31 = arith.constant 2 : index
      %c7_32 = arith.constant 7 : index
      %c0_33 = arith.constant 0 : index
      %24 = vector.load %arg7[%c2_31, %c7_32, %c0_33] : memref<18x25x16xf32, #tpu.memory_space<vmem>>, vector<16x16x16xf32>
      %25 = arith.subf %23, %24 : vector<16x16x16xf32>
      %cst_34 = arith.constant 1.250000e-01 : f32
      %26 = vector.broadcast %cst_34 : f32 to vector<16x16x16xf32>
      %27 = arith.mulf %25, %26 : vector<16x16x16xf32>
      %c2_35 = arith.constant 2 : index
      %c7_36 = arith.constant 7 : index
      %c0_37 = arith.constant 0 : index
      %28 = vector.load %arg7[%c2_35, %c7_36, %c0_37] : memref<18x25x16xf32, #tpu.memory_space<vmem>>, vector<16x16x16xf32>
      %c2_38 = arith.constant 2 : index
      %c8_39 = arith.constant 8 : index
      %c0_40 = arith.constant 0 : index
      %29 = vector.load %arg7[%c2_38, %c8_39, %c0_40] : memref<18x25x16xf32, #tpu.memory_space<vmem>>, vector<16x16x16xf32>
      %cst_41 = arith.constant 2.000000e+00 : f32
      %30 = vector.broadcast %cst_41 : f32 to vector<16x16x16xf32>
      %31 = arith.mulf %30, %29 : vector<16x16x16xf32>
      %32 = arith.addf %28, %31 : vector<16x16x16xf32>
      %c2_42 = arith.constant 2 : index
      %c9_43 = arith.constant 9 : index
      %c0_44 = arith.constant 0 : index
      %33 = vector.load %arg7[%c2_42, %c9_43, %c0_44] : memref<18x25x16xf32, #tpu.memory_space<vmem>>, vector<16x16x16xf32>
      %34 = arith.addf %32, %33 : vector<16x16x16xf32>
      %c0_45 = arith.constant 0 : index
      %c7_46 = arith.constant 7 : index
      %c0_47 = arith.constant 0 : index
      %35 = vector.load %arg7[%c0_45, %c7_46, %c0_47] : memref<18x25x16xf32, #tpu.memory_space<vmem>>, vector<16x16x16xf32>
      %36 = arith.subf %34, %35 : vector<16x16x16xf32>
      %c0_48 = arith.constant 0 : index
      %c8_49 = arith.constant 8 : index
      %c0_50 = arith.constant 0 : index
      %37 = vector.load %arg7[%c0_48, %c8_49, %c0_50] : memref<18x25x16xf32, #tpu.memory_space<vmem>>, vector<16x16x16xf32>
      %cst_51 = arith.constant 2.000000e+00 : f32
      %38 = vector.broadcast %cst_51 : f32 to vector<16x16x16xf32>
      %39 = arith.mulf %38, %37 : vector<16x16x16xf32>
      %40 = arith.subf %36, %39 : vector<16x16x16xf32>
      %c0_52 = arith.constant 0 : index
      %c9_53 = arith.constant 9 : index
      %c0_54 = arith.constant 0 : index
      %41 = vector.load %arg7[%c0_52, %c9_53, %c0_54] : memref<18x25x16xf32, #tpu.memory_space<vmem>>, vector<16x16x16xf32>
      %42 = arith.subf %40, %41 : vector<16x16x16xf32>
      %cst_55 = arith.constant 1.250000e-01 : f32
      %43 = vector.broadcast %cst_55 : f32 to vector<16x16x16xf32>
      %44 = arith.mulf %42, %43 : vector<16x16x16xf32>
      %45 = vector.shape_cast %10 : vector<16x16x16xf32> to vector<256x16xf32>
      %c0_56 = arith.constant 0 : index
      %c0_57 = arith.constant 0 : index
      %46 = vector.load %arg8[%c0_56, %c0_57] : memref<256x48xf32, #tpu.memory_space<vmem>>, vector<256x16xf32>
      tpu.vector_store %arg8[%c0_56, %c0_57], %45 {strides = array<i32>} : memref<256x48xf32, #tpu.memory_space<vmem>>, vector<256x16xf32>,
      %47 = vector.shape_cast %27 : vector<16x16x16xf32> to vector<256x16xf32>
      %c0_58 = arith.constant 0 : index
      %c16 = arith.constant 16 : index
      %48 = vector.load %arg8[%c0_58, %c16] : memref<256x48xf32, #tpu.memory_space<vmem>>, vector<256x16xf32>
      tpu.vector_store %arg8[%c0_58, %c16], %47 {strides = array<i32>} : memref<256x48xf32, #tpu.memory_space<vmem>>, vector<256x16xf32>,
      %49 = vector.shape_cast %44 : vector<16x16x16xf32> to vector<256x16xf32>
      %c0_59 = arith.constant 0 : index
      %c32 = arith.constant 32 : index
      %50 = vector.load %arg8[%c0_59, %c32] : memref<256x48xf32, #tpu.memory_space<vmem>>, vector<256x16xf32>
      tpu.vector_store %arg8[%c0_59, %c32], %49 {strides = array<i32>} : memref<256x48xf32, #tpu.memory_space<vmem>>, vector<256x16xf32>,
      %c0_60 = arith.constant 0 : index
      %c0_61 = arith.constant 0 : index
      %51 = vector.load %arg8[%c0_60, %c0_61] : memref<256x48xf32, #tpu.memory_space<vmem>>, vector<256x48xf32>
      %52 = arith.truncf %51 : vector<256x48xf32> to vector<256x48xbf16>
      %c0_62 = arith.constant 0 : index
      %c0_63 = arith.constant 0 : index
      %53 = vector.load %arg2[%c0_62, %c0_63] : memref<48x128xbf16, #tpu.memory_space<vmem>>, vector<48x128xbf16>
      %cst_64 = arith.constant dense<0.000000e+00> : vector<256x128xf32>
      %54 = tpu.matmul %52, %53, %cst_64 {dimension_numbers = #tpu.dot_dimension_numbers<[1], [0], [0], [1], [0, 0, 1, 1], [], []>} : vector<256x48xbf16>, vector<48x128xbf16>, vector<256x128xf32> -> vector<256x128xf32>
      %c0_65 = arith.constant 0 : index
      %c0_66 = arith.constant 0 : index
      %55 = vector.load %arg3[%c0_65, %c0_66] : memref<1x128xf32, #tpu.memory_space<vmem>>, vector<1x128xf32>
      %56 = vector.broadcast %55 : vector<1x128xf32> to vector<256x128xf32>
      %57 = arith.addf %54, %56 : vector<256x128xf32>
      %cst_67 = arith.constant 0.000000e+00 : f32
      %58 = vector.broadcast %cst_67 : f32 to vector<256x128xf32>
      %59 = arith.maximumf %57, %58 : vector<256x128xf32>
      %60 = arith.truncf %59 : vector<256x128xf32> to vector<256x128xbf16>
      %c0_68 = arith.constant 0 : index
      %c0_69 = arith.constant 0 : index
      %61 = vector.load %arg4[%c0_68, %c0_69] : memref<128x16xbf16, #tpu.memory_space<vmem>>, vector<128x16xbf16>
      %cst_70 = arith.constant dense<0.000000e+00> : vector<256x16xf32>
      %62 = tpu.matmul %60, %61, %cst_70 {dimension_numbers = #tpu.dot_dimension_numbers<[1], [0], [0], [1], [0, 0, 1, 1], [], []>} : vector<256x128xbf16>, vector<128x16xbf16>, vector<256x16xf32> -> vector<256x16xf32>
      %c0_71 = arith.constant 0 : index
      %c0_72 = arith.constant 0 : index
      %63 = vector.load %arg5[%c0_71, %c0_72] : memref<1x16xf32, #tpu.memory_space<vmem>>, vector<1x16xf32>
      %64 = vector.broadcast %63 : vector<1x16xf32> to vector<256x16xf32>
      %65 = arith.addf %62, %64 : vector<256x16xf32>
      %66 = vector.extract_strided_slice %10 {offsets = [0, 0, 3], sizes = [16, 16, 1], strides = [1, 1, 1]} : vector<16x16x16xf32> to vector<16x16x1xf32>
      %c0_73 = arith.constant 0 : index
      %c7_74 = arith.constant 7 : index
      %c3 = arith.constant 3 : index
      %67 = vector.load %arg7[%c0_73, %c7_74, %c3] : memref<18x25x16xf32, #tpu.memory_space<vmem>>, vector<16x16x1xf32>
      %68 = arith.maximumf %66, %67 : vector<16x16x1xf32>
      %c0_75 = arith.constant 0 : index
      %c8_76 = arith.constant 8 : index
      %c3_77 = arith.constant 3 : index
      %69 = vector.load %arg7[%c0_75, %c8_76, %c3_77] : memref<18x25x16xf32, #tpu.memory_space<vmem>>, vector<16x16x1xf32>
      %70 = arith.maximumf %68, %69 : vector<16x16x1xf32>
      %c0_78 = arith.constant 0 : index
      %c9_79 = arith.constant 9 : index
      %c3_80 = arith.constant 3 : index
      %71 = vector.load %arg7[%c0_78, %c9_79, %c3_80] : memref<18x25x16xf32, #tpu.memory_space<vmem>>, vector<16x16x1xf32>
      %72 = arith.maximumf %70, %71 : vector<16x16x1xf32>
      %c1_81 = arith.constant 1 : index
      %c7_82 = arith.constant 7 : index
      %c3_83 = arith.constant 3 : index
      %73 = vector.load %arg7[%c1_81, %c7_82, %c3_83] : memref<18x25x16xf32, #tpu.memory_space<vmem>>, vector<16x16x1xf32>
      %74 = arith.maximumf %72, %73 : vector<16x16x1xf32>
      %c1_84 = arith.constant 1 : index
      %c9_85 = arith.constant 9 : index
      %c3_86 = arith.constant 3 : index
      %75 = vector.load %arg7[%c1_84, %c9_85, %c3_86] : memref<18x25x16xf32, #tpu.memory_space<vmem>>, vector<16x16x1xf32>
      %76 = arith.maximumf %74, %75 : vector<16x16x1xf32>
      %c2_87 = arith.constant 2 : index
      %c7_88 = arith.constant 7 : index
      %c3_89 = arith.constant 3 : index
      %77 = vector.load %arg7[%c2_87, %c7_88, %c3_89] : memref<18x25x16xf32, #tpu.memory_space<vmem>>, vector<16x16x1xf32>
      %78 = arith.maximumf %76, %77 : vector<16x16x1xf32>
      %c2_90 = arith.constant 2 : index
      %c8_91 = arith.constant 8 : index
      %c3_92 = arith.constant 3 : index
      %79 = vector.load %arg7[%c2_90, %c8_91, %c3_92] : memref<18x25x16xf32, #tpu.memory_space<vmem>>, vector<16x16x1xf32>
      %80 = arith.maximumf %78, %79 : vector<16x16x1xf32>
      %c2_93 = arith.constant 2 : index
      %c9_94 = arith.constant 9 : index
      %c3_95 = arith.constant 3 : index
      %81 = vector.load %arg7[%c2_93, %c9_94, %c3_95] : memref<18x25x16xf32, #tpu.memory_space<vmem>>, vector<16x16x1xf32>
      %82 = arith.maximumf %80, %81 : vector<16x16x1xf32>
      %cst_96 = arith.constant 1.000000e-01 : f32
      %83 = vector.broadcast %cst_96 : f32 to vector<16x16x1xf32>
      %84 = arith.cmpf ogt, %82, %83 : vector<16x16x1xf32>
      %85 = arith.extui %84 : vector<16x16x1xi1> to vector<16x16x1xi32>
      %86 = arith.sitofp %85 : vector<16x16x1xi32> to vector<16x16x1xf32>
      %87 = vector.shape_cast %86 : vector<16x16x1xf32> to vector<256x1xf32>
      %88 = vector.broadcast %87 : vector<256x1xf32> to vector<256x16xf32>
      %89 = arith.mulf %65, %88 : vector<256x16xf32>
      %90 = arith.addf %45, %89 : vector<256x16xf32>
      %91 = vector.shape_cast %90 : vector<256x16xf32> to vector<16x16x16xf32>
      %c1_97 = arith.constant 1 : index
      %c8_98 = arith.constant 8 : index
      %c0_99 = arith.constant 0 : index
      %92 = vector.load %arg7[%c1_97, %c8_98, %c0_99] : memref<18x25x16xf32, #tpu.memory_space<vmem>>, vector<16x16x16xf32>
      tpu.vector_store %arg7[%c1_97, %c8_98, %c0_99], %91 {strides = array<i32>} : memref<18x25x16xf32, #tpu.memory_space<vmem>>, vector<16x16x16xf32>,
    }
    %c1_7 = arith.constant 1 : index
    %c8_8 = arith.constant 8 : index
    %c0_9 = arith.constant 0 : index
    %6 = vector.load %arg7[%c1_7, %c8_8, %c0_9] : memref<18x25x16xf32, #tpu.memory_space<vmem>>, vector<16x16x16xf32>
    %c0_10 = arith.constant 0 : index
    %c0_11 = arith.constant 0 : index
    %c0_12 = arith.constant 0 : index
    %c0_13 = arith.constant 0 : index
    %7 = vector.load %arg6[%c0_10, %c0_11, %c0_12, %c0_13] : memref<1x16x16x16xf32, #tpu.memory_space<vmem>>, vector<1x16x16x16xf32>
    %8 = vector.shape_cast %7 : vector<1x16x16x16xf32> to vector<16x16x16xf32>
    %9 = vector.shape_cast %6 : vector<16x16x16xf32> to vector<1x16x16x16xf32>
    tpu.vector_store %arg6[%c0_10, %c0_11, %c0_12, %c0_13], %9 {strides = array<i32>} : memref<1x16x16x16xf32, #tpu.memory_space<vmem>>, vector<1x16x16x16xf32>,
    return
  }
  func.func @transform_0(%arg0: i32) -> (i32, i32, i32, i32) {
    %c0_i32 = arith.constant 0 : i32
    %c0_i32_0 = arith.constant 0 : i32
    %c0_i32_1 = arith.constant 0 : i32
    %c0_i32_2 = arith.constant 0 : i32
    return %arg0, %c0_i32, %c0_i32_0, %c0_i32_1 : i32, i32, i32, i32
  }
  func.func @transform_1(%arg0: i32) -> (i32, i32) {
    %c0_i32 = arith.constant 0 : i32
    %c0_i32_0 = arith.constant 0 : i32
    %c0_i32_1 = arith.constant 0 : i32
    return %c0_i32, %c0_i32_0 : i32, i32
  }
  func.func @transform_2(%arg0: i32) -> (i32, i32) {
    %c0_i32 = arith.constant 0 : i32
    %c0_i32_0 = arith.constant 0 : i32
    %c0_i32_1 = arith.constant 0 : i32
    return %c0_i32, %c0_i32_0 : i32, i32
  }
  func.func @transform_3(%arg0: i32) -> (i32, i32) {
    %c0_i32 = arith.constant 0 : i32
    %c0_i32_0 = arith.constant 0 : i32
    %c0_i32_1 = arith.constant 0 : i32
    return %c0_i32, %c0_i32_0 : i32, i32
  }
  func.func @transform_4(%arg0: i32) -> (i32, i32) {
    %c0_i32 = arith.constant 0 : i32
    %c0_i32_0 = arith.constant 0 : i32
    %c0_i32_1 = arith.constant 0 : i32
    return %c0_i32, %c0_i32_0 : i32, i32
  }
  func.func @transform_5(%arg0: i32) -> (i32, i32, i32, i32) {
    %c0_i32 = arith.constant 0 : i32
    %c0_i32_0 = arith.constant 0 : i32
    %c0_i32_1 = arith.constant 0 : i32
    %c0_i32_2 = arith.constant 0 : i32
    return %arg0, %c0_i32, %c0_i32_0, %c0_i32_1 : i32, i32, i32, i32
  }
}

</mosaic_0001>

<bundles_post_ra>
// kernel: tpu_custom_call.1
= control target key start
LH: loop header
LB: loop body
LE: loop exit
PB: predicated region body
PF: predicated region fallthrough
CT: control target
= control target key end

     0   :  { %10 = vsyncpa [#allocation5], 0  ;;  %s5490_s0 = inlined_call_operand.hbm [shape: f32[2,16,16,16], index: 0, kind: input, shape index: {}]   ;;  %s5491_s1 = inlined_call_operand.vmem [shape: bf16[48,128], index: 1, kind: input, shape index: {}]   ;;  %s5492_s2 = inlined_call_operand.vmem [shape: f32[1,128], index: 2, kind: input, shape index: {}]   ;;  %s5493_s3 = inlined_call_operand.vmem [shape: bf16[128,16], index: 3, kind: input, shape index: {}]   ;;  %s5494_s4 = inlined_call_operand.vmem [shape: f32[1,16], index: 4, kind: input, shape index: {}]   ;;  %s5495_s5 = inlined_call_operand.hbm [shape: f32[2,16,16,16], index: 5, kind: output, shape index: {}]  }
   0x1   :  { %12 = vsyncpa [#allocation5 + $0x1], 0 }
   0x2   :  { %13 = vsyncpa [#allocation6], 0 }
   0x3   :  { %15 = vsyncpa [#allocation6 + $0x1], 0  ;;  %s3658_s18 = smov 0   ;;  %s3660_s19 = smov 0  }
   0x4   :  { %s3662_s20 = smov 0   ;;  %s3664_s21 = smov 0  }
   0x5 LB: > { %s3679_s22 = sadd.s32 4294967295, %s3611_s21   ;;  %s3133_s23 = sadd.s32 4294967294, %s3611_s21   ;;  %s3611_s21 = sphi %s3664_s21, %s5671_s21   ;;  %s3607_s20 = sphi %s3662_s20, %s5670_s20   ;;  %s3603_s19 = sphi %s3660_s19, %s5669_s19   ;;  %s3599_s18 = sphi %s3658_s18, %s5668_s18  }
   0x6   : > { %s3683_s24 = sadd.s32 1, %s3611_s21   ;;  %s28_s25 = sadd.s32 1, %s3607_s20 }
   0x7   : > { %s25_s26 = ssub.s32 %s3611_s21, %s3683_s24  ;;  %p35_p0 = scmp.ne.s32.totalorder %s3607_s20, %s3603_s19 }
   0x8   : > { %p26_p1 = scmp.eq.s32.totalorder %s25_s26, 0  ;;  %p36_p2 = scmp.eq.s32.totalorder %s3611_s21, 0 }
   0x9   : > { %p41_p3 = scmp.ne.s32.totalorder %s3603_s19, %s3599_s18  ;;  %p42_p4 = scmp.eq.s32.totalorder %s3679_s22, 0 }
   0xa   : > { %s3695_s27 = scalar_select %p26_p1, %s3607_s20, %s28_s25  }
   0xb   : > { %p3697_p5 = por %p36_p2, %p35_p0  ;;  %p3701_p6 = por %p42_p4, %p41_p3 }
   0xc   : > { %p149_p7 = scmp.eq.s32.totalorder %s3679_s22, 1  ;;  %p155_p8 = scmp.eq.s32.totalorder %s3133_s23, 1 }
   0xd   : > { %p3367_p10 = scmp.lt.s32.totalorder %s3611_s21, 2  ;;  %s187_s7 = sand.u32 1, %s3607_s20  }
   0xe   : > { %p3708_p11 = por %p149_p7, %p35_p0  ;;  %p3712_p12 = por %p155_p8, %p41_p3 }
   0xf   : > { %s3208_s8 = sshll.u32 %s3611_s21, 12  ;;  %s3136_s9 = sshll.u32 %s187_s7, 8 }
  0x10   : > { %s5560_s30 = scalar_select %p3708_p11, 1, 0 }
  0x11   : > { %s5561_s6 = scalar_select %p3712_p12, 1, 0 }
  0x12   : > { %s3721_s12 = scalar_lea.hbm %s5490_s0, %s3208_s8  ;;  %s191_s13 = scalar_lea.vmem [#allocation4], %s3136_s9 }
  0x13   : > { %s198_s14 = sshll.u32 %s191_s13, 4  ;;  %p3725_p13 = pnand %p3367_p10, %p3697_p5  ;;  %s3729_s14 = int_to_ptr.vmem [resolvable:$true] %s198_s14 }
  0x14   : > { %s3731_s16 = scalar_lea.sflag [#allocation5], %s187_s7  ;;  %s3511_s17 = scalar_lea.hbm %s3721_s12, 4096 }
  0x15   : > { %p3512_p0 = scmp.ne.s32.totalorder %s3721_s12, %s3511_s17  ;;  %p3513_p1 = pneg %p3725_p13 }
  0x16   : > { %s3516_s26 = scalar_lea.hbm %s5490_s0, 8192  ;;  %p3517_p4 = scmp.lt.u32.totalorder %s3721_s12, %s5490_s0 }
  0x17   : > { %p3514_p2 = pnand %p3513_p1, %p3512_p0  ;;  %p3518_p5 = scmp.lt.u32.totalorder %s3516_s26, %s3511_s17 }
  0x18   : > { %p3520_p8 = scmp.lt.u32.totalorder %s3511_s17, %s3721_s12 }
  0x19   : > { %p3515_p3 = pneg %p3514_p2  ;;  %p3519_p7 = por %p3518_p5, %p3517_p4 }
  0x1b   : > { %p3521_p10 = por %p3520_p8, %p3519_p7 }
  0x1d   : > { %p3522_p9 = pnand %p3521_p10, %p3515_p3 }
  0x1f   : > { %3525 = shalt.err (!%p3522_p9)
}
  0x20   : > { %s3526_s7 = scalar_lea.vmem %s3729_s14, 4096  ;;  %s3617_s9 = smov [#allocation4]  }
  0x21   : > { %p3527_p0 = scmp.ne.s32.totalorder %s3729_s14, %s3526_s7  ;;  %s3531_s10 = sshll.u32 %s3617_s9, 4  ;;  %s3532_s10 = int_to_ptr.vmem [resolvable:$false] %s3531_s10 }
  0x22   : > { %s3533_s11 = scalar_lea.vmem %s3532_s10, 8192  ;;  %p3534_p11 = scmp.lt.s32.totalorder %s3729_s14, %s3532_s10 }
  0x23   : > { %p3529_p2 = pnand %p3527_p0, %p3513_p1  ;;  %p3535_p4 = scmp.lt.s32.totalorder %s3533_s11, %s3526_s7 }
  0x25   : > { %p3530_p12 = pneg %p3529_p2  ;;  %p3536_p5 = por %p3535_p4, %p3534_p11 }
  0x27   : > { %p3537_p7 = pnand %p3536_p5, %p3530_p12 }
  0x29   : > { %3540 = shalt.err (!%p3537_p7)
}
  0x2a   : > { %s3618_s13 = smov 128   ;;  %s3619_s17 = smov 8  }
  0x2b   : > { %3362 = dma.hbm_to_vmem [thread:$0]  (!%p3725_p13), %s3721_s12, 4096, %s3729_s14, %s3731_s16, %s3618_s13, %s3618_s13, %s3619_s17  }
  0x2c   : > { %p3139_p9 = scmp.ge.s32.totalorder %s3611_s21, 1  ;;  %p206_p1 = scmp.lt.s32.totalorder %s3611_s21, 3 }
  0x2e   : > { %p207_p3 = pnand %p3139_p9, %p206_p1 }
  0x2f   : > { %s3762_s23 = sand.u32 (!%p207_p3), 1, %s3603_s19  }
  0x30   : > { %210 = sbr.rel (%p207_p3) target bundleno = 844 (0x34c), region = 40  ;;  %s3140_s25 = sshll.u32 (!%p207_p3), %s3762_s23, 8 }
  0x31   : > { %s213_s26 = scalar_lea.sflag (!%p207_p3), [#allocation5], %s3762_s23  ;;  %s3768_s28 = scalar_lea.vmem (!%p207_p3), [#allocation4], %s3140_s25 }
  0x37   : > { %3590 = dma.done.wait (%p3701_p6), %s213_s26, 4096  }
  0x38   : > { %3592 = vsyncadd (%p3701_p6), %s213_s26, 4294963200  ;;  %vm244_vm0 = vcmask 130048   ;;  %vm248_vm1 = vcmask 122880   ;;  %v3620_v0 = vmov 0.0   ;;  %v318_v1 = vld [vmem:[%s3768_s28] sm:$0xff]  ;;  %v319_v2 = vld [vmem:[%s3768_s28 + $0x8] sm:$0xff] }
  0x39   : > { %251 = vst.msk [vmem:[#allocation2 + $0x28] sm:$0xff] %vm244_vm0, %v3620_v0  ;;  %245 = vst.msk [vmem:[#allocation2] sm:$0xff] %vm244_vm0, %v3620_v0  ;;  %v320_v3 = vld [vmem:[%s3768_s28 + $0x10] sm:$0xff]  ;;  %v321_v4 = vld [vmem:[%s3768_s28 + $0x18] sm:$0xff]  ;;  %s3984_s29 = scalar_lea.vmem [#allocation7], %s3140_s25  ;;  %s3986_s12 = smov 0  }
  0x3a   : > { %246 = vst.msk [vmem:[#allocation2 + $0x8] sm:$0xff] %vm244_vm0, %v3620_v0  ;;  %247 = vst.msk [vmem:[#allocation2 + $0x10] sm:$0xff] %vm244_vm0, %v3620_v0  ;;  %v322_v5 = vld [vmem:[%s3768_s28 + $0x20] sm:$0xff]  ;;  %v323_v6 = vld [vmem:[%s3768_s28 + $0x28] sm:$0xff] }
  0x3b   : > { %250 = vst.msk [vmem:[#allocation2 + $0x20] sm:$0xff] %vm244_vm0, %v3620_v0  ;;  %252 = vst.msk [vmem:[#allocation2 + $0x30] sm:$0xff] %vm244_vm0, %v3620_v0  ;;  %v324_v7 = vld [vmem:[%s3768_s28 + $0x30] sm:$0xff]  ;;  %v325_v8 = vld [vmem:[%s3768_s28 + $0x38] sm:$0xff] }
  0x3c   : > { %254 = vst.msk [vmem:[#allocation2 + $0x40] sm:$0xff] %vm244_vm0, %v3620_v0  ;;  %255 = vst.msk [vmem:[#allocation2 + $0x48] sm:$0xff] %vm244_vm0, %v3620_v0  ;;  %v326_v9 = vld [vmem:[%s3768_s28 + $0x40] sm:$0xff]  ;;  %v327_v10 = vld [vmem:[%s3768_s28 + $0x48] sm:$0xff] }
  0x3d   : > { %256 = vst.msk [vmem:[#allocation2 + $0x50] sm:$0xff] %vm244_vm0, %v3620_v0  ;;  %258 = vst.msk [vmem:[#allocation2 + $0x60] sm:$0xff] %vm244_vm0, %v3620_v0  ;;  %v328_v11 = vld [vmem:[%s3768_s28 + $0x50] sm:$0xff]  ;;  %v329_v12 = vld [vmem:[%s3768_s28 + $0x58] sm:$0xff] }
  0x3e   : > { %259 = vst.msk [vmem:[#allocation2 + $0x68] sm:$0xff] %vm244_vm0, %v3620_v0  ;;  %260 = vst.msk [vmem:[#allocation2 + $0x70] sm:$0xff] %vm244_vm0, %v3620_v0  ;;  %v330_v13 = vld [vmem:[%s3768_s28 + $0x60] sm:$0xff]  ;;  %v331_v14 = vld [vmem:[%s3768_s28 + $0x68] sm:$0xff] }
  0x3f   : > { %262 = vst.msk [vmem:[#allocation2 + $0x80] sm:$0xff] %vm244_vm0, %v3620_v0  ;;  %263 = vst.msk [vmem:[#allocation2 + $0x88] sm:$0xff] %vm244_vm0, %v3620_v0  ;;  %v332_v15 = vld [vmem:[%s3768_s28 + $0x70] sm:$0xff]  ;;  %v333_v16 = vld [vmem:[%s3768_s28 + $0x78] sm:$0xff] }
  0x40   : > { %264 = vst.msk [vmem:[#allocation2 + $0x90] sm:$0xff] %vm244_vm0, %v3620_v0  ;;  %266 = vst.msk [vmem:[#allocation2 + $0xa0] sm:$0xff] %vm244_vm0, %v3620_v0  ;;  %v334_v17 = vld [vmem:[%s3768_s28 + $0x80] sm:$0xff]  ;;  %v335_v18 = vld [vmem:[%s3768_s28 + $0x88] sm:$0xff] }
  0x41   : > { %267 = vst.msk [vmem:[#allocation2 + $0xa8] sm:$0xff] %vm244_vm0, %v3620_v0  ;;  %268 = vst.msk [vmem:[#allocation2 + $0xb0] sm:$0xff] %vm244_vm0, %v3620_v0  ;;  %v336_v19 = vld [vmem:[%s3768_s28 + $0x90] sm:$0xff]  ;;  %v337_v20 = vld [vmem:[%s3768_s28 + $0x98] sm:$0xff] }
  0x42   : > { %270 = vst.msk [vmem:[#allocation2 + $0xc0] sm:$0xff] %vm244_vm0, %v3620_v0  ;;  %271 = vst.msk [vmem:[#allocation2 + $0xc8] sm:$0xff] %vm244_vm0, %v3620_v0  ;;  %v338_v21 = vld [vmem:[%s3768_s28 + $0xa0] sm:$0xff]  ;;  %v339_v22 = vld [vmem:[%s3768_s28 + $0xa8] sm:$0xff] }
  0x43   : > { %272 = vst.msk [vmem:[#allocation2 + $0xd0] sm:$0xff] %vm244_vm0, %v3620_v0  ;;  %274 = vst.msk [vmem:[#allocation2 + $0xe0] sm:$0xff] %vm244_vm0, %v3620_v0  ;;  %v340_v23 = vld [vmem:[%s3768_s28 + $0xb0] sm:$0xff]  ;;  %v341_v24 = vld [vmem:[%s3768_s28 + $0xb8] sm:$0xff] }
  0x44   : > { %275 = vst.msk [vmem:[#allocation2 + $0xe8] sm:$0xff] %vm244_vm0, %v3620_v0  ;;  %276 = vst.msk [vmem:[#allocation2 + $0xf0] sm:$0xff] %vm244_vm0, %v3620_v0  ;;  %v342_v25 = vld [vmem:[%s3768_s28 + $0xc0] sm:$0xff]  ;;  %v343_v26 = vld [vmem:[%s3768_s28 + $0xc8] sm:$0xff] }
  0x45   : > { %278 = vst.msk [vmem:[#allocation2 + $0x100] sm:$0xff] %vm244_vm0, %v3620_v0  ;;  %279 = vst.msk [vmem:[#allocation2 + $0x108] sm:$0xff] %vm244_vm0, %v3620_v0  ;;  %v344_v27 = vld [vmem:[%s3768_s28 + $0xd0] sm:$0xff]  ;;  %v345_v28 = vld [vmem:[%s3768_s28 + $0xd8] sm:$0xff] }
  0x46   : > { %280 = vst.msk [vmem:[#allocation2 + $0x110] sm:$0xff] %vm244_vm0, %v3620_v0  ;;  %282 = vst.msk [vmem:[#allocation2 + $0x120] sm:$0xff] %vm244_vm0, %v3620_v0  ;;  %v346_v29 = vld [vmem:[%s3768_s28 + $0xe0] sm:$0xff]  ;;  %v347_v30 = vld [vmem:[%s3768_s28 + $0xe8] sm:$0xff] }
  0x47   : > { %283 = vst.msk [vmem:[#allocation2 + $0x128] sm:$0xff] %vm244_vm0, %v3620_v0  ;;  %284 = vst.msk [vmem:[#allocation2 + $0x130] sm:$0xff] %vm244_vm0, %v3620_v0  ;;  %v348_v31 = vld [vmem:[%s3768_s28 + $0xf0] sm:$0xff]  ;;  %v349_v32 = vld [vmem:[%s3768_s28 + $0xf8] sm:$0xff] }
  0x48   : > { %286 = vst.msk [vmem:[#allocation2 + $0x140] sm:$0xff] %vm244_vm0, %v3620_v0  ;;  %287 = vst.msk [vmem:[#allocation2 + $0x148] sm:$0xff] %vm244_vm0, %v3620_v0 }
  0x49   : > { %288 = vst.msk [vmem:[#allocation2 + $0x150] sm:$0xff] %vm244_vm0, %v3620_v0  ;;  %290 = vst.msk [vmem:[#allocation2 + $0x160] sm:$0xff] %vm244_vm0, %v3620_v0 }
  0x4a   : > { %291 = vst.msk [vmem:[#allocation2 + $0x168] sm:$0xff] %vm244_vm0, %v3620_v0  ;;  %292 = vst.msk [vmem:[#allocation2 + $0x170] sm:$0xff] %vm244_vm0, %v3620_v0 }
  0x4b   : > { %294 = vst.msk [vmem:[#allocation2 + $0x180] sm:$0xff] %vm244_vm0, %v3620_v0  ;;  %295 = vst.msk [vmem:[#allocation2 + $0x188] sm:$0xff] %vm244_vm0, %v3620_v0 }
  0x4c   : > { %296 = vst.msk [vmem:[#allocation2 + $0x190] sm:$0xff] %vm244_vm0, %v3620_v0  ;;  %298 = vst.msk [vmem:[#allocation2 + $0x1a0] sm:$0xff] %vm244_vm0, %v3620_v0 }
  0x4d   : > { %299 = vst.msk [vmem:[#allocation2 + $0x1a8] sm:$0xff] %vm244_vm0, %v3620_v0  ;;  %300 = vst.msk [vmem:[#allocation2 + $0x1b0] sm:$0xff] %vm244_vm0, %v3620_v0 }
  0x4e   : > { %302 = vst.msk [vmem:[#allocation2 + $0x1c0] sm:$0xff] %vm244_vm0, %v3620_v0  ;;  %303 = vst.msk [vmem:[#allocation2 + $0x1c8] sm:$0xff] %vm244_vm0, %v3620_v0 }
  0x4f   : > { %304 = vst.msk [vmem:[#allocation2 + $0x1d0] sm:$0xff] %vm244_vm0, %v3620_v0  ;;  %306 = vst.msk [vmem:[#allocation2 + $0x1e0] sm:$0xff] %vm244_vm0, %v3620_v0 }
  0x50   : > { %307 = vst.msk [vmem:[#allocation2 + $0x1e8] sm:$0xff] %vm244_vm0, %v3620_v0  ;;  %308 = vst.msk [vmem:[#allocation2 + $0x1f0] sm:$0xff] %vm244_vm0, %v3620_v0 }
  0x51   : > { %310 = vst.msk [vmem:[#allocation2 + $0x200] sm:$0xff] %vm244_vm0, %v3620_v0  ;;  %311 = vst.msk [vmem:[#allocation2 + $0x208] sm:$0xff] %vm244_vm0, %v3620_v0 }
  0x52   : > { %312 = vst.msk [vmem:[#allocation2 + $0x210] sm:$0xff] %vm244_vm0, %v3620_v0  ;;  %314 = vst.msk [vmem:[#allocation2 + $0x220] sm:$0xff] %vm244_vm0, %v3620_v0 }
  0x53   : > { %315 = vst.msk [vmem:[#allocation2 + $0x228] sm:$0xff] %vm244_vm0, %v3620_v0  ;;  %316 = vst.msk [vmem:[#allocation2 + $0x230] sm:$0xff] %vm244_vm0, %v3620_v0 }
  0x54   : > { %249 = vst.msk [vmem:[#allocation2 + $0x18] sm:$0x1] %vm248_vm1, %v3620_v0  ;;  %253 = vst.msk [vmem:[#allocation2 + $0x38] sm:$0x1] %vm248_vm1, %v3620_v0 }
  0x55   : > { %257 = vst.msk [vmem:[#allocation2 + $0x58] sm:$0x1] %vm248_vm1, %v3620_v0  ;;  %261 = vst.msk [vmem:[#allocation2 + $0x78] sm:$0x1] %vm248_vm1, %v3620_v0 }
  0x56   : > { %265 = vst.msk [vmem:[#allocation2 + $0x98] sm:$0x1] %vm248_vm1, %v3620_v0  ;;  %269 = vst.msk [vmem:[#allocation2 + $0xb8] sm:$0x1] %vm248_vm1, %v3620_v0 }
  0x57   : > { %273 = vst.msk [vmem:[#allocation2 + $0xd8] sm:$0x1] %vm248_vm1, %v3620_v0  ;;  %277 = vst.msk [vmem:[#allocation2 + $0xf8] sm:$0x1] %vm248_vm1, %v3620_v0 }
  0x58   : > { %281 = vst.msk [vmem:[#allocation2 + $0x118] sm:$0x1] %vm248_vm1, %v3620_v0  ;;  %285 = vst.msk [vmem:[#allocation2 + $0x138] sm:$0x1] %vm248_vm1, %v3620_v0 }
  0x59   : > { %289 = vst.msk [vmem:[#allocation2 + $0x158] sm:$0x1] %vm248_vm1, %v3620_v0  ;;  %293 = vst.msk [vmem:[#allocation2 + $0x178] sm:$0x1] %vm248_vm1, %v3620_v0 }
  0x5a   : > { %297 = vst.msk [vmem:[#allocation2 + $0x198] sm:$0x1] %vm248_vm1, %v3620_v0  ;;  %301 = vst.msk [vmem:[#allocation2 + $0x1b8] sm:$0x1] %vm248_vm1, %v3620_v0 }
  0x5b   : > { %305 = vst.msk [vmem:[#allocation2 + $0x1d8] sm:$0x1] %vm248_vm1, %v3620_v0  ;;  %309 = vst.msk [vmem:[#allocation2 + $0x1f8] sm:$0x1] %vm248_vm1, %v3620_v0 }
  0x5c   : > { %313 = vst.msk [vmem:[#allocation2 + $0x218] sm:$0x1] %vm248_vm1, %v3620_v0  ;;  %317 = vst.msk [vmem:[#allocation2 + $0x238] sm:$0x1] %vm248_vm1, %v3620_v0 }
  0x5d   : > { %351 = vst.msk [vmem:[#allocation2 + $0x28] sm:$0xff] %vm244_vm0, %v318_v1  ;;  %352 = vst.msk [vmem:[#allocation2 + $0x30] sm:$0xff] %vm244_vm0, %v319_v2 }
  0x5e   : > { %353 = vst.msk [vmem:[#allocation2 + $0x48] sm:$0xff] %vm244_vm0, %v320_v3  ;;  %354 = vst.msk [vmem:[#allocation2 + $0x50] sm:$0xff] %vm244_vm0, %v321_v4 }
  0x5f   : > { %355 = vst.msk [vmem:[#allocation2 + $0x68] sm:$0xff] %vm244_vm0, %v322_v5  ;;  %356 = vst.msk [vmem:[#allocation2 + $0x70] sm:$0xff] %vm244_vm0, %v323_v6 }
  0x60   : > { %357 = vst.msk [vmem:[#allocation2 + $0x88] sm:$0xff] %vm244_vm0, %v324_v7  ;;  %358 = vst.msk [vmem:[#allocation2 + $0x90] sm:$0xff] %vm244_vm0, %v325_v8 }
  0x61   : > { %359 = vst.msk [vmem:[#allocation2 + $0xa8] sm:$0xff] %vm244_vm0, %v326_v9  ;;  %360 = vst.msk [vmem:[#allocation2 + $0xb0] sm:$0xff] %vm244_vm0, %v327_v10 }
  0x62   : > { %361 = vst.msk [vmem:[#allocation2 + $0xc8] sm:$0xff] %vm244_vm0, %v328_v11  ;;  %362 = vst.msk [vmem:[#allocation2 + $0xd0] sm:$0xff] %vm244_vm0, %v329_v12 }
  0x63   : > { %363 = vst.msk [vmem:[#allocation2 + $0xe8] sm:$0xff] %vm244_vm0, %v330_v13  ;;  %364 = vst.msk [vmem:[#allocation2 + $0xf0] sm:$0xff] %vm244_vm0, %v331_v14 }
  0x64   : > { %365 = vst.msk [vmem:[#allocation2 + $0x108] sm:$0xff] %vm244_vm0, %v332_v15  ;;  %366 = vst.msk [vmem:[#allocation2 + $0x110] sm:$0xff] %vm244_vm0, %v333_v16 }
  0x65   : > { %367 = vst.msk [vmem:[#allocation2 + $0x128] sm:$0xff] %vm244_vm0, %v334_v17  ;;  %368 = vst.msk [vmem:[#allocation2 + $0x130] sm:$0xff] %vm244_vm0, %v335_v18 }
  0x66   : > { %369 = vst.msk [vmem:[#allocation2 + $0x148] sm:$0xff] %vm244_vm0, %v336_v19  ;;  %370 = vst.msk [vmem:[#allocation2 + $0x150] sm:$0xff] %vm244_vm0, %v337_v20 }
  0x67   : > { %371 = vst.msk [vmem:[#allocation2 + $0x168] sm:$0xff] %vm244_vm0, %v338_v21  ;;  %372 = vst.msk [vmem:[#allocation2 + $0x170] sm:$0xff] %vm244_vm0, %v339_v22 }
  0x68   : > { %373 = vst.msk [vmem:[#allocation2 + $0x188] sm:$0xff] %vm244_vm0, %v340_v23  ;;  %374 = vst.msk [vmem:[#allocation2 + $0x190] sm:$0xff] %vm244_vm0, %v341_v24 }
  0x69   : > { %375 = vst.msk [vmem:[#allocation2 + $0x1a8] sm:$0xff] %vm244_vm0, %v342_v25  ;;  %376 = vst.msk [vmem:[#allocation2 + $0x1b0] sm:$0xff] %vm244_vm0, %v343_v26 }
  0x6a   : > { %377 = vst.msk [vmem:[#allocation2 + $0x1c8] sm:$0xff] %vm244_vm0, %v344_v27  ;;  %378 = vst.msk [vmem:[#allocation2 + $0x1d0] sm:$0xff] %vm244_vm0, %v345_v28 }
  0x6b   : > { %379 = vst.msk [vmem:[#allocation2 + $0x1e8] sm:$0xff] %vm244_vm0, %v346_v29  ;;  %380 = vst.msk [vmem:[#allocation2 + $0x1f0] sm:$0xff] %vm244_vm0, %v347_v30 }
  0x6c   : > { %381 = vst.msk [vmem:[#allocation2 + $0x208] sm:$0xff] %vm244_vm0, %v348_v31  ;;  %382 = vst.msk [vmem:[#allocation2 + $0x210] sm:$0xff] %vm244_vm0, %v349_v32 }
  0x6d LB: >> { %v3991_v33 = vld [vmem:[#allocation2 + $0x29] sm:$0xff]  ;;  %v4014_v50 = vld [vmem:[#allocation2 + $0x31] sm:$0xff]  ;;  %s3621_s14 = smov 16   ;;  %s3622_s15 = smov 32   ;;  %vm1350_vm2 = vcmask 261248   ;;  %vm1511_vm3 = vcmask 392448   ;;  %s3615_s12 = sphi %s3986_s12, %s388_s12  }
  0x6e   : >> { %v3993_v34 = vld [vmem:[#allocation2 + $0x49] sm:$0xff]  ;;  %v485_v39 = vmul.f32 2.0, %v3991_v33  ;;  %v4016_v51 = vld [vmem:[#allocation2 + $0x51] sm:$0xff]  ;;  %v486_v58 = vmul.f32 2.0, %v4014_v50  ;;  %vm1623_vm4 = vcmask 392192   ;;  %s388_s12 = sadd.s32 1, %s3615_s12  }
  0x6f   : >> { %v3995_v35 = vld [vmem:[#allocation2 + $0x69] sm:$0xff]  ;;  %v487_v36 = vmul.f32 2.0, %v3993_v34  ;;  %v488_v55 = vmul.f32 2.0, %v4016_v51  ;;  %v4036_v63 = vld [vmem:[#allocation2 + $0x71] sm:$0xff]  ;;  %p385_p6 = scmp.ge.s32.totalorder %s388_s12, 3  }
  0x70   : >> { %v3998_v37 = vld [vmem:[#allocation2 + $0x27] sm:$0xff]  ;;  %v489_v40 = vmul.f32 2.0, %v3995_v35  ;;  %v4024_v56 = vld [vmem:[#allocation2 + $0x2f] sm:$0xff]  ;;  %s3209_s12 = sshll.u32 (%p385_p6), %s3679_s22, 12  ;;  %s3055_s16 = sshll.u32 (%p385_p6), %s3984_s29, 4  ;;  %s5430_s16 = int_to_ptr.vmem [resolvable:$true] %s3055_s16 }
  0x71   : >> { %v4000_v38 = vld [vmem:[#allocation2 + $0x47] sm:$0xff]  ;;  %v710_v45 = vmul.f32 2.0, %v3998_v37  ;;  %v519_v46 = vadd.f32 %v487_v36, %v3991_v33  ;;  %v4026_v57 = vld [vmem:[#allocation2 + $0x4f] sm:$0xff]  ;;  %v520_v3 = vadd.f32 %v488_v55, %v4014_v50  ;;  %v711_v5 = vmul.f32 2.0, %v4024_v56  ;;  %s5428_s7 = scalar_lea.hbm (%p385_p6), %s5495_s5, %s3209_s12  ;;  %s3042_s9 = scalar_lea.sflag (%p385_p6), [#allocation6], %s3762_s23 }
  0x72   : >> { %v712_v41 = vmul.f32 2.0, %v4000_v38  ;;  %v4005_v42 = vld [vmem:[#allocation2 + $0x67] sm:$0xff]  ;;  %v4030_v59 = vadd.f32 %v489_v40, %v3993_v34  ;;  %v713_v0 = vmul.f32 2.0, %v4026_v57  ;;  %v4039_v1 = vld [vmem:[#allocation2 + $0x11] sm:$0xff]  ;;  %s3541_s10 = scalar_lea.vmem (%p385_p6), %s5430_s16, 4096  ;;  %p5665_p12 = scmp.ne.s32.totalorder (%p385_p6), %s5560_s30, 0 }
  0x73   : >> { %v872_v43 = vld [vmem:[#allocation2 + $0x68] sm:$0xff]  ;;  %v4019_v52 = vmul.f32 2.0, %v4005_v42  ;;  %v584_v60 = vadd.f32 %v3995_v35, %v519_v46  ;;  %v518_v4 = vadd.f32 %v486_v58, %v4039_v1  ;;  %v871_v6 = vld [vmem:[#allocation2 + $0x50] sm:$0xff]  ;;  %v585_v16 = vadd.f32 %v4036_v63, %v520_v3  ;;  %p3542_p11 = scmp.ne.s32.totalorder (%p385_p6), %s5430_s16, %s3541_s10  ;;  %s3625_s11 = smov (%p385_p6), [#allocation7]  }
  0x74   : >> { %v4007_v44 = vld [vmem:[#allocation2 + $0x9] sm:$0xff]  ;;  %v4011_v47 = vmul.f32 2.0, %v872_v43  ;;  %v4048_v13 = vmul.f32 2.0, %v871_v6  ;;  %s3545_s13 = sshll.u32 (%p385_p6), %s3625_s11, 4  ;;  %s3546_s13 = int_to_ptr.vmem [resolvable:$false] %s3545_s13 }
  0x75   : >> { %v517_v48 = vadd.f32 %v485_v39, %v4007_v44  ;;  %v870_v49 = vld [vmem:[#allocation2 + $0x48] sm:$0xff]  ;;  %v1031_v7 = vld [vmem:[#allocation2 + $0x10] sm:$0xff]  ;;  %v648_v9 = vsub.f32 %v584_v60, %v3998_v37  ;;  %v583_v17 = vadd.f32 %v518_v4, %v4016_v51  ;;  %v649_v26 = vsub.f32 %v585_v16, %v4024_v56  ;;  %p3543_p13 = pnand (%p385_p6), %p3542_p11, %p5665_p12  ;;  %s3547_s17 = scalar_lea.vmem (%p385_p6), %s3546_s13, 8192 }
  0x76   : >> { %v614_v53 = vld [vmem:[#allocation2 + $0x7] sm:$0xff]  ;;  %v4021_v54 = vmul.f32 2.0, %v870_v49  ;;  %v936_v61 = vadd.f32 %v4011_v47, %v4005_v42  ;;  %v615_v12 = vld [vmem:[#allocation2 + $0xf] sm:$0xff]  ;;  %v1063_v18 = vmul.f32 2.0, %v1031_v7  ;;  %v935_v23 = vadd.f32 %v4048_v13, %v4026_v57  ;;  %p3548_p10 = scmp.lt.s32.totalorder (%p385_p6), %s5430_s16, %s3546_s13  ;;  %p3549_p0 = scmp.lt.s32.totalorder (%p385_p6), %s3547_s17, %s3541_s10 }
  0x77   : >> { %v582_v62 = vadd.f32 %v517_v48, %v3993_v34  ;;  %v1030_v8 = vld [vmem:[#allocation2 + $0x8] sm:$0xff]  ;;  %v873_v14 = vld [vmem:[#allocation2 + $0x70] sm:$0xff]  ;;  %v744_v20 = vsub.f32 %v648_v9, %v712_v41  ;;  %v647_v27 = vsub.f32 %v583_v17, %v615_v12  ;;  %v745_v36 = vsub.f32 %v649_v26, %v713_v0  ;;  %p3544_p8 = pneg (%p385_p6), %p3543_p13 }
  0x78   : >> { %v934_v2 = vadd.f32 %v4021_v54, %v4000_v38  ;;  %v968_v10 = vadd.f32 %v936_v61, %v3995_v35  ;;  %v1033_v19 = vld [vmem:[#allocation2 + $0x30] sm:$0xff]  ;;  %v1062_v24 = vmul.f32 2.0, %v1030_v8  ;;  %v4058_v28 = vmul.f32 2.0, %v873_v14  ;;  %v1032_v43 = vld [vmem:[#allocation2 + $0x28] sm:$0xff]  ;;  %p3550_p2 = por (%p385_p6), %p3549_p0, %p3548_p10 }
  0x79   : >> { %v646_v11 = vsub.f32 %v582_v62, %v614_v53  ;;  %v4053_v22 = vld [vmem:[#allocation2 + $0x6f] sm:$0xff]  ;;  %v808_v29 = vsub.f32 %v744_v20, %v4005_v42  ;;  %v967_v31 = vadd.f32 %v935_v23, %v4016_v51  ;;  %v1065_v32 = vmul.f32 2.0, %v1033_v19  ;;  %v4085_v14 = vld [vmem:[#allocation2 + $0x87] sm:$0xff] }
  0x7a   : >> { %v966_v15 = vadd.f32 %v934_v2, %v3993_v34  ;;  %v743_v39 = vsub.f32 %v647_v27, %v711_v5  ;;  %v937_v41 = vadd.f32 %v4058_v28, %v4053_v22  ;;  %v1000_v49 = vsub.f32 %v968_v10, %v3998_v37  ;;  %v4070_v61 = vld [vmem:[#allocation2 + $0x89] sm:$0xff]  ;;  %v4075_v37 = vld [vmem:[#allocation2 + $0x91] sm:$0xff]  ;;  %p3551_p4 = pnand (%p385_p6), %p3550_p2, %p3544_p8 }
  0x7b   : >> { %v742_v21 = vsub.f32 %v646_v11, %v710_v45  ;;  %v840_v45 = vmul.f32 0.125, %v808_v29  ;;  %v999_v48 = vsub.f32 %v967_v31, %v615_v12  ;;  %v1064_v0 = vmul.f32 2.0, %v1032_v43  ;;  %v4078_v4 = vld [vmem:[#allocation2 + $0x8f] sm:$0xff] }
  0x7c   : >> { %v998_v25 = vsub.f32 %v966_v15, %v614_v53  ;;  %v809_v53 = vsub.f32 %v745_v36, %v4053_v22  ;;  %v807_v55 = vsub.f32 %v743_v39, %v4026_v57  ;;  %v969_v60 = vadd.f32 %v937_v41, %v4036_v63  ;;  %v4096_v20 = vld [vmem:[#allocation2 + $0xb1] sm:$0xff]  ;;  %v4105_v31 = vld [vmem:[#allocation2 + $0xa9] sm:$0xff] }
  0x7d   : >> { %v806_v30 = vsub.f32 %v742_v21, %v4000_v38  ;;  %1258 = vrot.lane.b32.xlu1 %v840_v45, %s3621_s14  ;;  %v1095_v62 = vsub.f32 %v999_v48, %v1063_v18  ;;  %v490_v2 = vmul.f32 2.0, %v4036_v63  ;;  %v715_v3 = vmul.f32 2.0, %v4053_v22  ;;  %v876_v21 = vld [vmem:[#allocation2 + $0xa8] sm:$0xff]  ;;  %v875_v27 = vld [vmem:[#allocation2 + $0x90] sm:$0xff] }
  0x7e   : >> { %v1094_v40 = vsub.f32 %v998_v25, %v1062_v24  ;;  %v841_v5 = vmul.f32 0.125, %v809_v53  ;;  %v839_v6 = vmul.f32 0.125, %v807_v55  ;;  %v1001_v8 = vsub.f32 %v969_v60, %v4024_v56  ;;  %v4108_v36 = vld [vmem:[#allocation2 + $0xa7] sm:$0xff] }
  0x7f   : >> { %v838_v46 = vmul.f32 0.125, %v806_v30  ;;  %v1127_v9 = vsub.f32 %v1095_v62, %v4039_v1  ;;  %v1096_v10 = vsub.f32 %v1000_v49, %v1064_v0  ;;  %v522_v11 = vadd.f32 %v490_v2, %v4016_v51 }
  0x80   : >> { %v1126_v58 = vsub.f32 %v1094_v40, %v4007_v44  ;;  %v874_v44 = vld [vmem:[#allocation2 + $0x88] sm:$0xff]  ;;  %v586_v12 = vadd.f32 %v4070_v61, %v4030_v59  ;;  %v1097_v15 = vsub.f32 %v1001_v8, %v1065_v32  ;;  %v492_v17 = vmul.f32 2.0, %v4075_v37 }
  0x81   : >> { %1254 = vrot.lane.b32.xlu0 %v838_v46, %s3621_s14  ;;  %v4087_v16 = vmul.f32 2.0, %v874_v44  ;;  %v717_v18 = vmul.f32 2.0, %v4078_v4  ;;  %1260 = vrot.lane.b32.xlu1 %v841_v5, %s3621_s14  ;;  %v1159_v56 = vmul.f32 0.125, %v1127_v9  ;;  %v1128_v1 = vsub.f32 %v1096_v10, %v3991_v33  ;;  %v4117_v46 = vld [vmem:[#allocation2 + $0xaf] sm:$0xff] }
  0x82   : >> { %v1158_v7 = vmul.f32 0.125, %v1126_v58  ;;  %v587_v19 = vadd.f32 %v4075_v37, %v522_v11  ;;  %v650_v59 = vsub.f32 %v586_v12, %v4000_v38  ;;  %v1129_v23 = vsub.f32 %v1097_v15, %v4014_v50  ;;  %v877_v50 = vld [vmem:[#allocation2 + $0xb0] sm:$0xff] }
  0x83   : >> { %v938_v24 = vadd.f32 %v4087_v16, %v4085_v14  ;;  %v524_v25 = vadd.f32 %v4036_v63, %v492_v17  ;;  %v491_v26 = vmul.f32 2.0, %v4070_v61  ;;  %v1160_v29 = vmul.f32 0.125, %v1128_v1 }
  0x84   : >> { %v651_v33 = vsub.f32 %v587_v19, %v4026_v57  ;;  %v746_v30 = vsub.f32 %v650_v59, %v4019_v52  ;;  %v716_v32 = vmul.f32 2.0, %v4085_v14  ;;  %v1161_v39 = vmul.f32 0.125, %v1129_v23 }
  0x85   : >> { %1256 = vrot.lane.b32.xlu0 %v839_v6, %s3621_s14  ;;  %v589_v40 = vadd.f32 %v4096_v20, %v524_v25  ;;  %v523_v41 = vadd.f32 %v3995_v35, %v491_v26  ;;  %v4112_v43 = vmul.f32 2.0, %v876_v21  ;;  %1417 = vrot.lane.b32.xlu1 %v1159_v56, %s3622_s15  ;;  %v4119_v48 = vmul.f32 2.0, %v875_v27  ;;  %v878_v25 = vld [vmem:[#allocation2 + $0xc8] sm:$0xff] }
  0x86   : >> { %v747_v52 = vsub.f32 %v651_v33, %v715_v3  ;;  %v810_v45 = vsub.f32 %v746_v30, %v4085_v14  ;;  %v970_v49 = vadd.f32 %v938_v24, %v4070_v61  ;;  %v4126_v60 = vmul.f32 2.0, %v877_v50  ;;  %v4157_v26 = vld [vmem:[#allocation2 + $0xcf] sm:$0xff] }
  0x87   : >> { %v653_v53 = vsub.f32 %v589_v40, %v4053_v22  ;;  %v588_v55 = vadd.f32 %v4105_v31, %v523_v41  ;;  %v940_v58 = vadd.f32 %v4112_v43, %v4108_v36  ;;  %v939_v2 = vadd.f32 %v4119_v48, %v4078_v4  ;;  %v880_v41 = vld [vmem:[#allocation2 + $0xe8] sm:$0xff] }
  0x88   : >> { %v811_v62 = vsub.f32 %v747_v52, %v4078_v4  ;;  %v842_v0 = vmul.f32 0.125, %v810_v45  ;;  %v1002_v3 = vsub.f32 %v970_v49, %v4000_v38  ;;  %v941_v6 = vadd.f32 %v4126_v60, %v4117_v46  ;;  %v879_v49 = vld [vmem:[#allocation2 + $0xd0] sm:$0xff] }
  0x89   : >> { %1415 = vrot.lane.b32.xlu0 %v1158_v7, %s3622_s15  ;;  %v749_v44 = vsub.f32 %v653_v53, %v717_v18  ;;  %v652_v5 = vsub.f32 %v588_v55, %v4005_v42  ;;  %v972_v7 = vadd.f32 %v940_v58, %v4105_v31  ;;  %1421 = vrot.lane.b32.xlu1 %v1161_v39, %s3622_s15  ;;  %v494_v11 = vmul.f32 2.0, %v4096_v20  ;;  %v4144_v18 = vld [vmem:[#allocation2 + $0xd1] sm:$0xff]  ;;  %v4175_v53 = vld [vmem:[#allocation2 + $0x28] sm:$0xff] }
  0x8a   : >> { %v843_v8 = vmul.f32 0.125, %v811_v62  ;;  %v971_v9 = vadd.f32 %v939_v2, %v4075_v37  ;;  %v1098_v10 = vsub.f32 %v1002_v3, %v4021_v54  ;;  %v973_v15 = vadd.f32 %v941_v6, %v4096_v20  ;;  %5563 = vst [vmem:[#allocation10_spill] sm:$0xff] %v4175_v53  ;;  %v4177_v55 = vld [vmem:[#allocation2 + $0x48] sm:$0xff]  ;;  %v881_v2 = vld [vmem:[#allocation2 + $0xf0] sm:$0xff]  ;;  %1190 = vst.msk [vmem:[#allocation3] sm:$0xff] %vm244_vm0, %v4175_v53 }
  0x8b   : >> { %v813_v38 = vsub.f32 %v749_v44, %v4117_v46  ;;  %v748_v12 = vsub.f32 %v652_v5, %v716_v32  ;;  %v1004_v17 = vsub.f32 %v972_v7, %v4005_v42  ;;  %v526_v19 = vadd.f32 %v4075_v37, %v494_v11  ;;  %v4165_v32 = vld [vmem:[#allocation2 + $0xc7] sm:$0xff]  ;;  %5564 = vst [vmem:[#allocation11_spill] sm:$0xff] %v4177_v55 }
  0x8c   : >> { %v1003_v56 = vsub.f32 %v971_v9, %v4026_v57  ;;  %v1130_v1 = vsub.f32 %v1098_v10, %v3993_v34  ;;  %v719_v59 = vmul.f32 2.0, %v4117_v46  ;;  %v1005_v23 = vsub.f32 %v973_v15, %v4053_v22  ;;  %1192 = vst.msk [vmem:[#allocation3 + $0x10] sm:$0xff] %vm244_vm0, %v4177_v55  ;;  %v4193_v7 = vld [vmem:[#allocation2 + $0xe7] sm:$0xff]  ;;  %v4197_v10 = vld [vmem:[#allocation2 + $0xef] sm:$0xff] }
  0x8d   : >> { %1419 = vrot.lane.b32.xlu0 %v1160_v29, %s3622_s15  ;;  %v845_v54 = vmul.f32 0.125, %v813_v38  ;;  %v812_v21 = vsub.f32 %v748_v12, %v4108_v36  ;;  %v1100_v24 = vsub.f32 %v1004_v17, %v4011_v47  ;;  %1264 = vrot.lane.b32.xlu1 %v843_v8, %s3621_s14  ;;  %v591_v34 = vadd.f32 %v4144_v18, %v526_v19  ;;  %v4162_v47 = vld [vmem:[#allocation2 + $0xc9] sm:$0xff] }
  0x8e   : >> { %v1099_v42 = vsub.f32 %v1003_v56, %v4048_v13  ;;  %v1162_v57 = vmul.f32 0.125, %v1130_v1  ;;  %v493_v27 = vmul.f32 2.0, %v4105_v31  ;;  %v1101_v33 = vsub.f32 %v1005_v23, %v4058_v28  ;;  %v4199_v11 = vld [vmem:[#allocation2 + $0xe9] sm:$0xff] }
  0x8f   : >> { %v844_v29 = vmul.f32 0.125, %v812_v21  ;;  %v1132_v22 = vsub.f32 %v1100_v24, %v3995_v35  ;;  %v718_v30 = vmul.f32 2.0, %v4108_v36  ;;  %v655_v50 = vsub.f32 %v591_v34, %v4078_v4  ;;  %v4210_v19 = vld [vmem:[#allocation2 + $0x30] sm:$0xff] }
  0x90   : >> { %v1131_v13 = vsub.f32 %v1099_v42, %v4016_v51  ;;  %v525_v39 = vadd.f32 %v4070_v61, %v493_v27  ;;  %v4170_v40 = vmul.f32 2.0, %v878_v25  ;;  %v1133_v52 = vsub.f32 %v1101_v33, %v4036_v63  ;;  %5565 = vst [vmem:[#allocation12_spill] sm:$0xff] %v4210_v19  ;;  %v4218_v24 = vld [vmem:[#allocation2 + $0x50] sm:$0xff]  ;;  %1191 = vst.msk [vmem:[#allocation3 + $0x8] sm:$0xff] %vm244_vm0, %v4210_v19 }
  0x91   : >> { %1262 = vrot.lane.b32.xlu0 %v842_v0, %s3621_s14  ;;  %v1164_v28 = vmul.f32 0.125, %v1132_v22  ;;  %v496_v35 = vmul.f32 2.0, %v4144_v18  ;;  %v721_v45 = vmul.f32 2.0, %v4157_v26  ;;  %1268 = vrot.lane.b32.xlu1 %v845_v54, %s3621_s14  ;;  %v751_v58 = vsub.f32 %v655_v50, %v719_v59  ;;  %v4184_v0 = vld [vmem:[#allocation2 + $0xf1] sm:$0xff]  ;;  %5566 = vst [vmem:[#allocation13_spill] sm:$0xff] %v4218_v24  ;;  %1193 = vst.msk [vmem:[#allocation3 + $0x18] sm:$0xff] %vm244_vm0, %v4218_v24 }
  0x92   : >> { %v1163_v51 = vmul.f32 0.125, %v1131_v13  ;;  %v590_v62 = vadd.f32 %v4162_v47, %v525_v39  ;;  %v942_v63 = vadd.f32 %v4170_v40, %v4165_v32  ;;  %v1165_v3 = vmul.f32 0.125, %v1133_v52  ;;  %v4229_v27 = vld [vmem:[#allocation2 + $0x210] sm:$0xff] }
  0x93   : >> { %v528_v44 = vadd.f32 %v4096_v20, %v496_v35  ;;  %v495_v5 = vmul.f32 2.0, %v4162_v47  ;;  %v720_v6 = vmul.f32 2.0, %v4165_v32  ;;  %v815_v8 = vsub.f32 %v751_v58, %v4157_v26  ;;  %5567 = vst [vmem:[#allocation14_spill] sm:$0xff] %v4229_v27  ;;  %1221 = vst.msk [vmem:[#allocation3 + $0xf8] sm:$0xff] %vm244_vm0, %v4229_v27  ;;  %v4243_v52 = vld [vmem:[#allocation2 + $0x111] sm:$0xff]  ;;  %v3501_v35 = vld [vmem:[%s5491_s1 + $0x8] sm:$0xff]  }
  0x94   : >> { %v654_v9 = vsub.f32 %v590_v62, %v4085_v14  ;;  %v4201_v38 = vmul.f32 2.0, %v880_v41  ;;  %v4203_v12 = vmul.f32 2.0, %v879_v49  ;;  %v974_v56 = vadd.f32 %v942_v63, %v4162_v47 }
  0x95   : >> { %1266 = vrot.lane.b32.xlu0 %v844_v29, %s3621_s14  ;;  %v593_v15 = vadd.f32 %v4184_v0, %v528_v44  ;;  %v527_v17 = vadd.f32 %v4105_v31, %v495_v5  ;;  %v4208_v1 = vmul.f32 2.0, %v881_v2  ;;  %1425 = vrot.lane.b32.xlu1 %v1163_v51, %s3622_s15  ;;  %v847_v59 = vmul.f32 0.125, %v815_v8  ;;  %v882_v8 = vld [vmem:[#allocation2 + $0x108] sm:$0xff] }
  0x96   : >> { %v750_v54 = vsub.f32 %v654_v9, %v718_v30  ;;  %v944_v21 = vadd.f32 %v4201_v38, %v4193_v7  ;;  %v943_v23 = vadd.f32 %v4203_v12, %v4157_v26  ;;  %v1006_v34 = vsub.f32 %v974_v56, %v4085_v14  ;;  %v3500_v14 = vld [vmem:[%s5491_s1] sm:$0xff]  }
  0x97   : >> { %v657_v25 = vsub.f32 %v593_v15, %v4117_v46  ;;  %v592_v42 = vadd.f32 %v4199_v11, %v527_v17  ;;  %v498_v30 = vmul.f32 2.0, %v4184_v0  ;;  %3253 = vmatprep.subr.bf16.mxu0 %v3500_v14  ;;  %v723_v5 = vmul.f32 2.0, %v4197_v10 }
  0x98   : >> { %v814_v29 = vsub.f32 %v750_v54, %v4165_v32  ;;  %v975_v33 = vadd.f32 %v943_v23, %v4144_v18  ;;  %v976_v22 = vadd.f32 %v944_v21, %v4199_v11  ;;  %v1102_v39 = vsub.f32 %v1006_v34, %v4087_v16  ;;  %v4253_v16 = vld [vmem:[#allocation2 + $0x70] sm:$0xff]  ;;  %3254 = vmatpush3.bf16.msra.mxu0 %v3500_v14  ;;  %v4285_v21 = vld [vmem:[#allocation2 + $0x107] sm:$0xff] }
  0x99   : >> { %1423 = vrot.lane.b32.xlu0 %v1162_v57, %s3622_s15  ;;  %v945_v57 = vadd.f32 %v4208_v1, %v4197_v10  ;;  %v753_v13 = vsub.f32 %v657_v25, %v721_v45  ;;  %v656_v50 = vsub.f32 %v592_v42, %v4108_v36  ;;  %1429 = vrot.lane.b32.xlu1 %v1165_v3, %s3622_s15  ;;  %v4282_v54 = vld [vmem:[#allocation2 + $0x10f] sm:$0xff] }
  0x9a   : >> { %v846_v49 = vmul.f32 0.125, %v814_v29  ;;  %v1007_v51 = vsub.f32 %v975_v33, %v4078_v4  ;;  %v1008_v45 = vsub.f32 %v976_v22, %v4108_v36  ;;  %v530_v58 = vadd.f32 %v4144_v18, %v498_v30  ;;  %5568 = vst [vmem:[#allocation15_spill] sm:$0xff] %v4253_v16  ;;  %1195 = vst.msk [vmem:[#allocation3 + $0x28] sm:$0xff] %vm244_vm0, %v4253_v16  ;;  %v4289_v23 = vld [vmem:[#allocation2 + $0x88] sm:$0xff]  ;;  %v4299_v34 = vld [vmem:[#allocation2 + $0xb0] sm:$0xff] }
  0x9b   : >> { %v977_v41 = vadd.f32 %v945_v57, %v4184_v0  ;;  %v817_v62 = vsub.f32 %v753_v13, %v4197_v10  ;;  %v752_v63 = vsub.f32 %v656_v50, %v720_v6  ;;  %v1134_v2 = vsub.f32 %v1102_v39, %v4070_v61  ;;  %3255 = vmatprep.subr.bf16.mxu0 %v3501_v35  ;;  %v4292_v42 = vld [vmem:[#allocation2 + $0x109] sm:$0xff] }
  0x9c   : >> { %v1103_v4 = vsub.f32 %v1007_v51, %v4119_v48  ;;  %v1104_v36 = vsub.f32 %v1008_v45, %v4112_v43  ;;  %v595_v3 = vadd.f32 %v4243_v52, %v530_v58  ;;  %v3502_v43 = vld [vmem:[%s5491_s1 + $0x10] sm:$0xff]   ;;  %5571 = vst [vmem:[#allocation18_spill] sm:$0xff] %v4289_v23  ;;  %1196 = vst.msk [vmem:[#allocation3 + $0x30] sm:$0xff] %vm244_vm0, %v4289_v23  ;;  %v884_v30 = vld [vmem:[#allocation2 + $0x128] sm:$0xff]  ;;  %3256 = vmatpush3.bf16.msra.mxu0 %v3501_v35 }
  0x9d   : >> { %1427 = vrot.lane.b32.xlu0 %v1164_v28, %s3622_s15  ;;  %v1009_v44 = vsub.f32 %v977_v41, %v4117_v46  ;;  %v4260_v28 = vld [vmem:[#allocation2 + $0x68] sm:$0xff]  ;;  %v849_v61 = vmul.f32 0.125, %v817_v62  ;;  %v816_v46 = vsub.f32 %v752_v63, %v4193_v7  ;;  %v4269_v6 = vmul.f32 0.125, %v1134_v2  ;;  %v4275_v48 = vld [vmem:[#allocation2 + $0x90] sm:$0xff]  ;;  %1272 = vrot.lane.b32.xlu1 %v847_v59, %s3621_s14  ;;  %5572 = vst [vmem:[#allocation19_spill] sm:$0xff] %v4299_v34 }
  0x9e   : >> { %5569 = vst [vmem:[#allocation16_spill] sm:$0xff] %v4260_v28  ;;  %1194 = vst.msk [vmem:[#allocation3 + $0x20] sm:$0xff] %vm244_vm0, %v4260_v28  ;;  %v1135_v15 = vsub.f32 %v1103_v4, %v4075_v37  ;;  %v1136_v17 = vsub.f32 %v1104_v36, %v4105_v31  ;;  %v659_v56 = vsub.f32 %v595_v3, %v4157_v26  ;;  %v722_v37 = vmul.f32 2.0, %v4193_v7  ;;  %v883_v14 = vld [vmem:[#allocation2 + $0x110] sm:$0xff]  ;;  %v4324_v2 = vld [vmem:[#allocation2 + $0x127] sm:$0xff] }
  0x9f   : >> { %v1105_v9 = vsub.f32 %v1009_v44, %v4126_v60  ;;  %5570 = vst [vmem:[#allocation17_spill] sm:$0xff] %v4275_v48  ;;  %v497_v60 = vmul.f32 2.0, %v4199_v11  ;;  %1197 = vst.msk [vmem:[#allocation3 + $0x38] sm:$0xff] %vm244_vm0, %v4275_v48  ;;  %v848_v59 = vmul.f32 0.125, %v816_v46  ;;  %v4295_v31 = vmul.f32 2.0, %v882_v8  ;;  %3257 = vmatprep.subr.bf16.mxu0 %v3502_v43  ;;  %v4314_v51 = vld [vmem:[#allocation2 + $0xd0] sm:$0xff] }
  0xa0   : >> { %v1167_v57 = vmul.f32 0.125, %v1135_v15  ;;  %v4301_v29 = vmul.f32 0.125, %v1136_v17  ;;  %v755_v33 = vsub.f32 %v659_v56, %v723_v5  ;;  %1199 = vst.msk [vmem:[#allocation3 + $0x48] sm:$0xff] %vm244_vm0, %v4299_v34  ;;  %v500_v39 = vmul.f32 2.0, %v4243_v52  ;;  %5574 = vst [vmem:[#allocation21_spill] sm:$0xff] %v4314_v51  ;;  %v4320_v58 = vld [vmem:[#allocation2 + $0x131] sm:$0xff]  ;;  %3258 = vmatpush3.bf16.msra.mxu0 %v3502_v43 }
  0xa1   : >> { %1270 = vrot.lane.b32.xlu0 %v846_v49, %s3621_s14  ;;  %v1137_v25 = vsub.f32 %v1105_v9, %v4096_v20  ;;  %v529_v22 = vadd.f32 %v4162_v47, %v497_v60  ;;  %v4306_v20 = vld [vmem:[#allocation2 + $0xa8] sm:$0xff]  ;;  %v946_v50 = vadd.f32 %v4295_v31, %v4285_v21  ;;  %v725_v41 = vmul.f32 2.0, %v4282_v54  ;;  %v885_v49 = vld [vmem:[#allocation2 + $0x130] sm:$0xff]  ;;  %1276 = vrot.lane.b32.xlu1 %v849_v61, %s3621_s14 }
  0xa2   : >> { %5573 = vst [vmem:[#allocation20_spill] sm:$0xff] %v4306_v20  ;;  %1198 = vst.msk [vmem:[#allocation3 + $0x40] sm:$0xff] %vm244_vm0, %v4306_v20  ;;  %v819_v35 = vsub.f32 %v755_v33, %v4282_v54  ;;  %v499_v62 = vmul.f32 2.0, %v4292_v42  ;;  %v724_v63 = vmul.f32 2.0, %v4285_v21  ;;  %v4328_v44 = vld [vmem:[#allocation2 + $0xc8] sm:$0xff]  ;;  %v532_v4 = vadd.f32 %v4184_v0, %v500_v39  ;;  %v4342_v46 = vld [vmem:[#allocation2 + $0xf0] sm:$0xff] }
  0xa3   : >> { %v1169_v13 = vmul.f32 0.125, %v1137_v25  ;;  %v594_v45 = vadd.f32 %v4292_v42, %v529_v22  ;;  %1201 = vst.msk [vmem:[#allocation3 + $0x58] sm:$0xff] %vm244_vm0, %v4314_v51  ;;  %5575 = vst [vmem:[#allocation22_spill] sm:$0xff] %v4328_v44  ;;  %v4331_v36 = vld [vmem:[#allocation2 + $0x12f] sm:$0xff]  ;;  %v4335_v5 = vmul.f32 2.0, %v884_v30  ;;  %v4337_v8 = vmul.f32 2.0, %v883_v14 }
  0xa4   : >> { %v4333_v3 = vld [vmem:[#allocation2 + $0x129] sm:$0xff]  ;;  %v978_v61 = vadd.f32 %v946_v50, %v4292_v42  ;;  %1200 = vst.msk [vmem:[#allocation3 + $0x50] sm:$0xff] %vm244_vm0, %v4328_v44  ;;  %5576 = vst [vmem:[#allocation23_spill] sm:$0xff] %v4342_v46  ;;  %v851_v9 = vmul.f32 0.125, %v819_v35  ;;  %v531_v17 = vadd.f32 %v4199_v11, %v499_v62  ;;  %v4346_v56 = vmul.f32 2.0, %v885_v49  ;;  %v4369_v49 = vld [vmem:[#allocation2 + $0x151] sm:$0xff] }
  0xa5   : >> { %1274 = vrot.lane.b32.xlu0 %v848_v59, %s3621_s14  ;;  %v658_v15 = vsub.f32 %v594_v45, %v4165_v32  ;;  %1203 = vst.msk [vmem:[#allocation3 + $0x68] sm:$0xff] %vm244_vm0, %v4342_v46  ;;  %v4350_v60 = vld [vmem:[#allocation2 + $0xe8] sm:$0xff]  ;;  %v597_v59 = vadd.f32 %v4320_v58, %v532_v4  ;;  %v948_v25 = vadd.f32 %v4335_v5, %v4324_v2  ;;  %v4360_v30 = vld [vmem:[#allocation2 + $0x110] sm:$0xff]  ;;  %v502_v39 = vmul.f32 2.0, %v4320_v58 }
  0xa6   : >> { %5577 = vst [vmem:[#allocation24_spill] sm:$0xff] %v4350_v60  ;;  %v947_v33 = vadd.f32 %v4337_v8, %v4282_v54  ;;  %v1010_v22 = vsub.f32 %v978_v61, %v4165_v32  ;;  %1202 = vst.msk [vmem:[#allocation3 + $0x60] sm:$0xff] %vm244_vm0, %v4350_v60  ;;  %1433 = vrot.lane.b32.xlu1 %v1167_v57, %s3622_s15  ;;  %v596_v14 = vadd.f32 %v4333_v3, %v531_v17  ;;  %v4373_v32 = vld [vmem:[#allocation2 + $0x108] sm:$0xff] }
  0xa7   : >> { %5578 = vst [vmem:[#allocation25_spill] sm:$0xff] %v4360_v30  ;;  %v754_v43 = vsub.f32 %v658_v15, %v722_v37  ;;  %v949_v50 = vadd.f32 %v4346_v56, %v4331_v36  ;;  %1205 = vst.msk [vmem:[#allocation3 + $0x78] sm:$0xff] %vm244_vm0, %v4360_v30  ;;  %v661_v57 = vsub.f32 %v597_v59, %v4197_v10 }
  0xa8   : >> { %5579 = vst [vmem:[#allocation26_spill] sm:$0xff] %v4373_v32  ;;  %v979_v35 = vadd.f32 %v947_v33, %v4243_v52  ;;  %v980_v37 = vadd.f32 %v948_v25, %v4333_v3  ;;  %1204 = vst.msk [vmem:[#allocation3 + $0x70] sm:$0xff] %vm244_vm0, %v4373_v32  ;;  %v660_v62 = vsub.f32 %v596_v14, %v4193_v7 }
  0xa9   : >> { %1431 = vrot.lane.b32.xlu0 %v4269_v6, %s3622_s15  ;;  %v1106_v6 = vsub.f32 %v1010_v22, %v4170_v40  ;;  %v818_v45 = vsub.f32 %v754_v43, %v4285_v21  ;;  %v981_v4 = vadd.f32 %v949_v50, %v4320_v58  ;;  %v534_v61 = vadd.f32 %v4243_v52, %v502_v39  ;;  %v886_v50 = vld [vmem:[#allocation2 + $0x148] sm:$0xff] }
  0xaa   : >> { %v757_v15 = vsub.f32 %v661_v57, %v725_v41  ;;  %v1011_v17 = vsub.f32 %v979_v35, %v4157_v26  ;;  %v1012_v40 = vsub.f32 %v980_v37, %v4193_v7  ;;  %1437 = vrot.lane.b32.xlu1 %v1169_v13, %s3622_s15  ;;  %v756_v33 = vsub.f32 %v660_v62, %v724_v63  ;;  %v4402_v57 = vld [vmem:[#allocation2 + $0x14f] sm:$0xff] }
  0xab   : >> { %v1138_v59 = vsub.f32 %v1106_v6, %v4162_v47  ;;  %v850_v25 = vmul.f32 0.125, %v818_v45  ;;  %v1013_v22 = vsub.f32 %v981_v4, %v4197_v10  ;;  %v599_v43 = vadd.f32 %v4369_v49, %v534_v61  ;;  %v4408_v37 = vld [vmem:[#allocation2 + $0x149] sm:$0xff] }
  0xac   : >> { %v821_v14 = vsub.f32 %v757_v15, %v4331_v36  ;;  %v1107_v41 = vsub.f32 %v1011_v17, %v4203_v12  ;;  %v1108_v26 = vsub.f32 %v1012_v40, %v4201_v38  ;;  %v820_v47 = vsub.f32 %v756_v33, %v4324_v2  ;;  %v4410_v45 = vld [vmem:[#allocation2 + $0x147] sm:$0xff]  ;;  %v4416_v15 = vld [vmem:[#allocation2 + $0x130] sm:$0xff] }
  0xad   : >> { %1435 = vrot.lane.b32.xlu0 %v4301_v29, %s3622_s15  ;;  %v1109_v7 = vsub.f32 %v1013_v22, %v4208_v1  ;;  %v663_v13 = vsub.f32 %v599_v43, %v4282_v54  ;;  %v727_v29 = vmul.f32 2.0, %v4331_v36  ;;  %v1170_v10 = vmul.f32 0.125, %v1138_v59  ;;  %5580 = vst [vmem:[#allocation27_spill] sm:$0xff] %v4416_v15  ;;  %v4418_v17 = vld [vmem:[#allocation2 + $0x128] sm:$0xff]  ;;  %v889_v33 = vld [vmem:[#allocation2 + $0x170] sm:$0xff]  ;;  %1207 = vst.msk [vmem:[#allocation3 + $0x88] sm:$0xff] %vm244_vm0, %v4416_v15 }
  0xae   : >> { %v1139_v63 = vsub.f32 %v1107_v41, %v4144_v18  ;;  %v1140_v39 = vsub.f32 %v1108_v26, %v4199_v11  ;;  %v501_v12 = vmul.f32 2.0, %v4333_v3  ;;  %1280 = vrot.lane.b32.xlu1 %v851_v9, %s3621_s14  ;;  %v853_v38 = vmul.f32 0.125, %v821_v14  ;;  %v888_v18 = vld [vmem:[#allocation2 + $0x168] sm:$0xff]  ;;  %v887_v9 = vld [vmem:[#allocation2 + $0x150] sm:$0xff]  ;;  %5581 = vst [vmem:[#allocation28_spill] sm:$0xff] %v4418_v17  ;;  %1206 = vst.msk [vmem:[#allocation3 + $0x80] sm:$0xff] %vm244_vm0, %v4418_v17 }
  0xaf   : >> { %v852_v1 = vmul.f32 0.125, %v820_v47  ;;  %v1141_v35 = vsub.f32 %v1109_v7, %v4184_v0  ;;  %v759_v6 = vsub.f32 %v663_v13, %v727_v29  ;;  %v726_v4 = vmul.f32 2.0, %v4324_v2  ;;  %v4429_v14 = vld [vmem:[#allocation2 + $0x171] sm:$0xff]  ;;  %v4433_v47 = vld [vmem:[#allocation2 + $0x167] sm:$0xff] }
  0xb0   : >> { %v1171_v62 = vmul.f32 0.125, %v1139_v63  ;;  %v533_v11 = vadd.f32 %v4292_v42, %v501_v12  ;;  %v4414_v61 = vmul.f32 2.0, %v886_v50  ;;  %v1172_v0 = vmul.f32 0.125, %v1140_v39  ;;  %v4438_v13 = vld [vmem:[#allocation2 + $0x16f] sm:$0xff] }
  0xb1   : >> { %1278 = vrot.lane.b32.xlu0 %v850_v25, %s3621_s14  ;;  %v1173_v59 = vmul.f32 0.125, %v1141_v35  ;;  %v823_v40 = vsub.f32 %v759_v6, %v4402_v57  ;;  %v504_v25 = vmul.f32 2.0, %v4369_v49  ;;  %v729_v41 = vmul.f32 2.0, %v4402_v57  ;;  %v4440_v29 = vld [vmem:[#allocation2 + $0x169] sm:$0xff] }
  0xb2   : >> { %v598_v22 = vadd.f32 %v4408_v37, %v533_v11  ;;  %v950_v43 = vadd.f32 %v4414_v61, %v4410_v45  ;;  %v503_v26 = vmul.f32 2.0, %v4408_v37  ;;  %1284 = vrot.lane.b32.xlu1 %v853_v38, %s3621_s14  ;;  %v728_v50 = vmul.f32 2.0, %v4410_v45 }
  0xb3   : >> { %v536_v7 = vadd.f32 %v4320_v58, %v504_v25  ;;  %v4443_v63 = vmul.f32 2.0, %v888_v18  ;;  %v4445_v39 = vmul.f32 2.0, %v887_v9  ;;  %v4450_v6 = vmul.f32 2.0, %v889_v33 }
  0xb4   : >> { %v662_v12 = vsub.f32 %v598_v22, %v4285_v21  ;;  %v535_v35 = vadd.f32 %v4333_v3, %v503_v26  ;;  %v982_v38 = vadd.f32 %v950_v43, %v4408_v37  ;;  %v506_v9 = vmul.f32 2.0, %v4429_v14  ;;  %v4462_v22 = vld [vmem:[#allocation2 + $0x148] sm:$0xff] }
  0xb5   : >> { %1282 = vrot.lane.b32.xlu0 %v852_v1, %s3621_s14  ;;  %v4452_v1 = vld [vmem:[#allocation2 + $0x150] sm:$0xff]  ;;  %v601_v11 = vadd.f32 %v4429_v14, %v536_v7  ;;  %v952_v25 = vadd.f32 %v4443_v63, %v4433_v47  ;;  %v951_v18 = vadd.f32 %v4445_v39, %v4402_v57  ;;  %5583 = vst [vmem:[#allocation30_spill] sm:$0xff] %v4462_v22  ;;  %1208 = vst.msk [vmem:[#allocation3 + $0x90] sm:$0xff] %vm244_vm0, %v4462_v22 }
  0xb6   : >> { %5582 = vst [vmem:[#allocation29_spill] sm:$0xff] %v4452_v1  ;;  %1209 = vst.msk [vmem:[#allocation3 + $0x98] sm:$0xff] %vm244_vm0, %v4452_v1  ;;  %v758_v43 = vsub.f32 %v662_v12, %v726_v4  ;;  %v600_v33 = vadd.f32 %v4440_v29, %v535_v35  ;;  %v1014_v26 = vsub.f32 %v982_v38, %v4285_v21  ;;  %1441 = vrot.lane.b32.xlu1 %v1171_v62, %s3622_s15 }
  0xb7   : >> { %v953_v7 = vadd.f32 %v4450_v6, %v4438_v13  ;;  %v855_v17 = vmul.f32 0.125, %v823_v40  ;;  %v665_v1 = vsub.f32 %v601_v11, %v4331_v36  ;;  %v983_v15 = vadd.f32 %v951_v18, %v4369_v49  ;;  %v4482_v11 = vld [vmem:[#allocation2 + $0x191] sm:$0xff] }
  0xb8   : >> { %v984_v4 = vadd.f32 %v952_v25, %v4440_v29  ;;  %v822_v12 = vsub.f32 %v758_v43, %v4410_v45  ;;  %v664_v21 = vsub.f32 %v600_v33, %v4324_v2  ;;  %v1110_v35 = vsub.f32 %v1014_v26, %v4295_v31  ;;  %v4506_v26 = vld [vmem:[#allocation2 + $0x187] sm:$0xff] }
  0xb9   : >> { %1439 = vrot.lane.b32.xlu0 %v1170_v10, %s3622_s15  ;;  %v985_v38 = vadd.f32 %v953_v7, %v4429_v14  ;;  %v761_v22 = vsub.f32 %v665_v1, %v729_v41  ;;  %v1015_v62 = vsub.f32 %v983_v15, %v4282_v54  ;;  %v538_v40 = vadd.f32 %v4369_v49, %v506_v9 }
  0xba   : >> { %v1016_v10 = vsub.f32 %v984_v4, %v4324_v2  ;;  %v854_v18 = vmul.f32 0.125, %v822_v12  ;;  %v760_v32 = vsub.f32 %v664_v21, %v728_v50  ;;  %v1142_v25 = vsub.f32 %v1110_v35, %v4292_v42  ;;  %1445 = vrot.lane.b32.xlu1 %v1173_v59, %s3622_s15  ;;  %v4498_v59 = vld [vmem:[#allocation2 + $0x189] sm:$0xff] }
  0xbb   : >> { %v1017_v43 = vsub.f32 %v985_v38, %v4331_v36  ;;  %v825_v31 = vsub.f32 %v761_v22, %v4438_v13  ;;  %v1111_v54 = vsub.f32 %v1015_v62, %v4337_v8  ;;  %v505_v15 = vmul.f32 2.0, %v4440_v29  ;;  %v892_v12 = vld [vmem:[#allocation2 + $0x1a8] sm:$0xff]  ;;  %v891_v21 = vld [vmem:[#allocation2 + $0x190] sm:$0xff] }
  0xbc   : >> { %v1112_v2 = vsub.f32 %v1016_v10, %v4335_v5  ;;  %v824_v41 = vsub.f32 %v760_v32, %v4433_v47  ;;  %v603_v42 = vadd.f32 %v4482_v11, %v538_v40  ;;  %v731_v36 = vmul.f32 2.0, %v4438_v13  ;;  %v893_v40 = vld [vmem:[#allocation2 + $0x1b0] sm:$0xff] }
  0xbd   : >> { %1443 = vrot.lane.b32.xlu0 %v1172_v0, %s3622_s15  ;;  %v4494_v50 = vsub.f32 %v1017_v43, %v4346_v56  ;;  %v890_v0 = vld [vmem:[#allocation2 + $0x188] sm:$0xff]  ;;  %v1143_v1 = vsub.f32 %v1111_v54, %v4243_v52  ;;  %v537_v5 = vadd.f32 %v4408_v37, %v505_v15  ;;  %v857_v9 = vmul.f32 0.125, %v825_v31  ;;  %v4524_v43 = vld [vmem:[#allocation2 + $0x1b1] sm:$0xff] }
  0xbe   : >> { %v1144_v8 = vsub.f32 %v1112_v2, %v4333_v3  ;;  %v856_v22 = vmul.f32 0.125, %v824_v41  ;;  %v1174_v33 = vmul.f32 0.125, %v1142_v25  ;;  %v667_v32 = vsub.f32 %v603_v42, %v4402_v57  ;;  %v4504_v56 = vld [vmem:[#allocation2 + $0x18f] sm:$0xff]  ;;  %1288 = vrot.lane.b32.xlu1 %v855_v17, %s3621_s14  ;;  %v4528_v2 = vld [vmem:[#allocation2 + $0x1a7] sm:$0xff] }
  0xbf   : >> { %v1145_v52 = vsub.f32 %v4494_v50, %v4320_v58  ;;  %v602_v3 = vadd.f32 %v4498_v59, %v537_v5  ;;  %v730_v7 = vmul.f32 2.0, %v4433_v47  ;;  %v4514_v4 = vmul.f32 2.0, %v890_v0  ;;  %v4517_v17 = vld [vmem:[#allocation2 + $0x170] sm:$0xff] }
  0xc0   : >> { %v1175_v35 = vmul.f32 0.125, %v1143_v1  ;;  %v1176_v38 = vmul.f32 0.125, %v1144_v8  ;;  %v763_v62 = vsub.f32 %v667_v32, %v731_v36  ;;  %v508_v10 = vmul.f32 2.0, %v4482_v11  ;;  %5584 = vst [vmem:[#allocation31_spill] sm:$0xff] %v4517_v17  ;;  %1211 = vst.msk [vmem:[#allocation3 + $0xa8] sm:$0xff] %vm244_vm0, %v4517_v17  ;;  %v4535_v41 = vld [vmem:[#allocation2 + $0x1af] sm:$0xff] }
  0xc1   : >> { %1286 = vrot.lane.b32.xlu0 %v854_v18, %s3621_s14  ;;  %v4519_v18 = vld [vmem:[#allocation2 + $0x168] sm:$0xff]  ;;  %v666_v58 = vsub.f32 %v602_v3, %v4410_v45  ;;  %v954_v25 = vadd.f32 %v4514_v4, %v4506_v26  ;;  %v733_v31 = vmul.f32 2.0, %v4504_v56  ;;  %v507_v54 = vmul.f32 2.0, %v4498_v59 }
  0xc2   : >> { %5585 = vst [vmem:[#allocation32_spill] sm:$0xff] %v4519_v18  ;;  %1210 = vst.msk [vmem:[#allocation3 + $0xa0] sm:$0xff] %vm244_vm0, %v4519_v18  ;;  %v540_v15 = vadd.f32 %v4429_v14, %v508_v10  ;;  %v4537_v50 = vld [vmem:[#allocation2 + $0x1a9] sm:$0xff]  ;;  %v732_v42 = vmul.f32 2.0, %v4506_v26  ;;  %v4540_v36 = vmul.f32 2.0, %v892_v12  ;;  %v4542_v0 = vmul.f32 2.0, %v891_v21  ;;  %1292 = vrot.lane.b32.xlu1 %v857_v9, %s3621_s14 }
  0xc3   : >> { %v762_v1 = vsub.f32 %v666_v58, %v730_v7  ;;  %v539_v8 = vadd.f32 %v4440_v29, %v507_v54  ;;  %v986_v5 = vadd.f32 %v954_v25, %v4498_v59  ;;  %v4548_v32 = vmul.f32 2.0, %v893_v40  ;;  %v4556_v9 = vld [vmem:[#allocation2 + $0x190] sm:$0xff] }
  0xc4   : >> { %v827_v3 = vsub.f32 %v763_v62, %v4504_v56  ;;  %v605_v10 = vadd.f32 %v4524_v43, %v540_v15  ;;  %v956_v12 = vadd.f32 %v4540_v36, %v4528_v2  ;;  %v955_v21 = vadd.f32 %v4542_v0, %v4504_v56  ;;  %5586 = vst [vmem:[#allocation33_spill] sm:$0xff] %v4556_v9  ;;  %v4565_v62 = vld [vmem:[#allocation2 + $0x188] sm:$0xff] }
  0xc5   : >> { %1290 = vrot.lane.b32.xlu0 %v856_v22, %s3621_s14  ;;  %v826_v22 = vsub.f32 %v762_v1, %v4506_v26  ;;  %v604_v7 = vadd.f32 %v4537_v50, %v539_v8  ;;  %v1018_v58 = vsub.f32 %v986_v5, %v4410_v45  ;;  %v957_v40 = vadd.f32 %v4548_v32, %v4535_v41 }
  0xc6   : >> { %1213 = vst.msk [vmem:[#allocation3 + $0xb8] sm:$0xff] %vm244_vm0, %v4556_v9  ;;  %5587 = vst [vmem:[#allocation34_spill] sm:$0xff] %v4565_v62  ;;  %v669_v25 = vsub.f32 %v605_v10, %v4438_v13  ;;  %v987_v54 = vadd.f32 %v955_v21, %v4482_v11  ;;  %v988_v15 = vadd.f32 %v956_v12, %v4537_v50  ;;  %v510_v1 = vmul.f32 2.0, %v4524_v43  ;;  %v4578_v9 = vld [vmem:[#allocation2 + $0x1d1] sm:$0xff] }
  0xc7   : >> { %1212 = vst.msk [vmem:[#allocation3 + $0xb0] sm:$0xff] %vm244_vm0, %v4565_v62  ;;  %1449 = vrot.lane.b32.xlu1 %v1175_v35, %s3622_s15  ;;  %v1177_v45 = vmul.f32 0.125, %v1145_v52  ;;  %v668_v8 = vsub.f32 %v604_v7, %v4433_v47  ;;  %v1114_v5 = vsub.f32 %v1018_v58, %v4414_v61  ;;  %v989_v10 = vadd.f32 %v957_v40, %v4524_v43  ;;  %v4600_v40 = vld [vmem:[#allocation2 + $0x1c9] sm:$0xff] }
  0xc8   : >> { %v765_v21 = vsub.f32 %v669_v25, %v733_v31  ;;  %v1019_v12 = vsub.f32 %v987_v54, %v4402_v57  ;;  %v1020_v18 = vsub.f32 %v988_v15, %v4433_v47  ;;  %v542_v62 = vadd.f32 %v4482_v11, %v510_v1  ;;  %v4605_v25 = vld [vmem:[#allocation2 + $0x1c7] sm:$0xff] }
  0xc9   : >> { %1447 = vrot.lane.b32.xlu0 %v1174_v33, %s3622_s15  ;;  %v859_v17 = vmul.f32 0.125, %v827_v3  ;;  %v764_v35 = vsub.f32 %v668_v8, %v732_v42  ;;  %v1146_v33 = vsub.f32 %v1114_v5, %v4408_v37  ;;  %v1021_v52 = vsub.f32 %v989_v10, %v4438_v13  ;;  %v894_v13 = vld [vmem:[#allocation2 + $0x1c8] sm:$0xff] }
  0xca   : >> { %v829_v7 = vsub.f32 %v765_v21, %v4535_v41  ;;  %v1115_v61 = vsub.f32 %v1019_v12, %v4445_v39  ;;  %v1116_v58 = vsub.f32 %v1020_v18, %v4443_v63  ;;  %v607_v31 = vadd.f32 %v4578_v9, %v542_v62  ;;  %v4602_v62 = vld [vmem:[#allocation2 + $0x1cf] sm:$0xff] }
  0xcb   : >> { %1453 = vrot.lane.b32.xlu1 %v1177_v45, %s3622_s15  ;;  %v858_v57 = vmul.f32 0.125, %v826_v22  ;;  %v828_v47 = vsub.f32 %v764_v35, %v4528_v2  ;;  %v4593_v42 = vsub.f32 %v1021_v52, %v4450_v6  ;;  %v509_v37 = vmul.f32 2.0, %v4537_v50  ;;  %v896_v1 = vld [vmem:[#allocation2 + $0x1e8] sm:$0xff]  ;;  %v895_v45 = vld [vmem:[#allocation2 + $0x1d0] sm:$0xff] }
  0xcc   : >> { %v1147_v3 = vsub.f32 %v1115_v61, %v4369_v49  ;;  %v1148_v39 = vsub.f32 %v1116_v58, %v4440_v29  ;;  %v671_v63 = vsub.f32 %v607_v31, %v4504_v56  ;;  %v735_v18 = vmul.f32 2.0, %v4535_v41  ;;  %v4616_v12 = vld [vmem:[#allocation2 + $0x1f1] sm:$0xff]  ;;  %v4626_v58 = vld [vmem:[#allocation2 + $0x1a8] sm:$0xff] }
  0xcd   : >> { %1451 = vrot.lane.b32.xlu0 %v1176_v38, %s3622_s15  ;;  %v861_v38 = vmul.f32 0.125, %v829_v7  ;;  %v1178_v22 = vmul.f32 0.125, %v1146_v33  ;;  %v541_v6 = vadd.f32 %v4498_v59, %v509_v37  ;;  %v860_v54 = vmul.f32 0.125, %v828_v47  ;;  %v897_v35 = vld [vmem:[#allocation2 + $0x1f0] sm:$0xff]  ;;  %5589 = vst [vmem:[#allocation36_spill] sm:$0xff] %v4626_v58  ;;  %1214 = vst.msk [vmem:[#allocation3 + $0xc0] sm:$0xff] %vm244_vm0, %v4626_v58 }
  0xce   : >> { %v1149_v49 = vsub.f32 %v4593_v42, %v4429_v14  ;;  %v734_v29 = vmul.f32 2.0, %v4528_v2  ;;  %v4610_v15 = vmul.f32 2.0, %v894_v13  ;;  %v1179_v8 = vmul.f32 0.125, %v1147_v3  ;;  %v4624_v61 = vld [vmem:[#allocation2 + $0x1b0] sm:$0xff] }
  0xcf   : >> { %1296 = vrot.lane.b32.xlu1 %v859_v17, %s3621_s14  ;;  %v1180_v5 = vmul.f32 0.125, %v1148_v39  ;;  %v606_v10 = vadd.f32 %v4600_v40, %v541_v6  ;;  %v512_v21 = vmul.f32 2.0, %v4578_v9  ;;  %v767_v14 = vsub.f32 %v671_v63, %v735_v18  ;;  %v4622_v17 = vld [vmem:[#allocation2 + $0x1e7] sm:$0xff]  ;;  %5588 = vst [vmem:[#allocation35_spill] sm:$0xff] %v4624_v61  ;;  %v4630_v47 = vld [vmem:[#allocation2 + $0x1ef] sm:$0xff]  ;;  %1215 = vst.msk [vmem:[#allocation3 + $0xc8] sm:$0xff] %vm244_vm0, %v4624_v61 }
  0xd0   : >> { %v958_v33 = vadd.f32 %v4610_v15, %v4605_v25  ;;  %v737_v52 = vmul.f32 2.0, %v4602_v62  ;;  %v511_v7 = vmul.f32 2.0, %v4600_v40  ;;  %v4632_v42 = vld [vmem:[#allocation2 + $0x1e9] sm:$0xff]  ;;  %v4634_v37 = vmul.f32 2.0, %v896_v1  ;;  %v4665_v58 = vld [vmem:[#allocation2 + $0x211] sm:$0xff] }
  0xd1   : >> { %1294 = vrot.lane.b32.xlu0 %v858_v57, %s3621_s14  ;;  %v670_v31 = vsub.f32 %v606_v10, %v4506_v26  ;;  %v544_v57 = vadd.f32 %v4524_v43, %v512_v21  ;;  %v4636_v13 = vmul.f32 2.0, %v895_v45  ;;  %v736_v39 = vmul.f32 2.0, %v4605_v25 }
  0xd2   : >> { %v543_v3 = vadd.f32 %v4537_v50, %v511_v7  ;;  %v990_v63 = vadd.f32 %v958_v33, %v4600_v40  ;;  %v4645_v18 = vmul.f32 2.0, %v897_v35  ;;  %v960_v45 = vadd.f32 %v4634_v37, %v4622_v17  ;;  %v4659_v33 = vld [vmem:[#allocation2 + $0x1d0] sm:$0xff] }
  0xd3   : >> { %1300 = vrot.lane.b32.xlu1 %v861_v38, %s3621_s14  ;;  %v766_v6 = vsub.f32 %v670_v31, %v734_v29  ;;  %v609_v1 = vadd.f32 %v4616_v12, %v544_v57  ;;  %v514_v10 = vmul.f32 2.0, %v4616_v12  ;;  %v959_v7 = vadd.f32 %v4636_v13, %v4602_v62  ;;  %5590 = vst [vmem:[#allocation37_spill] sm:$0xff] %v4659_v33 }
  0xd4   : >> { %v608_v21 = vadd.f32 %v4632_v42, %v543_v3  ;;  %v1022_v35 = vsub.f32 %v990_v63, %v4506_v26  ;;  %v961_v38 = vadd.f32 %v4645_v18, %v4630_v47  ;;  %v992_v31 = vadd.f32 %v960_v45, %v4632_v42  ;;  %1217 = vst.msk [vmem:[#allocation3 + $0xd8] sm:$0xff] %vm244_vm0, %v4659_v33  ;;  %v4669_v3 = vld [vmem:[#allocation2 + $0x1c8] sm:$0xff] }
  0xd5   : >> { %1298 = vrot.lane.b32.xlu0 %v860_v54, %s3621_s14  ;;  %v831_v54 = vsub.f32 %v767_v14, %v4602_v62  ;;  %v673_v29 = vsub.f32 %v609_v1, %v4535_v41  ;;  %v546_v57 = vadd.f32 %v4578_v9, %v514_v10  ;;  %5591 = vst [vmem:[#allocation38_spill] sm:$0xff] %v4669_v3  ;;  %1216 = vst.msk [vmem:[#allocation3 + $0xd0] sm:$0xff] %vm244_vm0, %v4669_v3 }
  0xd6   : >> { %v672_v26 = vsub.f32 %v608_v21, %v4528_v2  ;;  %v991_v63 = vadd.f32 %v959_v7, %v4578_v9  ;;  %v1118_v61 = vsub.f32 %v1022_v35, %v4514_v4  ;;  %v993_v14 = vadd.f32 %v961_v38, %v4616_v12 }
  0xd7   : >> { %1457 = vrot.lane.b32.xlu1 %v1179_v8, %s3622_s15  ;;  %v1181_v1 = vmul.f32 0.125, %v1149_v49  ;;  %v830_v45 = vsub.f32 %v766_v6, %v4605_v25  ;;  %v769_v10 = vsub.f32 %v673_v29, %v737_v52  ;;  %v1024_v33 = vsub.f32 %v992_v31, %v4528_v2  ;;  %v898_v52 = vld [vmem:[#allocation2 + $0x208] sm:$0xff] }
  0xd8   : >> { %v768_v21 = vsub.f32 %v672_v26, %v736_v39  ;;  %v1023_v7 = vsub.f32 %v991_v63, %v4504_v56  ;;  %v1025_v4 = vsub.f32 %v993_v14, %v4535_v41  ;;  %v611_v35 = vadd.f32 %v4665_v58, %v546_v57  ;;  %v803_v57 = vld [vmem:[#allocation2 + $0x20f] sm:$0xff]  ;;  %v802_v63 = vld [vmem:[#allocation2 + $0x207] sm:$0xff] }
  0xd9   : >> { %1455 = vrot.lane.b32.xlu0 %v1178_v22, %s3622_s15  ;;  %v833_v38 = vsub.f32 %v769_v10, %v4630_v47  ;;  %v1150_v8 = vsub.f32 %v1118_v61, %v4498_v59  ;;  %v863_v22 = vmul.f32 0.125, %v831_v54  ;;  %v862_v49 = vmul.f32 0.125, %v830_v45  ;;  %v578_v59 = vld [vmem:[#allocation2 + $0x209] sm:$0xff] }
  0xda   : >> { %v1119_v3 = vsub.f32 %v1023_v7, %v4542_v0  ;;  %v832_v2 = vsub.f32 %v768_v21, %v4622_v17  ;;  %v513_v56 = vmul.f32 2.0, %v4632_v42  ;;  %v1121_v41 = vsub.f32 %v1025_v4, %v4548_v32  ;;  %v901_v54 = vld [vmem:[#allocation2 + $0x230] sm:$0xff] }
  0xdb   : >> { %1461 = vrot.lane.b32.xlu1 %v1181_v1, %s3622_s15  ;;  %v1120_v39 = vsub.f32 %v1024_v33, %v4540_v36  ;;  %v675_v6 = vsub.f32 %v611_v35, %v4602_v62  ;;  %v739_v0 = vmul.f32 2.0, %v4630_v47  ;;  %v865_v29 = vmul.f32 0.125, %v833_v38  ;;  %v805_v1 = vld [vmem:[#allocation2 + $0x22f] sm:$0xff] }
  0xdc   : >> { %v1151_v61 = vsub.f32 %v1119_v3, %v4482_v11  ;;  %v1182_v31 = vmul.f32 0.125, %v1150_v8  ;;  %v930_v26 = vmul.f32 2.0, %v898_v52  ;;  %v864_v32 = vmul.f32 0.125, %v832_v2  ;;  %v900_v11 = vld [vmem:[#allocation2 + $0x228] sm:$0xff]  ;;  %v581_v21 = vld [vmem:[#allocation2 + $0x231] sm:$0xff] }
  0xdd   : >> { %1459 = vrot.lane.b32.xlu0 %v1180_v5, %s3622_s15  ;;  %v545_v5 = vadd.f32 %v4600_v40, %v513_v56  ;;  %v738_v33 = vmul.f32 2.0, %v4622_v17  ;;  %v516_v14 = vmul.f32 2.0, %v4665_v58  ;;  %v1153_v3 = vsub.f32 %v1121_v41, %v4524_v43  ;;  %v4703_v4 = vld [vmem:[#allocation2 + $0x1f0] sm:$0xff]  ;;  %v4705_v35 = vld [vmem:[#allocation2 + $0x1e8] sm:$0xff] }
  0xde   : >> { %v1152_v45 = vsub.f32 %v1120_v39, %v4537_v50  ;;  %v771_v10 = vsub.f32 %v675_v6, %v739_v0  ;;  %v933_v7 = vmul.f32 2.0, %v901_v54  ;;  %5592 = vst [vmem:[#allocation39_spill] sm:$0xff] %v4705_v35  ;;  %v1183_v38 = vmul.f32 0.125, %v1151_v61  ;;  %v804_v2 = vld [vmem:[#allocation2 + $0x227] sm:$0xff]  ;;  %1219 = vst.msk [vmem:[#allocation3 + $0xe8] sm:$0xff] %vm244_vm0, %v4703_v4 }
  0xdf   : >> { %1304 = vrot.lane.b32.xlu1 %v863_v22, %s3621_s14  ;;  %v610_v36 = vadd.f32 %v578_v59, %v545_v5  ;;  %v548_v22 = vadd.f32 %v4616_v12, %v516_v14  ;;  %1218 = vst.msk [vmem:[#allocation3 + $0xe0] sm:$0xff] %vm244_vm0, %v4705_v35  ;;  %v962_v43 = vadd.f32 %v930_v26, %v802_v63  ;;  %v741_v50 = vmul.f32 2.0, %v803_v57  ;;  %v580_v52 = vld [vmem:[#allocation2 + $0x229] sm:$0xff] }
  0xe0   : >> { %v965_v56 = vadd.f32 %v933_v7, %v805_v1  ;;  %v932_v41 = vmul.f32 2.0, %v900_v11  ;;  %v931_v61 = vmul.f32 2.0, %v4229_v27  ;;  %v1184_v5 = vmul.f32 0.125, %v1152_v45  ;;  %v4717_v14 = vld [vmem:[#allocation2 + $0x208] sm:$0xff] }
  0xe1   : >> { %1302 = vrot.lane.b32.xlu0 %v862_v49, %s3621_s14  ;;  %v674_v8 = vsub.f32 %v610_v36, %v4605_v25  ;;  %v515_v49 = vmul.f32 2.0, %v578_v59  ;;  %v613_v6 = vadd.f32 %v581_v21, %v548_v22  ;;  %v835_v54 = vsub.f32 %v771_v10, %v803_v57  ;;  %1220 = vst.msk [vmem:[#allocation3 + $0xf0] sm:$0xff] %vm244_vm0, %v4717_v14 }
  0xe2   : >> { %v964_v36 = vadd.f32 %v932_v41, %v804_v2  ;;  %v740_v35 = vmul.f32 2.0, %v802_v63  ;;  %v963_v11 = vadd.f32 %v931_v61, %v803_v57  ;;  %v1185_v45 = vmul.f32 0.125, %v1153_v3 }
  0xe3   : >> { %1308 = vrot.lane.b32.xlu1 %v865_v29, %s3621_s14  ;;  %v770_v39 = vsub.f32 %v674_v8, %v738_v33  ;;  %v547_v0 = vadd.f32 %v4632_v42, %v515_v49  ;;  %v677_v26 = vsub.f32 %v613_v6, %v4630_v47  ;;  %v994_v8 = vadd.f32 %v962_v43, %v578_v59 }
  0xe4   : >> { %v996_v33 = vadd.f32 %v964_v36, %v580_v52  ;;  %v995_v49 = vadd.f32 %v963_v11, %v4665_v58 }
  0xe5   : >> { %1306 = vrot.lane.b32.xlu0 %v864_v32, %s3621_s14  ;;  %v612_v7 = vadd.f32 %v580_v52, %v547_v0  ;;  %v834_v29 = vsub.f32 %v770_v39, %v802_v63  ;;  %v997_v32 = vadd.f32 %v965_v56, %v581_v21  ;;  %v773_v10 = vsub.f32 %v677_v26, %v741_v50  ;;  %v3503_v52 = vld [vmem:[%s5493_s3] sm:$0xff]  }
  0xe6   : >> { %v1026_v41 = vsub.f32 %v994_v8, %v4605_v25  ;;  %v1027_v6 = vsub.f32 %v995_v49, %v4602_v62  ;;  %v867_v0 = vmul.f32 0.125, %v835_v54  ;;  %v1028_v58 = vsub.f32 %v996_v33, %v4622_v17  ;;  %3291 = vmatprep.subr.bf16.mxu0 %v3503_v52  ;;  %3339 = vmatprep.subr.bf16.mxu1 %v3503_v52  ;;  %v3505_v54 = vld [vmem:[%s5493_s3 + $0x10] sm:$0xff]   ;;  %v3507_v49 = vld [vmem:[%s5493_s3 + $0x20] sm:$0xff]  }
  0xe7   : >> { %1465 = vrot.lane.b32.xlu1 %v1183_v38, %s3622_s15  ;;  %v676_v22 = vsub.f32 %v612_v7, %v4622_v17  ;;  %v837_v63 = vsub.f32 %v773_v10, %v805_v1  ;;  %v1029_v59 = vsub.f32 %v997_v32, %v4630_v47  ;;  %3347 = vmatpush3.bf16.msra.mxu1 %v3503_v52  ;;  %v3506_v32 = vld [vmem:[%s5493_s3 + $0x18] sm:$0xff]  }
  0xe8   : >> { %v1122_v21 = vsub.f32 %v1026_v41, %v4610_v15  ;;  %v1123_v38 = vsub.f32 %v1027_v6, %v4636_v13  ;;  %v3508_v6 = vld [vmem:[%s5493_s3 + $0x28] sm:$0xff]  }
  0xe9   : >> { %1463 = vrot.lane.b32.xlu0 %v1182_v31, %s3622_s15  ;;  %v772_v57 = vsub.f32 %v676_v22, %v740_v35  ;;  %v866_v31 = vmul.f32 0.125, %v834_v29  ;;  %v869_v25 = vmul.f32 0.125, %v837_v63  ;;  %v1125_v62 = vsub.f32 %v1029_v59, %v4645_v18 }
  0xea   : >> { %v1155_v47 = vsub.f32 %v1123_v38, %v4578_v9  ;;  %v1154_v1 = vsub.f32 %v1122_v21, %v4600_v40  ;;  %v1124_v35 = vsub.f32 %v1028_v58, %v4634_v37 }
  0xeb   : >> { %1469 = vrot.lane.b32.xlu1 %v1185_v45, %s3622_s15  ;;  %v836_v3 = vsub.f32 %v772_v57, %v804_v2  ;;  %v1157_v18 = vsub.f32 %v1125_v62, %v4616_v12 }
  0xec   : >> { %v1187_v17 = vmul.f32 0.125, %v1155_v47  ;;  %v1186_v13 = vmul.f32 0.125, %v1154_v1  ;;  %v1156_v9 = vsub.f32 %v1124_v35, %v4632_v42  ;;  %v3504_v42 = vld [vmem:[%s5493_s3 + $0x8] sm:$0xff]  }
  0xed   : >> { %1467 = vrot.lane.b32.xlu0 %v1184_v5, %s3622_s15  ;;  %v868_v15 = vmul.f32 0.125, %v836_v3  ;;  %v1189_v37 = vmul.f32 0.125, %v1157_v18  ;;  %3340 = vmatprep.subr.bf16.mxu1 %v3504_v42 }
  0xee   : >> { %v1188_v56 = vmul.f32 0.125, %v1156_v9  ;;  %3348 = vmatpush3.bf16.msra.mxu1 %v3504_v42 }
  0xef   : >> { %1312 = vrot.lane.b32.xlu1 %v867_v0, %s3621_s14  ;;  %v1259_v2 = vpop.permute.xlu1 %1258  ;;  %3341 = vmatprep.subr.bf16.mxu1 %v3505_v54 }
  0xf0   : >> { %1353 = vst.msk [vmem:[#allocation3 + $0x10] sm:$0xff] %vm1350_vm2, %v1259_v2 }
  0xf1   : >> { %1310 = vrot.lane.b32.xlu0 %v866_v31, %s3621_s14 }
  0xf2   : >> { %3349 = vmatpush3.bf16.msra.mxu1 %v3505_v54 }
  0xf3   : >> { %v1255_v43 = vpop.permute.xlu0 %1254  ;;  %1316 = vrot.lane.b32.xlu1 %v869_v25, %s3621_s14  ;;  %v1261_v50 = vpop.permute.xlu1 %1260  ;;  %3342 = vmatprep.subr.bf16.mxu1 %v3506_v32 }
  0xf4   : >> { %1351 = vst.msk [vmem:[#allocation3] sm:$0xff] %vm1350_vm2, %v1255_v43  ;;  %1354 = vst.msk [vmem:[#allocation3 + $0x18] sm:$0xff] %vm1350_vm2, %v1261_v50 }
  0xf5   : >> { %1314 = vrot.lane.b32.xlu0 %v868_v15, %s3621_s14 }
  0xf6   : >> { %3350 = vmatpush3.bf16.msra.mxu1 %v3506_v32 }
  0xf7   : >> { %v1257_v40 = vpop.permute.xlu0 %1256  ;;  %1473 = vrot.lane.b32.xlu1 %v1187_v17, %s3622_s15  ;;  %v1418_v12 = vpop.permute.xlu1 %1417  ;;  %3343 = vmatprep.subr.bf16.mxu1 %v3507_v49 }
  0xf8   : >> { %1352 = vst.msk [vmem:[#allocation3 + $0x8] sm:$0xff] %vm1350_vm2, %v1257_v40 }
  0xf9   : >> { %1471 = vrot.lane.b32.xlu0 %v1186_v13, %s3622_s15  ;;  %1513 = vst.msk [vmem:[#allocation3 + $0x8] sm:$0xff] %vm1511_vm3, %v1418_v12 }
  0xfa   : >> { %3351 = vmatpush3.bf16.msra.mxu1 %v3507_v49 }
  0xfb   : >> { %v1416_v39 = vpop.permute.xlu0 %1415  ;;  %1477 = vrot.lane.b32.xlu1 %v1189_v37, %s3622_s15  ;;  %v1422_v61 = vpop.permute.xlu1 %1421  ;;  %3344 = vmatprep.subr.bf16.mxu1 %v3508_v6 }
  0xfc   : >> { %1512 = vst.msk [vmem:[#allocation3] sm:$0xff] %vm1511_vm3, %v1416_v39  ;;  %1515 = vst.msk [vmem:[#allocation3 + $0x18] sm:$0xff] %vm1511_vm3, %v1422_v61 }
  0xfd   : >> { %1475 = vrot.lane.b32.xlu0 %v1188_v56, %s3622_s15 }
  0xfe   : >> { %3352 = vmatpush3.bf16.msra.mxu1 %v3508_v6 }
  0xff   : >> { %v1420_v5 = vpop.permute.xlu0 %1419  ;;  %v1265_v36 = vpop.permute.xlu1 %1264 }
 0x100   : >> { %1514 = vst.msk [vmem:[#allocation3 + $0x10] sm:$0xff] %vm1511_vm3, %v1420_v5  ;;  %v1545_v11 = vld [vmem:[#allocation3 + $0x8] sm:$0xff] }
 0x101   : >> { %1356 = vst.msk [vmem:[#allocation3 + $0x28] sm:$0xff] %vm1350_vm2, %v1265_v36 }
 0x103   : >> { %v1263_v26 = vpop.permute.xlu0 %1262  ;;  %v1544_v7 = vld [vmem:[#allocation3] sm:$0xff]  ;;  %v1269_v33 = vpop.permute.xlu1 %1268  ;;  %v1547_v10 = vld [vmem:[#allocation3 + $0x18] sm:$0xff] }
 0x104   : >> { %1355 = vst.msk [vmem:[#allocation3 + $0x20] sm:$0xff] %vm1350_vm2, %v1263_v26  ;;  %v1576_v29 = vpack.c.bf16 %v1545_v11, %v1544_v7  ;;  %1358 = vst.msk [vmem:[#allocation3 + $0x38] sm:$0xff] %vm1350_vm2, %v1269_v33 }
 0x106   : >> { %3259 = vmatprep.mubr.msk.bf16.mxu0 %vm1623_vm4, %v1576_v29 }
 0x107   : >> { %v1267_v8 = vpop.permute.xlu0 %1266  ;;  %v1546_v45 = vld [vmem:[#allocation3 + $0x10] sm:$0xff]  ;;  %v1426_v41 = vpop.permute.xlu1 %1425 }
 0x108   : >> { %1357 = vst.msk [vmem:[#allocation3 + $0x30] sm:$0xff] %vm1350_vm2, %v1267_v8  ;;  %v1577_v22 = vpack.c.bf16 %v1547_v10, %v1546_v45 }
 0x109   : >> { %1517 = vst.msk [vmem:[#allocation3 + $0x28] sm:$0xff] %vm1511_vm3, %v1426_v41 }
 0x10a   : >> { %3260 = vmatmul.mubr.msk.bf16.vlgmr.msra.gmra.mrb[0].mxu0 %vm1623_vm4, %v1577_v22 }
 0x10b   : >> { %v1424_v57 = vpop.permute.xlu0 %1423  ;;  %3292 = vmatpush3.bf16.msra.mxu0 %v3503_v52  ;;  %v1430_v0 = vpop.permute.xlu1 %1429 }
 0x10c   : >> { %1516 = vst.msk [vmem:[#allocation3 + $0x20] sm:$0xff] %vm1511_vm3, %v1424_v57  ;;  %3293 = vmatprep.subr.bf16.mxu0 %v3504_v42  ;;  %1519 = vst.msk [vmem:[#allocation3 + $0x38] sm:$0xff] %vm1511_vm3, %v1430_v0 }
 0x10f   : >> { %v1428_v63 = vpop.permute.xlu0 %1427  ;;  %3294 = vmatpush3.bf16.msra.mxu0 %v3504_v42  ;;  %v1273_v21 = vpop.permute.xlu1 %1272 }
 0x110   : >> { %1518 = vst.msk [vmem:[#allocation3 + $0x30] sm:$0xff] %vm1511_vm3, %v1428_v63  ;;  %3295 = vmatprep.subr.bf16.mxu0 %v3505_v54  ;;  %v1549_v3 = vld [vmem:[#allocation3 + $0x28] sm:$0xff] }
 0x111   : >> { %1360 = vst.msk [vmem:[#allocation3 + $0x48] sm:$0xff] %vm1350_vm2, %v1273_v21 }
 0x113   : >> { %v1271_v59 = vpop.permute.xlu0 %1270  ;;  %v1548_v31 = vld [vmem:[#allocation3 + $0x20] sm:$0xff]  ;;  %3296 = vmatpush3.bf16.msra.mxu0 %v3505_v54  ;;  %v1277_v58 = vpop.permute.xlu1 %1276  ;;  %v1551_v15 = vld [vmem:[#allocation3 + $0x38] sm:$0xff] }
 0x114   : >> { %1359 = vst.msk [vmem:[#allocation3 + $0x40] sm:$0xff] %vm1350_vm2, %v1271_v59  ;;  %v1578_v38 = vpack.c.bf16 %v1549_v3, %v1548_v31  ;;  %3297 = vmatprep.subr.bf16.mxu0 %v3506_v32  ;;  %1362 = vst.msk [vmem:[#allocation3 + $0x58] sm:$0xff] %vm1350_vm2, %v1277_v58 }
 0x116   : >> { %3263 = vmatprep.mubr.msk.bf16.mxu0 %vm1623_vm4, %v1578_v38 }
 0x117   : >> { %v1275_v25 = vpop.permute.xlu0 %1274  ;;  %v1550_v62 = vld [vmem:[#allocation3 + $0x30] sm:$0xff]  ;;  %3298 = vmatpush3.bf16.msra.mxu0 %v3506_v32 }
 0x118   : >> { %1361 = vst.msk [vmem:[#allocation3 + $0x50] sm:$0xff] %vm1350_vm2, %v1275_v25  ;;  %v1579_v47 = vpack.c.bf16 %v1551_v15, %v1550_v62  ;;  %3299 = vmatprep.subr.bf16.mxu0 %v3507_v49  ;;  %v1434_v1 = vpop.permute.xlu1 %1433 }
 0x119   : >> { %1521 = vst.msk [vmem:[#allocation3 + $0x48] sm:$0xff] %vm1511_vm3, %v1434_v1 }
 0x11a   : >> { %3264 = vmatmul.mubr.msk.bf16.gmra.mrb[4].mxu0 %vm1623_vm4, %v1579_v47 }
 0x11b   : >> { %v1432_v35 = vpop.permute.xlu0 %1431  ;;  %3300 = vmatpush3.bf16.msra.mxu0 %v3507_v49 }
 0x11c   : >> { %1520 = vst.msk [vmem:[#allocation3 + $0x40] sm:$0xff] %vm1511_vm3, %v1432_v35  ;;  %3301 = vmatprep.subr.bf16.mxu0 %v3508_v6  ;;  %v1438_v2 = vpop.permute.xlu1 %1437 }
 0x11d   : >> { %1523 = vst.msk [vmem:[#allocation3 + $0x58] sm:$0xff] %vm1511_vm3, %v1438_v2 }
 0x11f   : >> { %v1436_v43 = vpop.permute.xlu0 %1435  ;;  %3302 = vmatpush3.bf16.msra.mxu0 %v3508_v6 }
 0x120   : >> { %1522 = vst.msk [vmem:[#allocation3 + $0x50] sm:$0xff] %vm1511_vm3, %v1436_v43  ;;  %v1281_v17 = vpop.permute.xlu1 %1280  ;;  %v1553_v9 = vld [vmem:[#allocation3 + $0x48] sm:$0xff] }
 0x121   : >> { %1364 = vst.msk [vmem:[#allocation3 + $0x68] sm:$0xff] %vm1350_vm2, %v1281_v17 }
 0x123   : >> { %v1279_v13 = vpop.permute.xlu0 %1278  ;;  %v1552_v18 = vld [vmem:[#allocation3 + $0x40] sm:$0xff] }
 0x124   : >> { %1363 = vst.msk [vmem:[#allocation3 + $0x60] sm:$0xff] %vm1350_vm2, %v1279_v13  ;;  %v1580_v50 = vpack.c.bf16 %v1553_v9, %v1552_v18  ;;  %v1285_v40 = vpop.permute.xlu1 %1284  ;;  %v1555_v52 = vld [vmem:[#allocation3 + $0x58] sm:$0xff] }
 0x125   : >> { %1366 = vst.msk [vmem:[#allocation3 + $0x78] sm:$0xff] %vm1350_vm2, %v1285_v40 }
 0x126   : >> { %3267 = vmatprep.mubr.msk.bf16.mxu0 %vm1623_vm4, %v1580_v50 }
 0x127   : >> { %v1283_v37 = vpop.permute.xlu0 %1282  ;;  %v1554_v56 = vld [vmem:[#allocation3 + $0x50] sm:$0xff] }
 0x128   : >> { %1365 = vst.msk [vmem:[#allocation3 + $0x70] sm:$0xff] %vm1350_vm2, %v1283_v37  ;;  %v1581_v12 = vpack.c.bf16 %v1555_v52, %v1554_v56  ;;  %v1442_v39 = vpop.permute.xlu1 %1441  ;;  %v3509_v52 = vld [vmem:[%s5493_s3 + $0x30] sm:$0xff]  }
 0x129   : >> { %1525 = vst.msk [vmem:[#allocation3 + $0x68] sm:$0xff] %vm1511_vm3, %v1442_v39  ;;  %3303 = vmatprep.subr.bf16.mxu0 %v3509_v52  ;;  %3345 = vmatprep.subr.bf16.mxu1 %v3509_v52 }
 0x12a   : >> { %3268 = vmatmul.mubr.msk.bf16.gmra.mrb[8].mxu0 %vm1623_vm4, %v1581_v12  ;;  %3353 = vmatpush3.bf16.msra.mxu1 %v3509_v52 }
 0x12b   : >> { %v1440_v42 = vpop.permute.xlu0 %1439  ;;  %3304 = vmatpush3.bf16.msra.mxu0 %v3509_v52 }
 0x12c   : >> { %1524 = vst.msk [vmem:[#allocation3 + $0x60] sm:$0xff] %vm1511_vm3, %v1440_v42  ;;  %v1446_v61 = vpop.permute.xlu1 %1445  ;;  %v3510_v42 = vld [vmem:[%s5493_s3 + $0x38] sm:$0xff]  }
 0x12d   : >> { %1527 = vst.msk [vmem:[#allocation3 + $0x78] sm:$0xff] %vm1511_vm3, %v1446_v61  ;;  %3305 = vmatprep.subr.bf16.mxu0 %v3510_v42  ;;  %3346 = vmatprep.subr.bf16.mxu1 %v3510_v42 }
 0x12e   : >> { %3354 = vmatpush3.bf16.msra.mxu1 %v3510_v42 }
 0x12f   : >> { %v1444_v5 = vpop.permute.xlu0 %1443  ;;  %3306 = vmatpush3.bf16.msra.mxu0 %v3510_v42  ;;  %v2120_v42 = vld [vmem:[#allocation2 + $0x6f] sm:$0xff] }
 0x130   : >> { %1526 = vst.msk [vmem:[#allocation3 + $0x70] sm:$0xff] %vm1511_vm3, %v1444_v5  ;;  %v1289_v54 = vpop.permute.xlu1 %1288  ;;  %v1557_v7 = vld [vmem:[#allocation3 + $0x68] sm:$0xff] }
 0x131   : >> { %1368 = vst.msk [vmem:[#allocation3 + $0x88] sm:$0xff] %vm1350_vm2, %v1289_v54 }
 0x133   : >> { %v1287_v36 = vpop.permute.xlu0 %1286  ;;  %v1556_v26 = vld [vmem:[#allocation3 + $0x60] sm:$0xff] }
 0x134   : >> { %1367 = vst.msk [vmem:[#allocation3 + $0x80] sm:$0xff] %vm1350_vm2, %v1287_v36  ;;  %v1582_v11 = vpack.c.bf16 %v1557_v7, %v1556_v26  ;;  %v1293_v29 = vpop.permute.xlu1 %1292  ;;  %v1559_v8 = vld [vmem:[#allocation3 + $0x78] sm:$0xff] }
 0x135   : >> { %1370 = vst.msk [vmem:[#allocation3 + $0x98] sm:$0xff] %vm1350_vm2, %v1293_v29 }
 0x136   : >> { %3271 = vmatprep.mubr.msk.bf16.mxu0 %vm1623_vm4, %v1582_v11 }
 0x137   : >> { %v1291_v32 = vpop.permute.xlu0 %1290  ;;  %v1558_v33 = vld [vmem:[#allocation3 + $0x70] sm:$0xff] }
 0x138   : >> { %1369 = vst.msk [vmem:[#allocation3 + $0x90] sm:$0xff] %vm1350_vm2, %v1291_v32  ;;  %v1583_v45 = vpack.c.bf16 %v1559_v8, %v1558_v33 }
 0x139   : >> { %v1450_v10 = vpop.permute.xlu1 %1449 }
 0x13a   : >> { %3272 = vmatmul.mubr.msk.bf16.gmra.mrb[12].mxu0 %vm1623_vm4, %v1583_v45  ;;  %1529 = vst.msk [vmem:[#allocation3 + $0x88] sm:$0xff] %vm1511_vm3, %v1450_v10 }
 0x13b   : >> { %v1448_v22 = vpop.permute.xlu0 %1447 }
 0x13c   : >> { %1528 = vst.msk [vmem:[#allocation3 + $0x80] sm:$0xff] %vm1511_vm3, %v1448_v22 }
 0x13d   : >> { %v1454_v49 = vpop.permute.xlu1 %1453 }
 0x13e   : >> { %1531 = vst.msk [vmem:[#allocation3 + $0x98] sm:$0xff] %vm1511_vm3, %v1454_v49 }
 0x13f   : >> { %v1452_v41 = vpop.permute.xlu0 %1451 }
 0x140   : >> { %1530 = vst.msk [vmem:[#allocation3 + $0x90] sm:$0xff] %vm1511_vm3, %v1452_v41 }
 0x141   : >> { %v1297_v57 = vpop.permute.xlu1 %1296  ;;  %v1561_v63 = vld [vmem:[#allocation3 + $0x88] sm:$0xff] }
 0x142   : >> { %1372 = vst.msk [vmem:[#allocation3 + $0xa8] sm:$0xff] %vm1350_vm2, %v1297_v57 }
 0x143   : >> { %v1295_v6 = vpop.permute.xlu0 %1294  ;;  %v1560_v0 = vld [vmem:[#allocation3 + $0x80] sm:$0xff] }
 0x144   : >> { %1371 = vst.msk [vmem:[#allocation3 + $0xa0] sm:$0xff] %vm1350_vm2, %v1295_v6  ;;  %v1584_v21 = vpack.c.bf16 %v1561_v63, %v1560_v0 }
 0x145   : >> { %v1301_v59 = vpop.permute.xlu1 %1300  ;;  %v1563_v38 = vld [vmem:[#allocation3 + $0x98] sm:$0xff] }
 0x146   : >> { %3275 = vmatprep.mubr.msk.bf16.mxu0 %vm1623_vm4, %v1584_v21  ;;  %1374 = vst.msk [vmem:[#allocation3 + $0xb8] sm:$0xff] %vm1350_vm2, %v1301_v59  ;;  %v2115_v21 = vld [vmem:[#allocation2 + $0x27] sm:$0xff]  ;;  %v2116_v59 = vld [vmem:[#allocation2 + $0x2f] sm:$0xff] }
 0x147   : >> { %v1299_v31 = vpop.permute.xlu0 %1298  ;;  %v1562_v3 = vld [vmem:[#allocation3 + $0x90] sm:$0xff] }
 0x148   : >> { %1373 = vst.msk [vmem:[#allocation3 + $0xb0] sm:$0xff] %vm1350_vm2, %v1299_v31  ;;  %v1585_v58 = vpack.c.bf16 %v1563_v38, %v1562_v3  ;;  %v2113_v31 = vld [vmem:[#allocation2 + $0x7] sm:$0xff]  ;;  %v2114_v3 = vld [vmem:[#allocation2 + $0xf] sm:$0xff]  ;;  %v2147_v38 = vmax.f32 %v4177_v55, %v2115_v21 }
 0x149   : >> { %v1458_v25 = vpop.permute.xlu1 %1457 }
 0x14a   : >> { %3276 = vmatmul.mubr.msk.bf16.gmra.mrb[16].mxu0 %vm1623_vm4, %v1585_v58  ;;  %1533 = vst.msk [vmem:[#allocation3 + $0xa8] sm:$0xff] %vm1511_vm3, %v1458_v25  ;;  %v2148_v58 = vmax.f32 %v4218_v24, %v2116_v59  ;;  %v2145_v25 = vmax.f32 %v4175_v53, %v2113_v31  ;;  %v2369_v59 = vld [vmem:[#allocation2 + $0x29] sm:$0xff]  ;;  %v2370_v31 = vld [vmem:[#allocation2 + $0x31] sm:$0xff] }
 0x14b   : >> { %v1456_v62 = vpop.permute.xlu0 %1455 }
 0x14c   : >> { %1532 = vst.msk [vmem:[#allocation3 + $0xa0] sm:$0xff] %vm1511_vm3, %v1456_v62  ;;  %v2146_v62 = vmax.f32 %v4210_v19, %v2114_v3 }
 0x14d   : >> { %v1462_v15 = vpop.permute.xlu1 %1461 }
 0x14e   : >> { %1535 = vst.msk [vmem:[#allocation3 + $0xb8] sm:$0xff] %vm1511_vm3, %v1462_v15  ;;  %v2177_v15 = vld [vmem:[#allocation2 + $0x8] sm:$0xff] }
 0x14f   : >> { %v1460_v47 = vpop.permute.xlu0 %1459 }
 0x150   : >> { %1534 = vst.msk [vmem:[#allocation3 + $0xb0] sm:$0xff] %vm1511_vm3, %v1460_v47  ;;  %v2178_v47 = vld [vmem:[#allocation2 + $0x10] sm:$0xff] }
 0x151   : >> { %v1305_v1 = vpop.permute.xlu1 %1304  ;;  %v1565_v43 = vld [vmem:[#allocation3 + $0xa8] sm:$0xff] }
 0x152   : >> { %1376 = vst.msk [vmem:[#allocation3 + $0xc8] sm:$0xff] %vm1350_vm2, %v1305_v1  ;;  %v2211_v1 = vmax.f32 %v2147_v38, %v4175_v53 }
 0x153   : >> { %v1303_v35 = vpop.permute.xlu0 %1302  ;;  %v1564_v2 = vld [vmem:[#allocation3 + $0xa0] sm:$0xff] }
 0x154   : >> { %1375 = vst.msk [vmem:[#allocation3 + $0xc0] sm:$0xff] %vm1350_vm2, %v1303_v35  ;;  %v1586_v17 = vpack.c.bf16 %v1565_v43, %v1564_v2  ;;  %v2212_v35 = vmax.f32 %v2148_v58, %v4210_v19  ;;  %v2243_v2 = vld [vmem:[#allocation2 + $0x29] sm:$0xff]  ;;  %v2209_v43 = vmax.f32 %v2145_v25, %v2177_v15  ;;  %v5606_v19 = vld [vmem:[#allocation37_spill] sm:$0xff] }
 0x155   : >> { %v1309_v13 = vpop.permute.xlu1 %1308  ;;  %v1567_v50 = vld [vmem:[#allocation3 + $0xb8] sm:$0xff]  ;;  %v2126_v58 = vld [vmem:[#allocation2 + $0xcf] sm:$0xff]  ;;  %v4867_v25 = vld [vmem:[#allocation2 + $0x67] sm:$0xff] }
 0x156   : >> { %3279 = vmatprep.mubr.msk.bf16.mxu0 %vm1623_vm4, %v1586_v17  ;;  %1378 = vst.msk [vmem:[#allocation3 + $0xd8] sm:$0xff] %vm1350_vm2, %v1309_v13  ;;  %v2244_v17 = vld [vmem:[#allocation2 + $0x31] sm:$0xff]  ;;  %v2210_v13 = vmax.f32 %v2146_v62, %v2178_v47 }
 0x157   : >> { %v1307_v18 = vpop.permute.xlu0 %1306  ;;  %v1566_v9 = vld [vmem:[#allocation3 + $0xb0] sm:$0xff] }
 0x158   : >> { %1377 = vst.msk [vmem:[#allocation3 + $0xd0] sm:$0xff] %vm1350_vm2, %v1307_v18  ;;  %v1587_v40 = vpack.c.bf16 %v1567_v50, %v1566_v9  ;;  %v2241_v18 = vld [vmem:[#allocation2 + $0x9] sm:$0xff]  ;;  %v2242_v9 = vld [vmem:[#allocation2 + $0x11] sm:$0xff] }
 0x159   : >> { %v1466_v37 = vpop.permute.xlu1 %1465  ;;  %v2118_v50 = vld [vmem:[#allocation2 + $0x4f] sm:$0xff]  ;;  %v2274_v52 = vmax.f32 %v2210_v13, %v2242_v9  ;;  %v2125_v9 = vld [vmem:[#allocation2 + $0xc7] sm:$0xff] }
 0x15a   : >> { %3280 = vmatmul.mubr.msk.bf16.gmra.mrb[20].mxu0 %vm1623_vm4, %v1587_v40  ;;  %1537 = vst.msk [vmem:[#allocation3 + $0xc8] sm:$0xff] %vm1511_vm3, %v1466_v37  ;;  %v2275_v40 = vmax.f32 %v2211_v1, %v2243_v2  ;;  %v2276_v37 = vmax.f32 %v2212_v35, %v2244_v17  ;;  %v4869_v62 = vld [vmem:[#allocation2 + $0x6f] sm:$0xff] }
 0x15b   : >> { %v1464_v56 = vpop.permute.xlu0 %1463  ;;  %v4874_v35 = vld [vmem:[#allocation2 + $0x71] sm:$0xff] }
 0x15c   : >> { %1536 = vst.msk [vmem:[#allocation3 + $0xc0] sm:$0xff] %vm1511_vm3, %v1464_v56  ;;  %v2273_v56 = vmax.f32 %v2209_v43, %v2241_v18 }
 0x15d   : >> { %v1470_v12 = vpop.permute.xlu1 %1469 }
 0x15e   : >> { %1539 = vst.msk [vmem:[#allocation3 + $0xd8] sm:$0xff] %vm1511_vm3, %v1470_v12  ;;  %v2117_v12 = vld [vmem:[#allocation2 + $0x47] sm:$0xff] }
 0x15f   : >> { %v1468_v39 = vpop.permute.xlu0 %1467 }
 0x160   : >> { %1538 = vst.msk [vmem:[#allocation3 + $0xd0] sm:$0xff] %vm1511_vm3, %v1468_v39  ;;  %v2150_v39 = vmax.f32 %v4253_v16, %v2118_v50  ;;  %v2499_v50 = vld [vmem:[#allocation2 + $0x68] sm:$0xff] }
 0x161   : >> { %v1313_v61 = vpop.permute.xlu1 %1312  ;;  %v1569_v36 = vld [vmem:[#allocation3 + $0xc8] sm:$0xff] }
 0x162   : >> { %1380 = vst.msk [vmem:[#allocation3 + $0xe8] sm:$0xff] %vm1350_vm2, %v1313_v61  ;;  %v2119_v61 = vld [vmem:[#allocation2 + $0x67] sm:$0xff] }
 0x163   : >> { %v1311_v5 = vpop.permute.xlu0 %1310  ;;  %v1568_v54 = vld [vmem:[#allocation3 + $0xc0] sm:$0xff] }
 0x164   : >> { %1379 = vst.msk [vmem:[#allocation3 + $0xe0] sm:$0xff] %vm1350_vm2, %v1311_v5  ;;  %v1588_v26 = vpack.c.bf16 %v1569_v36, %v1568_v54  ;;  %v2122_v5 = vld [vmem:[#allocation2 + $0x8f] sm:$0xff]  ;;  %v2307_v54 = vld [vmem:[#allocation2 + $0x47] sm:$0xff] }
 0x165   : >> { %v1317_v7 = vpop.permute.xlu1 %1316  ;;  %v1571_v32 = vld [vmem:[#allocation3 + $0xd8] sm:$0xff]  ;;  %v2308_v36 = vld [vmem:[#allocation2 + $0x4f] sm:$0xff]  ;;  %v2154_v3 = vmax.f32 %v4299_v34, %v2122_v5 }
 0x166   : >> { %3283 = vmatprep.mubr.msk.bf16.mxu0 %vm1623_vm4, %v1588_v26  ;;  %1382 = vst.msk [vmem:[#allocation3 + $0xf8] sm:$0xff] %vm1350_vm2, %v1317_v7  ;;  %v2149_v26 = vmax.f32 %v4260_v28, %v2117_v12  ;;  %v2121_v7 = vld [vmem:[#allocation2 + $0x87] sm:$0xff] }
 0x167   : >> { %v1315_v11 = vpop.permute.xlu0 %1314  ;;  %v1570_v29 = vld [vmem:[#allocation3 + $0xd0] sm:$0xff]  ;;  %v2153_v38 = vmax.f32 %v4306_v20, %v2121_v7  ;;  %v2497_v5 = vld [vmem:[#allocation2 + $0x48] sm:$0xff]  ;;  %v4890_v7 = vmax.f32 %v2154_v3, %v4275_v48  ;;  %v3623_v3 = vmov 3  }
 0x168   : >> { %1381 = vst.msk [vmem:[#allocation3 + $0xf0] sm:$0xff] %vm1350_vm2, %v1315_v11  ;;  %v1589_v33 = vpack.c.bf16 %v1571_v32, %v1570_v29  ;;  %v2339_v11 = vmax.f32 %v2275_v40, %v2307_v54  ;;  %v2340_v29 = vmax.f32 %v2276_v37, %v2308_v36  ;;  %v2305_v32 = vld [vmem:[#allocation2 + $0x27] sm:$0xff]  ;;  %v4872_v1 = vmax.f32 %v2149_v26, %v4177_v55  ;;  %v2500_v40 = vld [vmem:[#allocation2 + $0x70] sm:$0xff] }
 0x169   : >> { %v1474_v8 = vpop.permute.xlu1 %1473  ;;  %v2498_v26 = vld [vmem:[#allocation2 + $0x50] sm:$0xff]  ;;  %3424 = vset.pattern.permute.xlu1 %v3623_v3  ;;  %3418 = vset.pattern.permute.xlu0 %v3623_v3 }
 0x16a   : >> { %3284 = vmatmul.mubr.msk.bf16.gmra.mrb[24].mxu0 %vm1623_vm4, %v1589_v33  ;;  %1541 = vst.msk [vmem:[#allocation3 + $0xe8] sm:$0xff] %vm1511_vm3, %v1474_v8  ;;  %v2306_v33 = vld [vmem:[#allocation2 + $0x2f] sm:$0xff]  ;;  %v2152_v8 = vmax.f32 %v4275_v48, %v2120_v42 }
 0x16b   : >> { %v1472_v45 = vpop.permute.xlu0 %1471 }
 0x16c   : >> { %1540 = vst.msk [vmem:[#allocation3 + $0xe0] sm:$0xff] %vm1511_vm3, %v1472_v45  ;;  %v2151_v45 = vmax.f32 %v4289_v23, %v2119_v61  ;;  %v4880_v13 = vmax.f32 %v2152_v8, %v4253_v16  ;;  %v2157_v8 = vmax.f32 %v4350_v60, %v2125_v9  ;;  %v4924_v9 = vld [vmem:[#allocation2 + $0xa9] sm:$0xff] }
 0x16d   : >> { %v1478_v10 = vpop.permute.xlu1 %1477  ;;  %v2135_v16 = vld [vmem:[#allocation2 + $0x167] sm:$0xff] }
 0x16e   : >> { %1543 = vst.msk [vmem:[#allocation3 + $0xf8] sm:$0xff] %vm1511_vm3, %v1478_v10  ;;  %v2124_v10 = vld [vmem:[#allocation2 + $0xaf] sm:$0xff]  ;;  %v4883_v18 = vmax.f32 %v2151_v45, %v4260_v28 }
 0x16f   : >> { %v1476_v22 = vpop.permute.xlu0 %1475  ;;  %v2156_v2 = vmax.f32 %v4314_v51, %v2124_v10 }
 0x170   : >> { %1542 = vst.msk [vmem:[#allocation3 + $0xf0] sm:$0xff] %vm1511_vm3, %v1476_v22  ;;  %v2371_v22 = vld [vmem:[#allocation2 + $0x49] sm:$0xff] }
 0x171   : >> { %v1573_v41 = vld [vmem:[#allocation3 + $0xe8] sm:$0xff] }
 0x173   : >> { %v1572_v49 = vld [vmem:[#allocation3 + $0xe0] sm:$0xff] }
 0x174   : >> { %v1590_v57 = vpack.c.bf16 %v1573_v41, %v1572_v49  ;;  %v2372_v49 = vld [vmem:[#allocation2 + $0x51] sm:$0xff]  ;;  %v2337_v41 = vmax.f32 %v2273_v56, %v2305_v32 }
 0x175   : >> { %v1575_v0 = vld [vmem:[#allocation3 + $0xf8] sm:$0xff]  ;;  %v2404_v21 = vmax.f32 %v2340_v29, %v2372_v49  ;;  %v4895_v29 = vld [vmem:[#allocation2 + $0x69] sm:$0xff] }
 0x176   : >> { %3287 = vmatprep.mubr.msk.bf16.mxu0 %vm1623_vm4, %v1590_v57  ;;  %v2338_v57 = vmax.f32 %v2274_v52, %v2306_v33  ;;  %v2401_v15 = vmax.f32 %v2337_v41, %v2369_v59  ;;  %v4885_v52 = vld [vmem:[#allocation2 + $0x69] sm:$0xff]  ;;  %v4900_v33 = vmax.f32 %v2156_v2, %v4299_v34  ;;  %v2246_v41 = vld [vmem:[#allocation2 + $0x51] sm:$0xff] }
 0x177   : >> { %v1574_v6 = vld [vmem:[#allocation3 + $0xf0] sm:$0xff]  ;;  %v2468_v17 = vmax.f32 %v2404_v21, %v4869_v62 }
 0x178   : >> { %v1591_v63 = vpack.c.bf16 %v1575_v0, %v1574_v6  ;;  %v4863_v6 = vmax.f32 %v2150_v39, %v4218_v24  ;;  %v2123_v0 = vld [vmem:[#allocation2 + $0xa7] sm:$0xff]  ;;  %v2402_v47 = vmax.f32 %v2338_v57, %v2370_v31  ;;  %v2465_v37 = vmax.f32 %v2401_v15, %v2307_v54  ;;  %v4897_v54 = vld [vmem:[#allocation2 + $0x71] sm:$0xff] }
 0x179   : >> { %v2155_v12 = vmax.f32 %v4328_v44, %v2123_v0  ;;  %v2158_v39 = vmax.f32 %v4342_v46, %v2126_v58  ;;  %v2532_v61 = vmax.f32 %v2468_v17, %v2500_v40  ;;  %v2245_v57 = vld [vmem:[#allocation2 + $0x49] sm:$0xff]  ;;  %v2280_v0 = vmax.f32 %v4880_v13, %v4874_v35  ;;  %v4909_v21 = vld [vmem:[#allocation2 + $0x91] sm:$0xff] }
 0x17a   : >> { %3288 = vmatmul.mubr.msk.bf16.gmra.mrb[28].mxu0 %vm1623_vm4, %v1591_v63  ;;  %v2403_v63 = vmax.f32 %v2339_v11, %v2371_v22  ;;  %v2466_v56 = vmax.f32 %v2402_v47, %v2308_v36  ;;  %v4893_v11 = vmax.f32 %v2153_v38, %v4289_v23  ;;  %v2529_v36 = vmax.f32 %v2465_v37, %v2497_v5  ;;  %v4913_v47 = vld [vmem:[#allocation2 + $0x89] sm:$0xff]  ;;  %v4915_v35 = vld [vmem:[#allocation2 + $0xb1] sm:$0xff] }
 0x17b   : >> { %v2596_v10 = vmax.f32 %v2532_v61, %v4897_v54  ;;  %v5525_v38 = vmov 0.0   ;;  %v4918_v2 = vmax.f32 %v2155_v12, %v4306_v20  ;;  %v2278_v13 = vmax.f32 %v4863_v6, %v2246_v41  ;;  %v2127_v40 = vld [vmem:[#allocation2 + $0xe7] sm:$0xff]  ;;  %v2130_v12 = vld [vmem:[#allocation2 + $0x10f] sm:$0xff] }
 0x17c   : >> { %v2467_v43 = vmax.f32 %v2403_v63, %v4867_v25  ;;  %v2530_v32 = vmax.f32 %v2466_v56, %v2498_v26  ;;  %v2279_v63 = vmax.f32 %v4883_v18, %v4885_v52  ;;  %v2593_v59 = vmax.f32 %v2529_v36, %v2371_v22  ;;  %v2128_v22 = vld [vmem:[#allocation2 + $0xef] sm:$0xff]  ;;  %v2311_v26 = vld [vmem:[#allocation2 + $0x87] sm:$0xff]  ;;  %v5596_v56 = vld [vmem:[#allocation29_spill] sm:$0xff] }
 0x17d   : >> { %vm2628_vm6 = vcmp.gt.f32.partialorder %v2596_v10, 0.1  ;;  %v2277_v18 = vmax.f32 %v4872_v1, %v2245_v57  ;;  %v4931_v52 = vld [vmem:[#allocation2 + $0xd1] sm:$0xff]  ;;  %v4938_v61 = vmax.f32 %v2157_v8, %v4328_v44  ;;  %v5593_v10 = vld [vmem:[#allocation26_spill] sm:$0xff]  ;;  %v5594_v8 = vld [vmem:[#allocation27_spill] sm:$0xff]  ;;  %v5611_v55 = vmax.f32 %v4900_v33, %v4915_v35 }
 0x17e   : >> { %v2531_v42 = vmax.f32 %v2467_v43, %v2499_v50  ;;  %v2594_v31 = vmax.f32 %v2530_v32, %v2372_v49  ;;  %v3174_v15 = vsel %vm2628_vm6, 1.0, %v5525_v38  ;;  %vm2625_vm7 = vcmp.gt.f32.partialorder %v2593_v59, 0.1  ;;  %v2132_v5 = vld [vmem:[#allocation2 + $0x12f] sm:$0xff]  ;;  %v4958_v32 = vld [vmem:[#allocation2 + $0xa7] sm:$0xff] }
 0x17f   : >> { %v3171_v43 = vsel %vm2625_vm7, 1.0, %v5525_v38  ;;  %v4927_v50 = vmax.f32 %v2158_v39, %v4314_v51  ;;  %v2160_v39 = vmax.f32 %v4360_v30, %v2128_v22  ;;  %v2312_v36 = vld [vmem:[#allocation2 + $0x8f] sm:$0xff]  ;;  %v2159_v41 = vmax.f32 %v5593_v10, %v2127_v40  ;;  %v2133_v40 = vld [vmem:[#allocation2 + $0x147] sm:$0xff] }
 0x180   : >> { %v2595_v45 = vmax.f32 %v2531_v42, %v4895_v29  ;;  %vm2626_vm8 = vcmp.gt.f32.partialorder %v2594_v31, 0.1  ;;  %v2129_v42 = vld [vmem:[#allocation2 + $0x107] sm:$0xff]  ;;  %v2343_v57 = vmax.f32 %v2279_v63, %v2311_v26  ;;  %v2344_v59 = vmax.f32 %v2280_v0, %v2312_v36  ;;  %v2376_v22 = vld [vmem:[#allocation2 + $0x91] sm:$0xff] }
 0x181   : >> { %v3172_v17 = vsel %vm2626_vm8, 1.0, %v5525_v38  ;;  %v2162_v3 = vmax.f32 %v5594_v8, %v2130_v12  ;;  %v2164_v6 = vmax.f32 %v5596_v56, %v2132_v5  ;;  %v2134_v1 = vld [vmem:[#allocation2 + $0x14f] sm:$0xff]  ;;  %v4956_v12 = vmax.f32 %v2160_v39, %v4342_v46 }
 0x182   : >> { %vm2627_vm5 = vcmp.gt.f32.partialorder %v2595_v45, 0.1  ;;  %v3419_v37 = vpack.i.bf16 %v3172_v17, %v3171_v43  ;;  %v4943_v45 = vld [vmem:[#allocation2 + $0xc9] sm:$0xff]  ;;  %v2342_v43 = vmax.f32 %v2278_v13, %v4869_v62  ;;  %v2408_v0 = vmax.f32 %v2344_v59, %v2376_v22  ;;  %v4964_v13 = vld [vmem:[#allocation2 + $0xf1] sm:$0xff] }
 0x183   : >> { %v3173_v58 = vsel %vm2627_vm5, 1.0, %v5525_v38  ;;  %v5595_v17 = vld [vmem:[#allocation28_spill] sm:$0xff]  ;;  %v5598_v31 = vld [vmem:[#allocation31_spill] sm:$0xff]  ;;  %v4977_v20 = vmax.f32 %v2162_v3, %v4360_v30 }
 0x184   : >> { %v3425_v49 = vpack.i.bf16 %v3174_v15, %v3173_v58  ;;  %3420 = vperm.xlu0 %3418, %v3419_v37   ;;  %v2131_v58 = vld [vmem:[#allocation2 + $0x127] sm:$0xff]  ;;  %v2161_v37 = vmax.f32 %v5595_v17, %v2129_v42  ;;  %v4960_v38 = vld [vmem:[#allocation2 + $0xaf] sm:$0xff]  ;;  %v2406_v62 = vmax.f32 %v2342_v43, %v4897_v54  ;;  %v2166_v46 = vmax.f32 %v5598_v31, %v2134_v1 }
 0x185   : >> { %v2375_v15 = vld [vmem:[#allocation2 + $0x89] sm:$0xff]  ;;  %v5597_v42 = vld [vmem:[#allocation30_spill] sm:$0xff]  ;;  %v2472_v39 = vmax.f32 %v2408_v0, %v4960_v38  ;;  %v5072_v33 = vld [vmem:[#allocation2 + $0x191] sm:$0xff] }
 0x186   : >> { %3426 = vperm.xlu1 %3424, %v3425_v49   ;;  %v2341_v49 = vmax.f32 %v2277_v18, %v4867_v25  ;;  %v2407_v63 = vmax.f32 %v2343_v57, %v2375_v15  ;;  %v4967_v18 = vmax.f32 %v2159_v41, %v4350_v60  ;;  %v2163_v5 = vmax.f32 %v5597_v42, %v2131_v58  ;;  %v4972_v59 = vld [vmem:[#allocation2 + $0xe9] sm:$0xff] }
 0x187   : >> { %v5599_v34 = vld [vmem:[#allocation32_spill] sm:$0xff]  ;;  %v2470_v43 = vmax.f32 %v2406_v62, %v2312_v36  ;;  %v4980_v41 = vmax.f32 %v2161_v37, %v5593_v10  ;;  %v2501_v0 = vld [vmem:[#allocation2 + $0x88] sm:$0xff] }
 0x188   : >> { %v2405_v25 = vmax.f32 %v2341_v49, %v4895_v29  ;;  %v2471_v57 = vmax.f32 %v2407_v63, %v4958_v32  ;;  %v2165_v51 = vmax.f32 %v5599_v34, %v2133_v40  ;;  %v2503_v29 = vld [vmem:[#allocation2 + $0xa8] sm:$0xff]  ;;  %v2504_v49 = vld [vmem:[#allocation2 + $0xb0] sm:$0xff]  ;;  %v4985_v40 = vmax.f32 %v2164_v6, %v5594_v8  ;;  %v5600_v8 = vld [vmem:[#allocation33_spill] sm:$0xff] }
 0x189   : >> { %v2136_v58 = vld [vmem:[#allocation2 + $0x16f] sm:$0xff]  ;;  %v2536_v60 = vmax.f32 %v2472_v39, %v2504_v49  ;;  %v4998_v39 = vmax.f32 %v2163_v5, %v5595_v17  ;;  %v5601_v17 = vld [vmem:[#allocation34_spill] sm:$0xff] }
 0x18a   : >> { %v2469_v54 = vmax.f32 %v2405_v25, %v2311_v26  ;;  %v2535_v63 = vmax.f32 %v2471_v57, %v2503_v29  ;;  %v2502_v44 = vld [vmem:[#allocation2 + $0x90] sm:$0xff]  ;;  %v2168_v5 = vmax.f32 %v5600_v8, %v2136_v58  ;;  %v2167_v30 = vmax.f32 %v5601_v17, %v2135_v16 }
 0x18b   : >> { %v4987_v26 = vld [vmem:[#allocation2 + $0xa9] sm:$0xff]  ;;  %v4989_v36 = vld [vmem:[#allocation2 + $0xb1] sm:$0xff]  ;;  %v2534_v25 = vmax.f32 %v2470_v43, %v2502_v44  ;;  %v5007_v44 = vmax.f32 %v2166_v46, %v5596_v56 }
 0x18c   : >> { %v2533_v3 = vmax.f32 %v2469_v54, %v2501_v0  ;;  %v4993_v62 = vld [vmem:[#allocation2 + $0x111] sm:$0xff]  ;;  %v4995_v57 = vld [vmem:[#allocation2 + $0x109] sm:$0xff]  ;;  %v2599_v6 = vmax.f32 %v2535_v63, %v4987_v26  ;;  %v2600_v29 = vmax.f32 %v2536_v60, %v4989_v36  ;;  %v5010_v54 = vmax.f32 %v2165_v51, %v5597_v42 }
 0x18d   : >> { %v5002_v49 = vld [vmem:[#allocation2 + $0x131] sm:$0xff]  ;;  %v5004_v1 = vld [vmem:[#allocation2 + $0x129] sm:$0xff]  ;;  %v2598_v37 = vmax.f32 %v2534_v25, %v2376_v22  ;;  %v5602_v60 = vmov 0.0  }
 0x18e   : >> { %v2138_v43 = vld [vmem:[#allocation2 + $0x18f] sm:$0xff]  ;;  %v2597_v0 = vmax.f32 %v2533_v3, %v2375_v15  ;;  %v2137_v63 = vld [vmem:[#allocation2 + $0x187] sm:$0xff]  ;;  %vm2631_vm9 = vcmp.gt.f32.partialorder %v2599_v6, 0.1  ;;  %vm2632_vm10 = vcmp.gt.f32.partialorder %v2600_v29, 0.1 }
 0x18f   : >> { %v2140_v10 = vld [vmem:[#allocation2 + $0x1af] sm:$0xff]  ;;  %v3177_v48 = vsel %vm2631_vm9, 1.0, %v5602_v60  ;;  %v3178_v28 = vsel %vm2632_vm10, 1.0, %v5602_v60  ;;  %vm2630_vm12 = vcmp.gt.f32.partialorder %v2598_v37, 0.1  ;;  %v2139_v22 = vld [vmem:[#allocation2 + $0x1a7] sm:$0xff] }
 0x190   : >> { %vm2629_vm11 = vcmp.gt.f32.partialorder %v2597_v0, 0.1  ;;  %v5018_v46 = vld [vmem:[#allocation2 + $0x151] sm:$0xff]  ;;  %v5020_v15 = vld [vmem:[#allocation2 + $0x149] sm:$0xff]  ;;  %v3435_v58 = vpack.i.bf16 %v3178_v28, %v3177_v48  ;;  %v3176_v3 = vsel %vm2630_vm12, 1.0, %v5602_v60  ;;  %v5033_v48 = vmax.f32 %v2168_v5, %v5598_v31 }
 0x191   : >> { %5603 = vst [vmem:[#allocation40_spill] sm:$0xff] %v5018_v46  ;;  %v3175_v16 = vsel %vm2629_vm11, 1.0, %v5602_v60  ;;  %v5604_v6 = vld [vmem:[#allocation35_spill] sm:$0xff]  ;;  %v5605_v0 = vld [vmem:[#allocation36_spill] sm:$0xff]  ;;  %v2172_v24 = vmax.f32 %v5606_v19, %v2140_v10 }
 0x192   : >> { %v2170_v29 = vmax.f32 %v5604_v6, %v2138_v43  ;;  %v2169_v37 = vmax.f32 %v5605_v0, %v2137_v63  ;;  %v2142_v56 = vld [vmem:[#allocation2 + $0x1cf] sm:$0xff]  ;;  %v2141_v42 = vld [vmem:[#allocation2 + $0x1c7] sm:$0xff]  ;;  %v3430_v51 = vpack.i.bf16 %v3176_v3, %v3175_v16  ;;  %3436 = vperm.xlu0 %3418, %v3435_v58   ;;  %v5043_v16 = vmax.f32 %v2167_v30, %v5599_v34 }
 0x193   : >> { %v5040_v25 = vld [vmem:[#allocation2 + $0x171] sm:$0xff]  ;;  %v5608_v3 = vld [vmem:[#allocation38_spill] sm:$0xff]  ;;  %v5046_v31 = vld [vmem:[#allocation2 + $0x169] sm:$0xff]  ;;  %v2174_v10 = vmax.f32 %v4703_v4, %v2142_v56  ;;  %v5610_v43 = vmax.f32 %v4918_v2, %v4924_v9  ;;  %v5612_v56 = vmax.f32 %v4893_v11, %v4913_v47  ;;  %v5613_v2 = vmax.f32 %v4890_v7, %v4909_v21 }
 0x194   : >> { %5607 = vst [vmem:[#allocation41_spill] sm:$0xff] %v5040_v25  ;;  %v2171_v23 = vmax.f32 %v5608_v3, %v2139_v22  ;;  %3431 = vperm.xlu1 %3424, %v3430_v51   ;;  %v2315_v28 = vld [vmem:[#allocation2 + $0xc7] sm:$0xff]  ;;  %v2316_v5 = vld [vmem:[#allocation2 + $0xcf] sm:$0xff]  ;;  %v5057_v34 = vmax.f32 %v2170_v29, %v5600_v8  ;;  %v5060_v51 = vmax.f32 %v2169_v37, %v5601_v17 }
 0x195   : >> { %v5609_v58 = vld [vmem:[#allocation39_spill] sm:$0xff]  ;;  %v2347_v63 = vmax.f32 %v5610_v43, %v2315_v28  ;;  %v2348_v30 = vmax.f32 %v5611_v55, %v2316_v5  ;;  %v2380_v46 = vld [vmem:[#allocation2 + $0xd1] sm:$0xff]  ;;  %v2346_v9 = vmax.f32 %v5613_v2, %v4960_v38  ;;  %v5075_v35 = vmax.f32 %v2172_v24, %v5604_v6 }
 0x196   : >> { %v2173_v53 = vmax.f32 %v5609_v58, %v2141_v42  ;;  %v2379_v22 = vld [vmem:[#allocation2 + $0xc9] sm:$0xff]  ;;  %v2345_v42 = vmax.f32 %v5612_v56, %v4958_v32  ;;  %v5082_v7 = vmax.f32 %v2171_v23, %v5605_v0  ;;  %v5086_v24 = vld [vmem:[#allocation2 + $0x1b1] sm:$0xff] }
 0x197   : >> { %v2144_v29 = vld [vmem:[#allocation2 + $0x1ef] sm:$0xff]  ;;  %v2143_v37 = vld [vmem:[#allocation2 + $0x1e7] sm:$0xff]  ;;  %v2411_v43 = vmax.f32 %v2347_v63, %v2379_v22  ;;  %v2412_v8 = vmax.f32 %v2348_v30, %v2380_v46  ;;  %v2410_v56 = vmax.f32 %v2346_v9, %v4989_v36  ;;  %v5093_v30 = vmax.f32 %v2174_v10, %v5606_v19 }
 0x198   : >> { %v5079_v47 = vld [vmem:[#allocation2 + $0x189] sm:$0xff]  ;;  %v2409_v32 = vmax.f32 %v2345_v42, %v4987_v26  ;;  %v5090_v63 = vld [vmem:[#allocation2 + $0x1d1] sm:$0xff]  ;;  %v5096_v55 = vmax.f32 %v2173_v53, %v5608_v3  ;;  %v2176_v26 = vmax.f32 %v4229_v27, %v2144_v29  ;;  %v2175_v36 = vmax.f32 %v4717_v14, %v2143_v37 }
 0x199   : >> { %v2443_v21 = vld [vmem:[#allocation2 + $0xe7] sm:$0xff]  ;;  %v2444_v38 = vld [vmem:[#allocation2 + $0xef] sm:$0xff]  ;;  %v2474_v17 = vmax.f32 %v2410_v56, %v2316_v5 }
 0x19a   : >> { %v5088_v2 = vld [vmem:[#allocation2 + $0x1a9] sm:$0xff]  ;;  %v2475_v23 = vmax.f32 %v2411_v43, %v2443_v21  ;;  %v2476_v11 = vmax.f32 %v2412_v8, %v2444_v38  ;;  %v2473_v0 = vmax.f32 %v2409_v32, %v2315_v28  ;;  %v2572_v27 = vld [vmem:[#allocation2 + $0xf1] sm:$0xff]  ;;  %v5122_v29 = vmax.f32 %v2175_v36, %v5609_v58 }
 0x19b   : >> { %v5098_v6 = vld [vmem:[#allocation2 + $0x1c9] sm:$0xff]  ;;  %v5615_v32 = vmax.f32 %v4927_v50, %v4931_v52  ;;  %v5140_v50 = vld [vmem:[%s5492_s2] ss:$0 sm:$0xff] }
 0x19c   : >> { %v2507_v42 = vld [vmem:[#allocation2 + $0xe8] sm:$0xff]  ;;  %v2508_v9 = vld [vmem:[#allocation2 + $0xf0] sm:$0xff] }
 0x19d   : >> { %v2539_v53 = vmax.f32 %v2475_v23, %v2507_v42  ;;  %v2540_v19 = vmax.f32 %v2476_v11, %v2508_v9  ;;  %v2505_v43 = vld [vmem:[#allocation2 + $0xc8] sm:$0xff]  ;;  %v2506_v8 = vld [vmem:[#allocation2 + $0xd0] sm:$0xff]  ;;  %v5117_v9 = vmax.f32 %v2176_v26, %v4703_v4  ;;  %v2350_v26 = vmax.f32 %v5615_v32, %v2444_v38 }
 0x19e   : >> { %v2571_v37 = vld [vmem:[#allocation2 + $0xe9] sm:$0xff]  ;;  %v2537_v28 = vmax.f32 %v2473_v0, %v2505_v43  ;;  %v2538_v5 = vmax.f32 %v2474_v17, %v2506_v8  ;;  %v5114_v42 = vld [vmem:[#allocation2 + $0x1f1] sm:$0xff]  ;;  %v5617_v38 = vmax.f32 %v4956_v12, %v4964_v13 }
 0x19f   : >> { %v2603_v23 = vmax.f32 %v2539_v53, %v2571_v37  ;;  %v2604_v11 = vmax.f32 %v2540_v19, %v2572_v27  ;;  %v5119_v3 = vld [vmem:[#allocation2 + $0x1e9] sm:$0xff]  ;;  %v5614_v53 = vmax.f32 %v4938_v61, %v4943_v45 }
 0x1a0   : >> { %v2601_v0 = vmax.f32 %v2537_v28, %v2379_v22  ;;  %v2602_v17 = vmax.f32 %v2538_v5, %v2380_v46  ;;  %v2319_v43 = vld [vmem:[#allocation2 + $0x107] sm:$0xff]  ;;  %v2320_v8 = vld [vmem:[#allocation2 + $0x10f] sm:$0xff]  ;;  %v5616_v28 = vmax.f32 %v4967_v18, %v4972_v59 }
 0x1a1   : >> { %vm2635_vm13 = vcmp.gt.f32.partialorder %v2603_v23, 0.1  ;;  %vm2636_vm14 = vcmp.gt.f32.partialorder %v2604_v11, 0.1  ;;  %v2349_v19 = vmax.f32 %v5614_v53, %v2443_v21  ;;  %v2383_v45 = vld [vmem:[#allocation2 + $0x109] sm:$0xff]  ;;  %v2384_v21 = vld [vmem:[#allocation2 + $0x111] sm:$0xff]  ;;  %v5618_v53 = vmax.f32 %v4980_v41, %v4995_v57 }
 0x1a2   : >> { %v3181_v56 = vsel %vm2635_vm13, 1.0, %v5602_v60  ;;  %v3182_v25 = vsel %vm2636_vm14, 1.0, %v5602_v60  ;;  %vm2633_vm15 = vcmp.gt.f32.partialorder %v2601_v0, 0.1  ;;  %vm2634_vm1 = vcmp.gt.f32.partialorder %v2602_v17, 0.1 }
 0x1a3   : >> { %v3445_v22 = vpack.i.bf16 %v3182_v25, %v3181_v56  ;;  %v3179_v46 = vsel %vm2633_vm15, 1.0, %v5602_v60  ;;  %v3180_v36 = vsel %vm2634_vm1, 1.0, %v5602_v60  ;;  %v2351_v61 = vmax.f32 %v5616_v28, %v2319_v43  ;;  %v2447_v5 = vld [vmem:[#allocation2 + $0x127] sm:$0xff]  ;;  %v2448_v11 = vld [vmem:[#allocation2 + $0x12f] sm:$0xff] }
 0x1a4   : >> { %v3440_v52 = vpack.i.bf16 %v3180_v36, %v3179_v46  ;;  %v2352_v25 = vmax.f32 %v5617_v38, %v2320_v8  ;;  %v2413_v32 = vmax.f32 %v2349_v19, %v2571_v37  ;;  %v2414_v56 = vmax.f32 %v2350_v26, %v2572_v27  ;;  %v2511_v0 = vld [vmem:[#allocation2 + $0x128] sm:$0xff]  ;;  %v2510_v19 = vld [vmem:[#allocation2 + $0x110] sm:$0xff] }
 0x1a5   : >> { %3446 = vperm.xlu0 %3418, %v3445_v22   ;;  %v2415_v59 = vmax.f32 %v2351_v61, %v2383_v45  ;;  %v2509_v17 = vld [vmem:[#allocation2 + $0x108] sm:$0xff]  ;;  %v5152_v46 = vmax.f32 %v5618_v53, %v2447_v5  ;;  %v5619_v22 = vmax.f32 %v4977_v20, %v4993_v62  ;;  %v2512_v38 = vld [vmem:[#allocation2 + $0x130] sm:$0xff] }
 0x1a6   : >> { %3441 = vperm.xlu1 %3424, %v3440_v52   ;;  %v2416_v13 = vmax.f32 %v2352_v25, %v2384_v21  ;;  %v2477_v27 = vmax.f32 %v2413_v32, %v2319_v43  ;;  %v2478_v37 = vmax.f32 %v2414_v56, %v2320_v8  ;;  %v5154_v26 = vld [vmem:[#allocation2 + $0x147] sm:$0xff]  ;;  %v5156_v36 = vld [vmem:[#allocation2 + $0x14f] sm:$0xff]  ;;  %v5620_v43 = vmax.f32 %v4998_v39, %v5004_v1 }
 0x1a7   : >> { %v5161_v28 = vmax.f32 %v5619_v22, %v2448_v11  ;;  %v2479_v57 = vmax.f32 %v2415_v59, %v2447_v5  ;;  %v5621_v52 = vmax.f32 %v4985_v40, %v5002_v49  ;;  %v5172_v32 = vld [vmem:[#allocation2 + $0x149] sm:$0xff]  ;;  %v5175_v59 = vld [vmem:[#allocation2 + $0x151] sm:$0xff] }
 0x1a8   : >> { %v2355_v8 = vmax.f32 %v5620_v43, %v5154_v26  ;;  %v2480_v56 = vmax.f32 %v2416_v13, %v2448_v11  ;;  %v2575_v53 = vld [vmem:[#allocation2 + $0x129] sm:$0xff]  ;;  %v2542_v5 = vmax.f32 %v2478_v37, %v2510_v19  ;;  %v2576_v23 = vld [vmem:[#allocation2 + $0x131] sm:$0xff] }
 0x1a9   : >> { %v2356_v25 = vmax.f32 %v5621_v52, %v5156_v36  ;;  %v2543_v43 = vmax.f32 %v2479_v57, %v2511_v0  ;;  %v2451_v49 = vld [vmem:[#allocation2 + $0x167] sm:$0xff] }
 0x1aa   : >> { %v2419_v40 = vmax.f32 %v2355_v8, %v5172_v32  ;;  %v2515_v0 = vld [vmem:[#allocation2 + $0x168] sm:$0xff] }
 0x1ab   : >> { %v2607_v13 = vmax.f32 %v2543_v43, %v2575_v53  ;;  %v2418_v43 = vmax.f32 %v5161_v28, %v2576_v23 }
 0x1ad   : >> { %vm2639_vm3 = vcmp.gt.f32.partialorder %v2607_v13, 0.1 }
 0x1dd   : >> { %v3261_v12 = vpop.f32.mrb[0].mxu0 }
 0x1de   : >> { %v1715_v61 = vadd.f32 %v3261_v12, %v5140_v50  ;;  %v1706_v41 = vpop.f32.mrb[1].mxu0  ;;  %v2541_v12 = vmax.f32 %v2477_v27, %v2509_v17  ;;  %v2606_v17 = vmax.f32 %v2542_v5, %v2384_v21  ;;  %v2420_v27 = vmax.f32 %v2356_v25, %v5175_v59  ;;  %v2516_v21 = vld [vmem:[#allocation2 + $0x170] sm:$0xff]  ;;  %v2453_v5 = vld [vmem:[#allocation2 + $0x187] sm:$0xff] }
 0x1df   : >> { %v1707_v20 = vadd.f32 %v5140_v50, %v1706_v41  ;;  %v3262_v62 = vpop.f32.mrb[2].mxu0  ;;  %v2544_v41 = vmax.f32 %v2480_v56, %v2512_v38  ;;  %v2579_v56 = vld [vmem:[#allocation2 + $0x169] sm:$0xff] }
 0x1e0   : >> { %v1835_v22 = vmax.f32 %v1715_v61, 0.0  ;;  %v1718_v1 = vadd.f32 %v3262_v62, %v5140_v50  ;;  %v1709_v39 = vpop.f32.mrb[3].mxu0  ;;  %v2605_v10 = vmax.f32 %v2541_v12, %v2383_v45  ;;  %v2452_v61 = vld [vmem:[#allocation2 + $0x16f] sm:$0xff]  ;;  %v2483_v62 = vmax.f32 %v2419_v40, %v2451_v49 }
 0x1e1   : >> { %v1833_v52 = vmax.f32 %v1707_v20, 0.0  ;;  %v1710_v18 = vadd.f32 %v5140_v50, %v1709_v39  ;;  %v2608_v19 = vmax.f32 %v2544_v41, %v2576_v23  ;;  %vm2638_vm4 = vcmp.gt.f32.partialorder %v2606_v17, 0.1  ;;  %v2454_v41 = vld [vmem:[#allocation2 + $0x18f] sm:$0xff] }
 0x1e2   : >> { %v1836_v11 = vmax.f32 %v1718_v1, 0.0  ;;  %vm2637_vm2 = vcmp.gt.f32.partialorder %v2605_v10, 0.1  ;;  %v3185_v45 = vsel %vm2639_vm3, 1.0, %v5602_v60  ;;  %v3184_v38 = vsel %vm2638_vm4, 1.0, %v5602_v60  ;;  %v2580_v1 = vld [vmem:[#allocation2 + $0x171] sm:$0xff] }
 0x1e3   : >> { %v1834_v37 = vmax.f32 %v1710_v18, 0.0  ;;  %v3183_v8 = vsel %vm2637_vm2, 1.0, %v5602_v60  ;;  %vm2640_vm5 = vcmp.gt.f32.partialorder %v2608_v19, 0.1  ;;  %v2484_v10 = vmax.f32 %v2420_v27, %v2452_v61  ;;  %v2513_v17 = vld [vmem:[#allocation2 + $0x148] sm:$0xff]  ;;  %v2514_v27 = vld [vmem:[#allocation2 + $0x150] sm:$0xff] }
 0x1e4   : >> { %v1866_v57 = vpack.c.bf16 %v1836_v11, %v1835_v22  ;;  %v3186_v18 = vsel %vm2640_vm5, 1.0, %v5602_v60  ;;  %v3450_v25 = vpack.i.bf16 %v3184_v38, %v3183_v8  ;;  %v2547_v12 = vmax.f32 %v2483_v62, %v2515_v0  ;;  %v2517_v8 = vld [vmem:[#allocation2 + $0x188] sm:$0xff] }
 0x1e5   : >> { %v1865_v20 = vpack.c.bf16 %v1834_v37, %v1833_v52  ;;  %v3455_v22 = vpack.i.bf16 %v3186_v18, %v3185_v45  ;;  %v2417_v39 = vmax.f32 %v5152_v46, %v2575_v53  ;;  %v5622_v40 = vmax.f32 %v5010_v54, %v5020_v15  ;;  %v5623_v37 = vld [vmem:[#allocation40_spill] sm:$0xff] }
 0x1e6   : >> { %3451 = vperm.xlu1 %3424, %v3450_v25   ;;  %v2548_v11 = vmax.f32 %v2484_v10, %v2516_v21  ;;  %v2611_v13 = vmax.f32 %v2547_v12, %v2579_v56  ;;  %v5624_v19 = vmax.f32 %v5007_v44, %v5623_v37  ;;  %v2482_v23 = vmax.f32 %v2418_v43, %v5156_v36  ;;  %v2581_v53 = vld [vmem:[#allocation2 + $0x189] sm:$0xff]  ;;  %v2582_v54 = vld [vmem:[#allocation2 + $0x191] sm:$0xff] }
 0x1e7   : >> { %3307 = vmatprep.mubr.bf16.mxu0 %v1865_v20  ;;  %v2357_v52 = vmax.f32 %v5622_v40, %v2451_v49  ;;  %3456 = vperm.xlu0 %3418, %v3455_v22   ;;  %v2481_v46 = vmax.f32 %v2417_v39, %v5154_v26  ;;  %v5625_v15 = vmax.f32 %v5043_v16, %v5046_v31  ;;  %v5626_v20 = vld [vmem:[#allocation41_spill] sm:$0xff]  ;;  %v2518_v21 = vld [vmem:[#allocation2 + $0x190] sm:$0xff] }
 0x1e8   : >> { %3308 = vmatmul.mubr.bf16.vlgmr.msra.gmra.mrb[32].mxu0 %v1866_v57  ;;  %v2358_v62 = vmax.f32 %v5624_v19, %v2452_v61  ;;  %v2612_v0 = vmax.f32 %v2548_v11, %v2580_v1  ;;  %vm2643_vm6 = vcmp.gt.f32.partialorder %v2611_v13, 0.1  ;;  %v5627_v44 = vmax.f32 %v5033_v48, %v5626_v20 }
 0x1e9   : >> { %v2421_v28 = vmax.f32 %v2357_v52, %v2579_v56  ;;  %v2359_v49 = vmax.f32 %v5625_v15, %v2453_v5  ;;  %v3189_v45 = vsel %vm2643_vm6, 1.0, %v5602_v60  ;;  %v2545_v26 = vmax.f32 %v2481_v46, %v2513_v17  ;;  %v2455_v56 = vld [vmem:[#allocation2 + $0x1a7] sm:$0xff]  ;;  %v2520_v15 = vld [vmem:[#allocation2 + $0x1b0] sm:$0xff] }
 0x1ea   : >> { %v2422_v57 = vmax.f32 %v2358_v62, %v2580_v1  ;;  %v2360_v61 = vmax.f32 %v5627_v44, %v2454_v41  ;;  %v2546_v38 = vmax.f32 %v2482_v23, %v2514_v27  ;;  %vm2644_vm7 = vcmp.gt.f32.partialorder %v2612_v0, 0.1  ;;  %v2519_v17 = vld [vmem:[#allocation2 + $0x1a8] sm:$0xff] }
 0x1eb   : >> { %v2485_v36 = vmax.f32 %v2421_v28, %v2453_v5  ;;  %v2423_v25 = vmax.f32 %v2359_v49, %v2581_v53  ;;  %v3190_v10 = vsel %vm2644_vm7, 1.0, %v5602_v60  ;;  %v2609_v12 = vmax.f32 %v2545_v26, %v5172_v32  ;;  %v2456_v5 = vld [vmem:[#allocation2 + $0x1af] sm:$0xff] }
 0x1ec   : >> { %v2486_v18 = vmax.f32 %v2422_v57, %v2454_v41  ;;  %v2424_v31 = vmax.f32 %v2360_v61, %v2582_v54  ;;  %v2610_v22 = vmax.f32 %v2546_v38, %v5175_v59  ;;  %v3465_v43 = vpack.i.bf16 %v3190_v10, %v3189_v45  ;;  %v2583_v57 = vld [vmem:[#allocation2 + $0x1a9] sm:$0xff] }
 0x1ed   : >> { %v3265_v16 = vpop.f32.mrb[4].mxu0  ;;  %v2549_v48 = vmax.f32 %v2485_v36, %v2517_v8  ;;  %v2487_v52 = vmax.f32 %v2423_v25, %v2455_v56  ;;  %vm2641_vm8 = vcmp.gt.f32.partialorder %v2609_v12, 0.1  ;;  %v5628_v44 = vmax.f32 %v5060_v51, %v5079_v47  ;;  %v2457_v45 = vld [vmem:[#allocation2 + $0x1c7] sm:$0xff]  ;;  %v2458_v26 = vld [vmem:[#allocation2 + $0x1cf] sm:$0xff] }
 0x1ee   : >> { %v1731_v1 = vadd.f32 %v3265_v16, %v5140_v50  ;;  %v1722_v39 = vpop.f32.mrb[5].mxu0  ;;  %v2550_v40 = vmax.f32 %v2486_v18, %v2518_v21  ;;  %vm2642_vm9 = vcmp.gt.f32.partialorder %v2610_v22, 0.1  ;;  %3466 = vperm.xlu0 %3418, %v3465_v43   ;;  %v3187_v59 = vsel %vm2641_vm8, 1.0, %v5602_v60  ;;  %v2584_v21 = vld [vmem:[#allocation2 + $0x1b1] sm:$0xff]  ;;  %v2459_v25 = vld [vmem:[#allocation2 + $0x1e7] sm:$0xff] }
 0x1ef   : >> { %v1723_v11 = vadd.f32 %v5140_v50, %v1722_v39  ;;  %v3266_v41 = vpop.f32.mrb[6].mxu0  ;;  %v2613_v13 = vmax.f32 %v2549_v48, %v2581_v53  ;;  %v3188_v19 = vsel %vm2642_vm9, 1.0, %v5602_v60  ;;  %v2488_v0 = vmax.f32 %v2424_v31, %v2456_v5  ;;  %v2585_v48 = vld [vmem:[#allocation2 + $0x1c9] sm:$0xff] }
 0x1f0   : >> { %v1839_v27 = vmax.f32 %v1731_v1, 0.0  ;;  %v1734_v32 = vadd.f32 %v3266_v41, %v5140_v50  ;;  %v1725_v37 = vpop.f32.mrb[7].mxu0  ;;  %v3460_v23 = vpack.i.bf16 %v3188_v19, %v3187_v59  ;;  %v2614_v28 = vmax.f32 %v2550_v40, %v2582_v54  ;;  %v2586_v1 = vld [vmem:[#allocation2 + $0x1d1] sm:$0xff] }
 0x1f1   : >> { %v1837_v62 = vmax.f32 %v1723_v11, 0.0  ;;  %v1726_v46 = vadd.f32 %v5140_v50, %v1725_v37  ;;  %vm2645_vm10 = vcmp.gt.f32.partialorder %v2613_v13, 0.1  ;;  %v2551_v53 = vmax.f32 %v2487_v52, %v2519_v17  ;;  %v2460_v51 = vld [vmem:[#allocation2 + $0x1ef] sm:$0xff] }
 0x1f2   : >> { %v1840_v49 = vmax.f32 %v1734_v32, 0.0  ;;  %3461 = vperm.xlu1 %3424, %v3460_v23   ;;  %vm2646_vm11 = vcmp.gt.f32.partialorder %v2614_v28, 0.1  ;;  %v3191_v20 = vsel %vm2645_vm10, 1.0, %v5602_v60  ;;  %v2361_v61 = vmax.f32 %v5628_v44, %v2455_v56  ;;  %v2521_v56 = vld [vmem:[#allocation2 + $0x1c8] sm:$0xff]  ;;  %v2588_v41 = vld [vmem:[#allocation2 + $0x1f1] sm:$0xff] }
 0x1f3   : >> { %v1838_v8 = vmax.f32 %v1726_v46, 0.0  ;;  %v3192_v54 = vsel %vm2646_vm11, 1.0, %v5602_v60  ;;  %v2552_v36 = vmax.f32 %v2488_v0, %v2520_v15  ;;  %v2615_v18 = vmax.f32 %v2551_v53, %v2583_v57  ;;  %v2587_v11 = vld [vmem:[#allocation2 + $0x1e9] sm:$0xff] }
 0x1f4   : >> { %v1868_v38 = vpack.c.bf16 %v1840_v49, %v1839_v27  ;;  %v3470_v16 = vpack.i.bf16 %v3192_v54, %v3191_v20  ;;  %v5629_v10 = vmax.f32 %v5057_v34, %v5072_v33  ;;  %v2425_v22 = vmax.f32 %v2361_v61, %v2583_v57  ;;  %v2461_v32 = vld [vmem:[#allocation2 + $0x207] sm:$0xff]  ;;  %v2524_v46 = vld [vmem:[#allocation2 + $0x1f0] sm:$0xff] }
 0x1f5   : >> { %v1867_v31 = vpack.c.bf16 %v1838_v8, %v1837_v62  ;;  %v2616_v47 = vmax.f32 %v2552_v36, %v2584_v21  ;;  %vm2647_vm12 = vcmp.gt.f32.partialorder %v2615_v18, 0.1  ;;  %v5630_v39 = vmax.f32 %v5082_v7, %v5088_v2  ;;  %v2522_v7 = vld [vmem:[#allocation2 + $0x1d0] sm:$0xff]  ;;  %v2523_v62 = vld [vmem:[#allocation2 + $0x1e8] sm:$0xff] }
 0x1f6   : >> { %v2362_v12 = vmax.f32 %v5629_v10, %v2456_v5  ;;  %v5631_v40 = vmax.f32 %v5075_v35, %v5086_v24  ;;  %3471 = vperm.xlu1 %3424, %v3470_v16   ;;  %v3193_v34 = vsel %vm2647_vm12, 1.0, %v5602_v60  ;;  %v2489_v5 = vmax.f32 %v2425_v22, %v2457_v45  ;;  %v2462_v28 = vld [vmem:[#allocation2 + $0x20f] sm:$0xff] }
 0x1f7   : >> { %v2363_v43 = vmax.f32 %v5630_v39, %v2457_v45  ;;  %3311 = vmatprep.mubr.bf16.mxu1 %v1867_v31  ;;  %v5632_v13 = vmax.f32 %v5096_v55, %v5098_v6  ;;  %vm2648_vm13 = vcmp.gt.f32.partialorder %v2616_v47, 0.1  ;;  %v5633_v35 = vmax.f32 %v5093_v30, %v5090_v63  ;;  %v2525_v0 = vld [vmem:[#allocation2 + $0x208] sm:$0xff] }
 0x1f8   : >> { %v2364_v52 = vmax.f32 %v5631_v40, %v2458_v26  ;;  %v2426_v33 = vmax.f32 %v2362_v12, %v2584_v21  ;;  %3312 = vmatmul.mubr.bf16.vlgmr.msra.gmra.mrb[0].mxu1 %v1868_v38  ;;  %v3194_v37 = vsel %vm2648_vm13, 1.0, %v5602_v60  ;;  %v2553_v19 = vmax.f32 %v2489_v5, %v2521_v56  ;;  %v2589_v53 = vld [vmem:[#allocation2 + $0x209] sm:$0xff]  ;;  %v2590_v56 = vld [vmem:[#allocation2 + $0x211] sm:$0xff] }
 0x1f9   : >> { %v2365_v17 = vmax.f32 %v5632_v13, %v2459_v25  ;;  %v2427_v2 = vmax.f32 %v2363_v43, %v2585_v48  ;;  %v2366_v24 = vmax.f32 %v5633_v35, %v2460_v51  ;;  %v3475_v6 = vpack.i.bf16 %v3194_v37, %v3193_v34 }
 0x1fa   : >> { %v2428_v27 = vmax.f32 %v2364_v52, %v2586_v1  ;;  %v2490_v59 = vmax.f32 %v2426_v33, %v2458_v26  ;;  %v2617_v8 = vmax.f32 %v2553_v19, %v2585_v48  ;;  %v5634_v63 = vmax.f32 %v5122_v29, %v5119_v3  ;;  %v2526_v26 = vld [vmem:[#allocation2 + $0x210] sm:$0xff]  ;;  %v2463_v52 = vld [vmem:[#allocation2 + $0x227] sm:$0xff] }
 0x1fb   : >> { %v2429_v23 = vmax.f32 %v2365_v17, %v2587_v11  ;;  %v2491_v55 = vmax.f32 %v2427_v2, %v2459_v25  ;;  %v2430_v49 = vmax.f32 %v2366_v24, %v2588_v41  ;;  %3476 = vperm.xlu0 %3418, %v3475_v6   ;;  %v5635_v38 = vmax.f32 %v5117_v9, %v5114_v42  ;;  %v2527_v2 = vld [vmem:[#allocation2 + $0x228] sm:$0xff] }
 0x1fc   : >> { %v2492_v15 = vmax.f32 %v2428_v27, %v2460_v51  ;;  %v2554_v57 = vmax.f32 %v2490_v59, %v2522_v7  ;;  %v2367_v30 = vmax.f32 %v5634_v63, %v2461_v32  ;;  %vm2649_vm14 = vcmp.gt.f32.partialorder %v2617_v8, 0.1 }
 0x1fd   : >> { %v2493_v20 = vmax.f32 %v2429_v23, %v2461_v32  ;;  %v2555_v44 = vmax.f32 %v2491_v55, %v2523_v62  ;;  %v2494_v45 = vmax.f32 %v2430_v49, %v2462_v28  ;;  %v2368_v54 = vmax.f32 %v5635_v38, %v2462_v28  ;;  %v3269_v36 = vpop.f32.mrb[8].mxu0  ;;  %v2528_v32 = vld [vmem:[#allocation2 + $0x230] sm:$0xff] }
 0x1fe   : >> { %v2556_v61 = vmax.f32 %v2492_v15, %v2524_v46  ;;  %v2618_v21 = vmax.f32 %v2554_v57, %v2586_v1  ;;  %v2431_v25 = vmax.f32 %v2367_v30, %v2589_v53  ;;  %v1747_v31 = vadd.f32 %v3269_v36, %v5140_v50  ;;  %v1738_v16 = vpop.f32.mrb[9].mxu0  ;;  %v2591_v62 = vld [vmem:[#allocation2 + $0x229] sm:$0xff]  ;;  %v2592_v28 = vld [vmem:[#allocation2 + $0x231] sm:$0xff] }
 0x1ff   : >> { %v2557_v18 = vmax.f32 %v2493_v20, %v2525_v0  ;;  %v3195_v3 = vsel %vm2649_vm14, 1.0, %v5602_v60  ;;  %v2619_v29 = vmax.f32 %v2555_v44, %v2587_v11  ;;  %v1739_v12 = vadd.f32 %v5140_v50, %v1738_v16  ;;  %v3270_v22 = vpop.f32.mrb[10].mxu0 }
 0x200   : >> { %v2620_v10 = vmax.f32 %v2556_v61, %v2588_v41  ;;  %vm2650_vm15 = vcmp.gt.f32.partialorder %v2618_v21, 0.1  ;;  %v2558_v48 = vmax.f32 %v2494_v45, %v2526_v26  ;;  %v1843_v42 = vmax.f32 %v1747_v31, 0.0  ;;  %v1741_v1 = vpop.f32.mrb[11].mxu0  ;;  %v2464_v41 = vld [vmem:[#allocation2 + $0x22f] sm:$0xff] }
 0x201   : >> { %v2621_v51 = vmax.f32 %v2557_v18, %v2589_v53  ;;  %v1750_v9 = vadd.f32 %v3270_v22, %v5140_v50  ;;  %v3196_v47 = vsel %vm2650_vm15, 1.0, %v5602_v60  ;;  %vm2651_vm1 = vcmp.gt.f32.partialorder %v2619_v29, 0.1 }
 0x202   : >> { %v1841_v39 = vmax.f32 %v1739_v12, 0.0  ;;  %v1742_v43 = vadd.f32 %v5140_v50, %v1741_v1  ;;  %v3480_v40 = vpack.i.bf16 %v3196_v47, %v3195_v3  ;;  %vm2652_vm2 = vcmp.gt.f32.partialorder %v2620_v10, 0.1 }
 0x203   : >> { %v1844_v11 = vmax.f32 %v1750_v9, 0.0  ;;  %v3197_v34 = vsel %vm2651_vm1, 1.0, %v5602_v60  ;;  %v3198_v33 = vsel %vm2652_vm2, 1.0, %v5602_v60  ;;  %v2622_v5 = vmax.f32 %v2558_v48, %v2590_v56 }
 0x204   : >> { %v1842_v13 = vmax.f32 %v1742_v43, 0.0  ;;  %3481 = vperm.xlu1 %3424, %v3480_v40   ;;  %v3485_v17 = vpack.i.bf16 %v3198_v33, %v3197_v34  ;;  %vm2653_vm3 = vcmp.gt.f32.partialorder %v2621_v51, 0.1  ;;  %v2432_v7 = vmax.f32 %v2368_v54, %v2590_v56 }
 0x205   : >> { %v1870_v27 = vpack.c.bf16 %v1844_v11, %v1843_v42  ;;  %vm2654_vm4 = vcmp.gt.f32.partialorder %v2622_v5, 0.1  ;;  %v3199_v35 = vsel %vm2653_vm3, 1.0, %v5602_v60  ;;  %v2495_v24 = vmax.f32 %v2431_v25, %v2463_v52 }
 0x206   : >> { %v1869_v37 = vpack.c.bf16 %v1842_v13, %v1841_v39  ;;  %3486 = vperm.xlu0 %3418, %v3485_v17   ;;  %v3200_v59 = vsel %vm2654_vm4, 1.0, %v5602_v60  ;;  %v2496_v19 = vmax.f32 %v2432_v7, %v2464_v41 }
 0x207   : >> { %v3490_v46 = vpack.i.bf16 %v3200_v59, %v3199_v35  ;;  %v2559_v23 = vmax.f32 %v2495_v24, %v2527_v2 }
 0x208   : >> { %3315 = vmatprep.mubr.bf16.mxu1 %v1869_v37  ;;  %v2560_v6 = vmax.f32 %v2496_v19, %v2528_v32 }
 0x209   : >> { %3316 = vmatmul.mubr.bf16.gmra.mrb[4].mxu1 %v1870_v27  ;;  %3491 = vperm.xlu1 %3424, %v3490_v46   ;;  %v2623_v55 = vmax.f32 %v2559_v23, %v2591_v62 }
 0x20a   : >> { %v2624_v15 = vmax.f32 %v2560_v6, %v2592_v28 }
 0x20b   : >> { %vm2655_vm5 = vcmp.gt.f32.partialorder %v2623_v55, 0.1 }
 0x20c   : >> { %vm2656_vm6 = vcmp.gt.f32.partialorder %v2624_v15, 0.1  ;;  %v3201_v49 = vsel %vm2655_vm5, 1.0, %v5602_v60 }
 0x20d   : >> { %v3202_v0 = vsel %vm2656_vm6, 1.0, %v5602_v60  ;;  %v3273_v53 = vpop.f32.mrb[12].mxu0 }
 0x20e   : >> { %v3495_v57 = vpack.i.bf16 %v3202_v0, %v3201_v49  ;;  %v1763_v8 = vadd.f32 %v3273_v53, %v5140_v50  ;;  %v1754_v20 = vpop.f32.mrb[13].mxu0 }
 0x20f   : >> { %v1755_v63 = vadd.f32 %v5140_v50, %v1754_v20  ;;  %v3274_v30 = vpop.f32.mrb[14].mxu0 }
 0x210   : >> { %3496 = vperm.xlu0 %3418, %v3495_v57   ;;  %v1766_v44 = vadd.f32 %v3274_v30, %v5140_v50  ;;  %v1757_v61 = vpop.f32.mrb[15].mxu0  ;;  %v1847_v26 = vmax.f32 %v1763_v8, 0.0 }
 0x211   : >> { %v1758_v45 = vadd.f32 %v5140_v50, %v1757_v61  ;;  %v1845_v54 = vmax.f32 %v1755_v63, 0.0 }
 0x212   : >> { %v1848_v38 = vmax.f32 %v1766_v44, 0.0 }
 0x213   : >> { %v1846_v36 = vmax.f32 %v1758_v45, 0.0 }
 0x214   : >> { %v1872_v21 = vpack.c.bf16 %v1848_v38, %v1847_v26 }
 0x215   : >> { %v1871_v60 = vpack.c.bf16 %v1846_v36, %v1845_v54  ;;  %v3427_v54 = vpop.permute.xlu1 %3426  ;;  %v3421_v36 = vpop.permute.xlu0 %3420 }
 0x217   : >> { %3319 = vmatprep.mubr.bf16.mxu1 %v1871_v60  ;;  %v3428_v60 = vunpack.i.l.bf16 %v3427_v54 }
 0x218   : >> { %3320 = vmatmul.mubr.bf16.gmra.mrb[8].mxu1 %v1872_v21  ;;  %v5274_v21 = vld [vmem:[%s5494_s4] ss:$0 sm:$0xff] }
 0x21d   : >> { %v3277_v18 = vpop.f32.mrb[16].mxu0 }
 0x21e   : >> { %v1779_v25 = vadd.f32 %v3277_v18, %v5140_v50  ;;  %v1770_v31 = vpop.f32.mrb[17].mxu0 }
 0x21f   : >> { %v1771_v16 = vadd.f32 %v5140_v50, %v1770_v31  ;;  %v3278_v3 = vpop.f32.mrb[18].mxu0  ;;  %v3429_v31 = vunpack.i.h.bf16 %v3427_v54 }
 0x220   : >> { %v1782_v29 = vadd.f32 %v3278_v3, %v5140_v50  ;;  %v1773_v10 = vpop.f32.mrb[19].mxu0  ;;  %v1851_v22 = vmax.f32 %v1779_v25, 0.0  ;;  %v3422_v25 = vunpack.i.l.bf16 %v3421_v36  ;;  %v3423_v3 = vunpack.i.h.bf16 %v3421_v36 }
 0x221   : >> { %v1774_v12 = vadd.f32 %v5140_v50, %v1773_v10  ;;  %v1849_v51 = vmax.f32 %v1771_v16, 0.0 }
 0x222   : >> { %v1852_v48 = vmax.f32 %v1782_v29, 0.0 }
 0x223   : >> { %v1850_v42 = vmax.f32 %v1774_v12, 0.0 }
 0x224   : >> { %v1874_v9 = vpack.c.bf16 %v1852_v48, %v1851_v22 }
 0x225   : >> { %v1873_v1 = vpack.c.bf16 %v1850_v42, %v1849_v51 }
 0x227   : >> { %3323 = vmatprep.mubr.bf16.mxu1 %v1873_v1 }
 0x228   : >> { %3324 = vmatmul.mubr.bf16.gmra.mrb[12].mxu1 %v1874_v9  ;;  %v5636_v9 = vld [vmem:[#allocation11_spill] sm:$0xff] }
 0x22d   : >> { %v3281_v47 = vpop.f32.mrb[20].mxu0 }
 0x22e   : >> { %v1795_v56 = vadd.f32 %v3281_v47, %v5140_v50  ;;  %v1786_v39 = vpop.f32.mrb[21].mxu0 }
 0x22f   : >> { %v1787_v43 = vadd.f32 %v5140_v50, %v1786_v39  ;;  %v3282_v40 = vpop.f32.mrb[22].mxu0 }
 0x230   : >> { %v1798_v52 = vadd.f32 %v3282_v40, %v5140_v50  ;;  %v1789_v11 = vpop.f32.mrb[23].mxu0  ;;  %v1855_v33 = vmax.f32 %v1795_v56, 0.0  ;;  %v5637_v56 = vld [vmem:[#allocation10_spill] sm:$0xff]  ;;  %v5638_v40 = vld [vmem:[#allocation13_spill] sm:$0xff] }
 0x231   : >> { %v1790_v34 = vadd.f32 %v5140_v50, %v1789_v11  ;;  %v1853_v41 = vmax.f32 %v1787_v43, 0.0  ;;  %v5639_v11 = vld [vmem:[#allocation12_spill] sm:$0xff] }
 0x232   : >> { %v1856_v5 = vmax.f32 %v1798_v52, 0.0 }
 0x233   : >> { %v1854_v13 = vmax.f32 %v1790_v34, 0.0 }
 0x234   : >> { %v1876_v17 = vpack.c.bf16 %v1856_v5, %v1855_v33  ;;  %v3437_v33 = vpop.permute.xlu0 %3436  ;;  %v3432_v5 = vpop.permute.xlu1 %3431 }
 0x235   : >> { %v1875_v7 = vpack.c.bf16 %v1854_v13, %v1853_v41  ;;  %v3438_v41 = vunpack.i.l.bf16 %v3437_v33 }
 0x237   : >> { %3327 = vmatprep.mubr.bf16.mxu1 %v1875_v7  ;;  %v3439_v7 = vunpack.i.h.bf16 %v3437_v33 }
 0x238   : >> { %3328 = vmatmul.mubr.bf16.gmra.mrb[16].mxu1 %v1876_v17  ;;  %v3433_v17 = vunpack.i.l.bf16 %v3432_v5 }
 0x23d   : >> { %v3285_v2 = vpop.f32.mrb[24].mxu0 }
 0x23e   : >> { %v1811_v27 = vadd.f32 %v3285_v2, %v5140_v50  ;;  %v1802_v35 = vpop.f32.mrb[25].mxu0 }
 0x23f   : >> { %v1803_v24 = vadd.f32 %v5140_v50, %v1802_v35  ;;  %v3286_v32 = vpop.f32.mrb[26].mxu0  ;;  %v3434_v35 = vunpack.i.h.bf16 %v3432_v5 }
 0x240   : >> { %v1814_v37 = vadd.f32 %v3286_v32, %v5140_v50  ;;  %v1805_v59 = vpop.f32.mrb[27].mxu0  ;;  %v1859_v62 = vmax.f32 %v1811_v27, 0.0 }
 0x241   : >> { %v1806_v19 = vadd.f32 %v5140_v50, %v1805_v59  ;;  %v1857_v23 = vmax.f32 %v1803_v24, 0.0 }
 0x242   : >> { %v1860_v46 = vmax.f32 %v1814_v37, 0.0 }
 0x243   : >> { %v1858_v28 = vmax.f32 %v1806_v19, 0.0 }
 0x244   : >> { %v1878_v6 = vpack.c.bf16 %v1860_v46, %v1859_v62 }
 0x245   : >> { %v1877_v55 = vpack.c.bf16 %v1858_v28, %v1857_v23  ;;  %v5640_v23 = vld [vmem:[#allocation18_spill] sm:$0xff] }
 0x247   : >> { %3331 = vmatprep.mubr.bf16.mxu1 %v1877_v55  ;;  %v5641_v55 = vld [vmem:[#allocation16_spill] sm:$0xff] }
 0x248   : >> { %3332 = vmatmul.mubr.bf16.gmra.mrb[20].mxu1 %v1878_v6 }
 0x24d   : >> { %v3289_v15 = vpop.f32.mrb[28].mxu0 }
 0x24e   : >> { %v1827_v49 = vadd.f32 %v3289_v15, %v5140_v50  ;;  %v1818_v0 = vpop.f32.mrb[29].mxu0 }
 0x24f   : >> { %v1819_v53 = vadd.f32 %v5140_v50, %v1818_v0  ;;  %v3290_v57 = vpop.f32.mrb[30].mxu0  ;;  %v5642_v0 = vld [vmem:[#allocation17_spill] sm:$0xff] }
 0x250   : >> { %v1830_v8 = vadd.f32 %v3290_v57, %v5140_v50  ;;  %v1821_v20 = vpop.f32.mrb[31].mxu0  ;;  %v1863_v30 = vmax.f32 %v1827_v49, 0.0  ;;  %v5643_v57 = vld [vmem:[#allocation15_spill] sm:$0xff] }
 0x251   : >> { %v1822_v63 = vadd.f32 %v5140_v50, %v1821_v20  ;;  %v1861_v61 = vmax.f32 %v1819_v53, 0.0  ;;  %v3447_v20 = vpop.permute.xlu0 %3446 }
 0x252   : >> { %v1864_v44 = vmax.f32 %v1830_v8, 0.0 }
 0x253   : >> { %v1862_v45 = vmax.f32 %v1822_v63, 0.0  ;;  %v3442_v63 = vpop.permute.xlu1 %3441 }
 0x254   : >> { %v1880_v26 = vpack.c.bf16 %v1864_v44, %v1863_v30  ;;  %v3448_v30 = vunpack.i.l.bf16 %v3447_v20  ;;  %v3444_v54 = vunpack.i.h.bf16 %v3442_v63 }
 0x255   : >> { %v1879_v38 = vpack.c.bf16 %v1862_v45, %v1861_v61  ;;  %v3443_v61 = vunpack.i.l.bf16 %v3442_v63  ;;  %v3449_v45 = vunpack.i.h.bf16 %v3447_v20 }
 0x257   : >> { %3335 = vmatprep.mubr.bf16.mxu1 %v1879_v38 }
 0x258   : >> { %3336 = vmatmul.mubr.bf16.gmra.mrb[24].mxu1 %v1880_v26 }
 0x2bb   : >> { %v3309_v18 = vpop.f32.mrb[32].mxu0 }
 0x2bc   : >> { %v1995_v50 = vadd.f32 %v3309_v18, %v5274_v21  ;;  %v1986_v16 = vpop.f32.mrb[33].mxu0 }
 0x2bd   : >> { %v1987_v29 = vadd.f32 %v5274_v21, %v1986_v16  ;;  %v3310_v10 = vpop.f32.mrb[34].mxu0 }
 0x2be   : >> { %v2883_v12 = vmul.f32 %v3428_v60, %v1995_v50  ;;  %v1998_v22 = vadd.f32 %v3310_v10, %v5274_v21  ;;  %v1989_v48 = vpop.f32.mrb[35].mxu0 }
 0x2bf   : >> { %v2881_v51 = vmul.f32 %v3422_v25, %v1987_v29  ;;  %v1990_v42 = vadd.f32 %v5274_v21, %v1989_v48 }
 0x2c0   : >> { %v2915_v1 = vadd.f32 %v2883_v12, %v5636_v9  ;;  %v2884_v47 = vmul.f32 %v3429_v31, %v1998_v22  ;;  %v5645_v12 = vld [vmem:[#allocation20_spill] sm:$0xff]  ;;  %v5647_v9 = vld [vmem:[#allocation19_spill] sm:$0xff] }
 0x2c1   : >> { %v2913_v39 = vadd.f32 %v2881_v51, %v5637_v56  ;;  %v2882_v43 = vmul.f32 %v3423_v3, %v1990_v42  ;;  %v5644_v3 = vld [vmem:[#allocation22_spill] sm:$0xff]  ;;  %v5646_v51 = vld [vmem:[#allocation21_spill] sm:$0xff]  ;;  %v3452_v56 = vpop.permute.xlu1 %3451 }
 0x2c2   : >> { %2947 = vst.msk [vmem:[#allocation2 + $0x48] sm:$0xff] %vm244_vm0, %v2915_v1  ;;  %v2916_v52 = vadd.f32 %v2884_v47, %v5638_v40  ;;  %v3457_v47 = vpop.permute.xlu0 %3456  ;;  %v3453_v40 = vunpack.i.l.bf16 %v3452_v56  ;;  %v3454_v33 = vunpack.i.h.bf16 %v3452_v56 }
 0x2c3   : >> { %2945 = vst.msk [vmem:[#allocation2 + $0x28] sm:$0xff] %vm244_vm0, %v2913_v39  ;;  %v2914_v34 = vadd.f32 %v2882_v43, %v5639_v11  ;;  %v3458_v39 = vunpack.i.l.bf16 %v3457_v47 }
 0x2c4   : >> { %2948 = vst.msk [vmem:[#allocation2 + $0x50] sm:$0xff] %vm244_vm0, %v2916_v52  ;;  %v3459_v52 = vunpack.i.h.bf16 %v3457_v47 }
 0x2c5   : >> { %2946 = vst.msk [vmem:[#allocation2 + $0x30] sm:$0xff] %vm244_vm0, %v2914_v34 }
 0x2cb   : >> { %v3313_v13 = vpop.f32.mrb[0].mxu1 }
 0x2cc   : >> { %v2011_v2 = vadd.f32 %v3313_v13, %v5274_v21  ;;  %v2002_v27 = vpop.f32.mrb[1].mxu1 }
 0x2cd   : >> { %v2003_v24 = vadd.f32 %v5274_v21, %v2002_v27  ;;  %v3314_v32 = vpop.f32.mrb[2].mxu1 }
 0x2ce   : >> { %v2887_v37 = vmul.f32 %v3438_v41, %v2011_v2  ;;  %v2014_v59 = vadd.f32 %v3314_v32, %v5274_v21  ;;  %v2005_v19 = vpop.f32.mrb[3].mxu1 }
 0x2cf   : >> { %v2885_v62 = vmul.f32 %v3433_v17, %v2003_v24  ;;  %v2006_v46 = vadd.f32 %v5274_v21, %v2005_v19 }
 0x2d0   : >> { %v2919_v28 = vadd.f32 %v2887_v37, %v5640_v23  ;;  %v2888_v6 = vmul.f32 %v3439_v7, %v2014_v59  ;;  %v5649_v37 = vld [vmem:[#allocation24_spill] sm:$0xff]  ;;  %v5651_v23 = vld [vmem:[#allocation23_spill] sm:$0xff] }
 0x2d1   : >> { %v2917_v15 = vadd.f32 %v2885_v62, %v5641_v55  ;;  %v2886_v49 = vmul.f32 %v3434_v35, %v2006_v46  ;;  %v5648_v35 = vld [vmem:[#allocation26_spill] sm:$0xff]  ;;  %v5650_v62 = vld [vmem:[#allocation25_spill] sm:$0xff]  ;;  %v3462_v55 = vpop.permute.xlu1 %3461 }
 0x2d2   : >> { %2951 = vst.msk [vmem:[#allocation2 + $0x88] sm:$0xff] %vm244_vm0, %v2919_v28  ;;  %v2920_v53 = vadd.f32 %v2888_v6, %v5642_v0  ;;  %v3467_v6 = vpop.permute.xlu0 %3466  ;;  %v3463_v0 = vunpack.i.l.bf16 %v3462_v55  ;;  %v3464_v20 = vunpack.i.h.bf16 %v3462_v55 }
 0x2d3   : >> { %2949 = vst.msk [vmem:[#allocation2 + $0x68] sm:$0xff] %vm244_vm0, %v2917_v15  ;;  %v2918_v8 = vadd.f32 %v2886_v49, %v5643_v57  ;;  %v3468_v15 = vunpack.i.l.bf16 %v3467_v6 }
 0x2d4   : >> { %2952 = vst.msk [vmem:[#allocation2 + $0x90] sm:$0xff] %vm244_vm0, %v2920_v53  ;;  %v3469_v53 = vunpack.i.h.bf16 %v3467_v6 }
 0x2d5   : >> { %2950 = vst.msk [vmem:[#allocation2 + $0x70] sm:$0xff] %vm244_vm0, %v2918_v8 }
 0x2dc   : >> { %v3317_v44 = vpop.f32.mrb[4].mxu1 }
 0x2dd   : >> { %v2027_v26 = vadd.f32 %v3317_v44, %v5274_v21  ;;  %v2018_v38 = vpop.f32.mrb[5].mxu1 }
 0x2de   : >> { %v2019_v36 = vadd.f32 %v5274_v21, %v2018_v38  ;;  %v3318_v60 = vpop.f32.mrb[6].mxu1 }
 0x2df   : >> { %v2891_v18 = vmul.f32 %v3448_v30, %v2027_v26  ;;  %v2030_v25 = vadd.f32 %v3318_v60, %v5274_v21  ;;  %v2021_v31 = vpop.f32.mrb[7].mxu1 }
 0x2e0   : >> { %v2889_v50 = vmul.f32 %v3443_v61, %v2019_v36  ;;  %v2022_v16 = vadd.f32 %v5274_v21, %v2021_v31 }
 0x2e1   : >> { %v2923_v29 = vadd.f32 %v2891_v18, %v5644_v3  ;;  %v2892_v10 = vmul.f32 %v3449_v45, %v2030_v25  ;;  %v5653_v18 = vld [vmem:[#allocation28_spill] sm:$0xff]  ;;  %v5655_v3 = vld [vmem:[#allocation27_spill] sm:$0xff] }
 0x2e2   : >> { %v2921_v22 = vadd.f32 %v2889_v50, %v5645_v12  ;;  %v2890_v48 = vmul.f32 %v3444_v54, %v2022_v16  ;;  %v5652_v54 = vld [vmem:[#allocation30_spill] sm:$0xff]  ;;  %v5654_v50 = vld [vmem:[#allocation29_spill] sm:$0xff]  ;;  %v3472_v12 = vpop.permute.xlu1 %3471 }
 0x2e3   : >> { %2955 = vst.msk [vmem:[#allocation2 + $0xc8] sm:$0xff] %vm244_vm0, %v2923_v29  ;;  %v2924_v42 = vadd.f32 %v2892_v10, %v5646_v51  ;;  %v3477_v10 = vpop.permute.xlu0 %3476  ;;  %v3474_v47 = vunpack.i.h.bf16 %v3472_v12 }
 0x2e4   : >> { %2953 = vst.msk [vmem:[#allocation2 + $0xa8] sm:$0xff] %vm244_vm0, %v2921_v22  ;;  %v2922_v1 = vadd.f32 %v2890_v48, %v5647_v9  ;;  %v3478_v22 = vunpack.i.l.bf16 %v3477_v10  ;;  %v3473_v48 = vunpack.i.l.bf16 %v3472_v12 }
 0x2e5   : >> { %2956 = vst.msk [vmem:[#allocation2 + $0xd0] sm:$0xff] %vm244_vm0, %v2924_v42  ;;  %v3479_v42 = vunpack.i.h.bf16 %v3477_v10 }
 0x2e6   : >> { %2954 = vst.msk [vmem:[#allocation2 + $0xb0] sm:$0xff] %vm244_vm0, %v2922_v1 }
 0x2eb   : >> { %v3321_v43 = vpop.f32.mrb[8].mxu1 }
 0x2ec   : >> { %v2043_v11 = vadd.f32 %v3321_v43, %v5274_v21  ;;  %v2034_v34 = vpop.f32.mrb[9].mxu1 }
 0x2ed   : >> { %v2035_v5 = vadd.f32 %v5274_v21, %v2034_v34  ;;  %v3322_v41 = vpop.f32.mrb[10].mxu1 }
 0x2ee   : >> { %v2895_v13 = vmul.f32 %v3458_v39, %v2043_v11  ;;  %v2046_v17 = vadd.f32 %v3322_v41, %v5274_v21  ;;  %v2037_v7 = vpop.f32.mrb[11].mxu1 }
 0x2ef   : >> { %v2893_v2 = vmul.f32 %v3453_v40, %v2035_v5  ;;  %v2038_v27 = vadd.f32 %v5274_v21, %v2037_v7 }
 0x2f0   : >> { %v2927_v24 = vadd.f32 %v2895_v13, %v5648_v35  ;;  %v2896_v32 = vmul.f32 %v3459_v52, %v2046_v17  ;;  %v5657_v13 = vld [vmem:[#allocation32_spill] sm:$0xff]  ;;  %v5659_v35 = vld [vmem:[#allocation31_spill] sm:$0xff] }
 0x2f1   : >> { %v2925_v59 = vadd.f32 %v2893_v2, %v5649_v37  ;;  %v2894_v19 = vmul.f32 %v3454_v33, %v2038_v27  ;;  %v5656_v33 = vld [vmem:[#allocation34_spill] sm:$0xff]  ;;  %v5658_v2 = vld [vmem:[#allocation33_spill] sm:$0xff] }
 0x2f2   : >> { %2959 = vst.msk [vmem:[#allocation2 + $0x108] sm:$0xff] %vm244_vm0, %v2927_v24  ;;  %v2928_v46 = vadd.f32 %v2896_v32, %v5650_v62  ;;  %v3487_v32 = vpop.permute.xlu0 %3486 }
 0x2f3   : >> { %2957 = vst.msk [vmem:[#allocation2 + $0xe8] sm:$0xff] %vm244_vm0, %v2925_v59  ;;  %v2926_v28 = vadd.f32 %v2894_v19, %v5651_v23  ;;  %v3482_v59 = vpop.permute.xlu1 %3481  ;;  %v3488_v19 = vunpack.i.l.bf16 %v3487_v32  ;;  %v3489_v55 = vunpack.i.h.bf16 %v3487_v32 }
 0x2f4   : >> { %2960 = vst.msk [vmem:[#allocation2 + $0x110] sm:$0xff] %vm244_vm0, %v2928_v46  ;;  %v3483_v23 = vunpack.i.l.bf16 %v3482_v59 }
 0x2f5   : >> { %2958 = vst.msk [vmem:[#allocation2 + $0xf0] sm:$0xff] %vm244_vm0, %v2926_v28 }
 0x2fb   : >> { %v3325_v49 = vpop.f32.mrb[12].mxu1  ;;  %v2992_v32 = vld [vmem:[#allocation2 + $0x110] sm:$0xff] (%p385_p6) }
 0x2fc   : >> { %v2059_v57 = vadd.f32 %v3325_v49, %v5274_v21  ;;  %v2050_v8 = vpop.f32.mrb[13].mxu1  ;;  %3024 = vst.msk [vmem:[%s3984_s29 + $0x78] sm:$0xff] (%p385_p6), %vm244_vm0, %v2992_v32 }
 0x2fd   : >> { %v2051_v63 = vadd.f32 %v5274_v21, %v2050_v8  ;;  %v3326_v30 = vpop.f32.mrb[14].mxu1 }
 0x2fe   : >> { %v2899_v44 = vmul.f32 %v3468_v15, %v2059_v57  ;;  %v2062_v61 = vadd.f32 %v3326_v30, %v5274_v21  ;;  %v2053_v45 = vpop.f32.mrb[15].mxu1 }
 0x2ff   : >> { %v2897_v26 = vmul.f32 %v3463_v0, %v2051_v63  ;;  %v2054_v38 = vadd.f32 %v5274_v21, %v2053_v45 }
 0x300   : >> { %v2931_v36 = vadd.f32 %v2899_v44, %v5652_v54  ;;  %v2900_v60 = vmul.f32 %v3469_v53, %v2062_v61  ;;  %v3484_v53 = vunpack.i.h.bf16 %v3482_v59  ;;  %v5661_v44 = vld [vmem:[#allocation36_spill] sm:$0xff]  ;;  %v5663_v54 = vld [vmem:[#allocation35_spill] sm:$0xff] }
 0x301   : >> { %v2929_v25 = vadd.f32 %v2897_v26, %v5653_v18  ;;  %v2898_v31 = vmul.f32 %v3464_v20, %v2054_v38  ;;  %v5660_v20 = vld [vmem:[#allocation38_spill] sm:$0xff]  ;;  %v5662_v26 = vld [vmem:[#allocation37_spill] sm:$0xff]  ;;  %v3492_v18 = vpop.permute.xlu1 %3491 }
 0x302   : >> { %2963 = vst.msk [vmem:[#allocation2 + $0x148] sm:$0xff] %vm244_vm0, %v2931_v36  ;;  %v2932_v16 = vadd.f32 %v2900_v60, %v5654_v50  ;;  %v3497_v60 = vpop.permute.xlu0 %3496 }
 0x303   : >> { %2961 = vst.msk [vmem:[#allocation2 + $0x128] sm:$0xff] %vm244_vm0, %v2929_v25  ;;  %v2930_v29 = vadd.f32 %v2898_v31, %v5655_v3  ;;  %v3498_v31 = vunpack.i.l.bf16 %v3497_v60  ;;  %v3493_v3 = vunpack.i.l.bf16 %v3492_v18  ;;  %v3499_v12 = vunpack.i.h.bf16 %v3497_v60 }
 0x304   : >> { %2964 = vst.msk [vmem:[#allocation2 + $0x150] sm:$0xff] %vm244_vm0, %v2932_v16 }
 0x305   : >> { %2962 = vst.msk [vmem:[#allocation2 + $0x130] sm:$0xff] %vm244_vm0, %v2930_v29 }
 0x30b   : >> { %v3329_v51 = vpop.f32.mrb[16].mxu1 }
 0x30c   : >> { %v2075_v9 = vadd.f32 %v3329_v51, %v5274_v21  ;;  %v2066_v1 = vpop.f32.mrb[17].mxu1  ;;  %v2994_v59 = vld [vmem:[#allocation2 + $0x130] sm:$0xff] (%p385_p6) }
 0x30d   : >> { %v2067_v56 = vadd.f32 %v5274_v21, %v2066_v1  ;;  %v3330_v39 = vpop.f32.mrb[18].mxu1  ;;  %3026 = vst.msk [vmem:[%s3984_s29 + $0x88] sm:$0xff] (%p385_p6), %vm244_vm0, %v2994_v59 }
 0x30e   : >> { %v2903_v43 = vmul.f32 %v3478_v22, %v2075_v9  ;;  %v2078_v40 = vadd.f32 %v3330_v39, %v5274_v21  ;;  %v2069_v52 = vpop.f32.mrb[19].mxu1 }
 0x30f   : >> { %v2901_v11 = vmul.f32 %v3473_v48, %v2067_v56  ;;  %v2070_v34 = vadd.f32 %v5274_v21, %v2069_v52 }
 0x310   : >> { %v2935_v5 = vadd.f32 %v2903_v43, %v5656_v33  ;;  %v2904_v41 = vmul.f32 %v3479_v42, %v2078_v40  ;;  %v3494_v42 = vunpack.i.h.bf16 %v3492_v18  ;;  %v5664_v40 = vld [vmem:[#allocation14_spill] sm:$0xff]  ;;  %v2982_v33 = vld [vmem:[#allocation2 + $0x70] sm:$0xff] (%p385_p6) }
 0x311   : >> { %v2933_v17 = vadd.f32 %v2901_v11, %v5657_v13  ;;  %v2902_v7 = vmul.f32 %v3474_v47, %v2070_v34  ;;  %v2981_v34 = vld [vmem:[#allocation2 + $0x68] sm:$0xff] (%p385_p6)  ;;  %3014 = vst.msk [vmem:[%s3984_s29 + $0x28] sm:$0xff] (%p385_p6), %vm244_vm0, %v2982_v33 }
 0x312   : >> { %2967 = vst.msk [vmem:[#allocation2 + $0x188] sm:$0xff] %vm244_vm0, %v2935_v5  ;;  %v2936_v27 = vadd.f32 %v2904_v41, %v5658_v2  ;;  %3013 = vst.msk [vmem:[%s3984_s29 + $0x20] sm:$0xff] (%p385_p6), %vm244_vm0, %v2981_v34  ;;  %v2983_v5 = vld [vmem:[#allocation2 + $0x88] sm:$0xff] (%p385_p6)  ;;  %v2984_v41 = vld [vmem:[#allocation2 + $0x90] sm:$0xff] (%p385_p6) }
 0x313   : >> { %2965 = vst.msk [vmem:[#allocation2 + $0x168] sm:$0xff] %vm244_vm0, %v2933_v17  ;;  %v2934_v24 = vadd.f32 %v2902_v7, %v5659_v35  ;;  %v2985_v13 = vld [vmem:[#allocation2 + $0xa8] sm:$0xff] (%p385_p6)  ;;  %3015 = vst.msk [vmem:[%s3984_s29 + $0x30] sm:$0xff] (%p385_p6), %vm244_vm0, %v2983_v5  ;;  %v2986_v17 = vld [vmem:[#allocation2 + $0xb0] sm:$0xff] (%p385_p6) }
 0x314   : >> { %2968 = vst.msk [vmem:[#allocation2 + $0x190] sm:$0xff] %vm244_vm0, %v2936_v27  ;;  %3016 = vst.msk [vmem:[%s3984_s29 + $0x38] sm:$0xff] (%p385_p6), %vm244_vm0, %v2984_v41  ;;  %v2987_v7 = vld [vmem:[#allocation2 + $0xc8] sm:$0xff] (%p385_p6)  ;;  %v2988_v2 = vld [vmem:[#allocation2 + $0xd0] sm:$0xff] (%p385_p6) }
 0x315   : >> { %2966 = vst.msk [vmem:[#allocation2 + $0x170] sm:$0xff] %vm244_vm0, %v2934_v24  ;;  %3017 = vst.msk [vmem:[%s3984_s29 + $0x40] sm:$0xff] (%p385_p6), %vm244_vm0, %v2985_v13  ;;  %v2989_v27 = vld [vmem:[#allocation2 + $0xe8] sm:$0xff] (%p385_p6)  ;;  %v2990_v35 = vld [vmem:[#allocation2 + $0xf0] sm:$0xff] (%p385_p6) }
 0x316   : > { %3018 = vst.msk [vmem:[%s3984_s29 + $0x48] sm:$0xff] (%p385_p6), %vm244_vm0, %v2986_v17  ;;  %3019 = vst.msk [vmem:[%s3984_s29 + $0x50] sm:$0xff] (%p385_p6), %vm244_vm0, %v2987_v7  ;;  %v2991_v24 = vld [vmem:[#allocation2 + $0x108] sm:$0xff] (%p385_p6) }
 0x317   : > { %3020 = vst.msk [vmem:[%s3984_s29 + $0x58] sm:$0xff] (%p385_p6), %vm244_vm0, %v2988_v2  ;;  %3021 = vst.msk [vmem:[%s3984_s29 + $0x60] sm:$0xff] (%p385_p6), %vm244_vm0, %v2989_v27 }
 0x318   : > { %3022 = vst.msk [vmem:[%s3984_s29 + $0x68] sm:$0xff] (%p385_p6), %vm244_vm0, %v2990_v35  ;;  %3023 = vst.msk [vmem:[%s3984_s29 + $0x70] sm:$0xff] (%p385_p6), %vm244_vm0, %v2991_v24 }
 0x31b   : >> { %v3333_v37 = vpop.f32.mrb[20].mxu1 }
 0x31c   : >> { %v2091_v62 = vadd.f32 %v3333_v37, %v5274_v21  ;;  %v2082_v46 = vpop.f32.mrb[21].mxu1  ;;  %v2993_v37 = vld [vmem:[#allocation2 + $0x128] sm:$0xff] (%p385_p6) }
 0x31d   : >> { %v2083_v28 = vadd.f32 %v5274_v21, %v2082_v46  ;;  %v3334_v6 = vpop.f32.mrb[22].mxu1  ;;  %3025 = vst.msk [vmem:[%s3984_s29 + $0x80] sm:$0xff] (%p385_p6), %vm244_vm0, %v2993_v37  ;;  %v2997_v46 = vld [vmem:[#allocation2 + $0x168] sm:$0xff] (%p385_p6) }
 0x31e   : >> { %v2907_v15 = vmul.f32 %v3488_v19, %v2091_v62  ;;  %v2094_v49 = vadd.f32 %v3334_v6, %v5274_v21  ;;  %v2085_v0 = vpop.f32.mrb[23].mxu1  ;;  %v2995_v19 = vld [vmem:[#allocation2 + $0x148] sm:$0xff] (%p385_p6)  ;;  %v2996_v62 = vld [vmem:[#allocation2 + $0x150] sm:$0xff] (%p385_p6)  ;;  %3029 = vst.msk [vmem:[%s3984_s29 + $0xa0] sm:$0xff] (%p385_p6), %vm244_vm0, %v2997_v46 }
 0x31f   : >> { %v2905_v57 = vmul.f32 %v3483_v23, %v2083_v28  ;;  %v2086_v8 = vadd.f32 %v5274_v21, %v2085_v0  ;;  %3027 = vst.msk [vmem:[%s3984_s29 + $0x90] sm:$0xff] (%p385_p6), %vm244_vm0, %v2995_v19  ;;  %3028 = vst.msk [vmem:[%s3984_s29 + $0x98] sm:$0xff] (%p385_p6), %vm244_vm0, %v2996_v62  ;;  %v2998_v23 = vld [vmem:[#allocation2 + $0x170] sm:$0xff] (%p385_p6)  ;;  %v2999_v28 = vld [vmem:[#allocation2 + $0x188] sm:$0xff] (%p385_p6) }
 0x320   : >> { %v2939_v63 = vadd.f32 %v2907_v15, %v5660_v20  ;;  %v2908_v30 = vmul.f32 %v3489_v55, %v2094_v49  ;;  %v3000_v6 = vld [vmem:[#allocation2 + $0x190] sm:$0xff] (%p385_p6)  ;;  %3030 = vst.msk [vmem:[%s3984_s29 + $0xa8] sm:$0xff] (%p385_p6), %vm244_vm0, %v2998_v23  ;;  %3031 = vst.msk [vmem:[%s3984_s29 + $0xb0] sm:$0xff] (%p385_p6), %vm244_vm0, %v2999_v28 }
 0x321   : >> { %v2937_v61 = vadd.f32 %v2905_v57, %v5661_v44  ;;  %v2906_v45 = vmul.f32 %v3484_v53, %v2086_v8  ;;  %3032 = vst.msk [vmem:[%s3984_s29 + $0xb8] sm:$0xff] (%p385_p6), %vm244_vm0, %v3000_v6 }
 0x322   : >> { %2971 = vst.msk [vmem:[#allocation2 + $0x1c8] sm:$0xff] %vm244_vm0, %v2939_v63  ;;  %v2940_v38 = vadd.f32 %v2908_v30, %v5662_v26 }
 0x323   : >> { %2969 = vst.msk [vmem:[#allocation2 + $0x1a8] sm:$0xff] %vm244_vm0, %v2937_v61  ;;  %v2938_v36 = vadd.f32 %v2906_v45, %v5663_v54 }
 0x324   : >> { %2972 = vst.msk [vmem:[#allocation2 + $0x1d0] sm:$0xff] %vm244_vm0, %v2940_v38 }
 0x325   : >> { %2970 = vst.msk [vmem:[#allocation2 + $0x1b0] sm:$0xff] %vm244_vm0, %v2938_v36 }
 0x329   : > { %v3003_v49 = vld [vmem:[#allocation2 + $0x1c8] sm:$0xff] (%p385_p6) }
 0x32a   : > { %v3001_v55 = vld [vmem:[#allocation2 + $0x1a8] sm:$0xff] (%p385_p6)  ;;  %3035 = vst.msk [vmem:[%s3984_s29 + $0xd0] sm:$0xff] (%p385_p6), %vm244_vm0, %v3003_v49 }
 0x32b   : >> { %v3337_v25 = vpop.f32.mrb[24].mxu1  ;;  %3033 = vst.msk [vmem:[%s3984_s29 + $0xc0] sm:$0xff] (%p385_p6), %vm244_vm0, %v3001_v55  ;;  %v3004_v0 = vld [vmem:[#allocation2 + $0x1d0] sm:$0xff] (%p385_p6) }
 0x32c   : >> { %v2107_v50 = vadd.f32 %v3337_v25, %v5274_v21  ;;  %v2098_v16 = vpop.f32.mrb[25].mxu1  ;;  %v3002_v15 = vld [vmem:[#allocation2 + $0x1b0] sm:$0xff] (%p385_p6)  ;;  %3036 = vst.msk [vmem:[%s3984_s29 + $0xd8] sm:$0xff] (%p385_p6), %vm244_vm0, %v3004_v0 }
 0x32d   : >> { %v2099_v29 = vadd.f32 %v5274_v21, %v2098_v16  ;;  %v3338_v10 = vpop.f32.mrb[26].mxu1  ;;  %3034 = vst.msk [vmem:[%s3984_s29 + $0xc8] sm:$0xff] (%p385_p6), %vm244_vm0, %v3002_v15 }
 0x32e   : >> { %v2911_v22 = vmul.f32 %v3498_v31, %v2107_v50  ;;  %v2110_v48 = vadd.f32 %v3338_v10, %v5274_v21  ;;  %v2101_v51 = vpop.f32.mrb[27].mxu1 }
 0x32f   : >> { %v2909_v9 = vmul.f32 %v3493_v3, %v2099_v29  ;;  %v2102_v1 = vadd.f32 %v5274_v21, %v2101_v51  ;;  %387 = sbr.rel (!%p385_p6) target bundleno = 109 (0x6d), region = 94  ;;  %v2980_v21 = vld [vmem:[#allocation2 + $0x50] sm:$0xff] (%p385_p6) }
 0x330   : >> { %v2943_v47 = vadd.f32 %v2911_v22, %v4717_v14  ;;  %v2912_v56 = vmul.f32 %v3499_v12, %v2110_v48  ;;  %v2977_v14 = vld [vmem:[#allocation2 + $0x28] sm:$0xff] (%p385_p6)  ;;  %3012 = vst.msk [vmem:[%s3984_s29 + $0x18] sm:$0xff] (%p385_p6), %vm244_vm0, %v2980_v21 }
 0x331   : >> { %v2941_v39 = vadd.f32 %v2909_v9, %v5609_v58  ;;  %v2910_v43 = vmul.f32 %v3494_v42, %v2102_v1  ;;  %v2979_v58 = vld [vmem:[#allocation2 + $0x48] sm:$0xff] (%p385_p6)  ;;  %3009 = vst.msk [vmem:[%s3984_s29] sm:$0xff] (%p385_p6), %vm244_vm0, %v2977_v14 }
 0x332   : >> { %2975 = vst.msk [vmem:[#allocation2 + $0x208] sm:$0xff] %vm244_vm0, %v2943_v47  ;;  %v2944_v52 = vadd.f32 %v2912_v56, %v5664_v40  ;;  %3011 = vst.msk [vmem:[%s3984_s29 + $0x10] sm:$0xff] (%p385_p6), %vm244_vm0, %v2979_v58 }
 0x333   : >> { %2973 = vst.msk [vmem:[#allocation2 + $0x1e8] sm:$0xff] %vm244_vm0, %v2941_v39  ;;  %v2942_v11 = vadd.f32 %v2910_v43, %v4703_v4  ;;  %v2978_v4 = vld [vmem:[#allocation2 + $0x30] sm:$0xff] (%p385_p6) }
 0x334   : >> { %2976 = vst.msk [vmem:[#allocation2 + $0x210] sm:$0xff] %vm244_vm0, %v2944_v52  ;;  %3010 = vst.msk [vmem:[%s3984_s29 + $0x8] sm:$0xff] (%p385_p6), %vm244_vm0, %v2978_v4 }
 0x335   : >> { %2974 = vst.msk [vmem:[#allocation2 + $0x1f0] sm:$0xff] %vm244_vm0, %v2942_v11 }
 0x339   : > { %v3007_v8 = vld [vmem:[#allocation2 + $0x208] sm:$0xff] }
 0x33a   : > { %v3005_v53 = vld [vmem:[#allocation2 + $0x1e8] sm:$0xff]  ;;  %3039 = vst.msk [vmem:[%s3984_s29 + $0xf0] sm:$0xff] %vm244_vm0, %v3007_v8 }
 0x33b   : > { %3037 = vst.msk [vmem:[%s3984_s29 + $0xe0] sm:$0xff] %vm244_vm0, %v3005_v53  ;;  %v3008_v20 = vld [vmem:[#allocation2 + $0x210] sm:$0xff] }
 0x33c   : > { %v3006_v57 = vld [vmem:[#allocation2 + $0x1f0] sm:$0xff]  ;;  %3040 = vst.msk [vmem:[%s3984_s29 + $0xf8] sm:$0xff] %vm244_vm0, %v3008_v20 }
 0x33d   : > { %3038 = vst.msk [vmem:[%s3984_s29 + $0xe8] sm:$0xff] %vm244_vm0, %v3006_v57 }
 0x33e   : > { %3554 = shalt.err (!%p3551_p4)
}
 0x33f   : > { %s3555_s29 = scalar_lea.hbm %s5428_s7, 4096  ;;  %s3559_s28 = scalar_lea.hbm %s5495_s5, 8192 }
 0x340   : > { %p3556_p5 = scmp.ne.s32.totalorder %s5428_s7, %s3555_s29  ;;  %p3560_p1 = scmp.lt.u32.totalorder %s5428_s7, %s5495_s5 }
 0x341   : > { %p3561_p3 = scmp.lt.u32.totalorder %s3559_s28, %s3555_s29  ;;  %p3563_p11 = scmp.lt.u32.totalorder %s3555_s29, %s5428_s7 }
 0x342   : > { %p3557_p7 = pnand %p3556_p5, %p5665_p12 }
 0x343   : > { %p3562_p6 = por %p3561_p3, %p3560_p1 }
 0x344   : > { %p3558_p9 = pneg %p3557_p7 }
 0x345   : > { %p3564_p13 = por %p3563_p11, %p3562_p6 }
 0x347   : > { %p3565_p8 = pnand %p3564_p13, %p3558_p9 }
 0x349   : > { %3568 = shalt.err (!%p3565_p8)
}
 0x34a   : > { %s3626_s12 = smov 128   ;;  %s3627_s22 = smov 8  }
 0x34b   : > { %3357 = dma.vmem_to_hbm [thread:$0]  (%p5665_p12), %s5430_s16, 4096, %s5428_s7, %s3042_s9, %s3626_s12, %s3626_s12, %s3627_s22  }
 0x34c PF: > { %s3070_s8 = sand.u32 1, %s3599_s18   ;;  %p5666_p10 = scmp.ne.s32.totalorder %s5561_s6, 0 }
 0x34d   : > { %p5667_p0 = scmp.ge.s32.totalorder %s3611_s21, 2  ;;  %s3071_s10 = scalar_lea.sflag [#allocation6], %s3070_s8 }
 0x34f   : > { %p3364_p2 = pnand %p5667_p0, %p5666_p10 }
 0x351   : > { %3594 = dma.done.wait (!%p3364_p2), %s3071_s10, 4096  }
 0x352   : > { %3596 = vsyncadd (!%p3364_p2), %s3071_s10, 4294963200  ;;  %p18_p4 = scmp.ge.s32.totalorder %s3683_s24, 4   ;;  %s5668_s18 = smov %s3603_s19 }
 0x353   : > { %s5669_s19 = smov %s3607_s20  ;;  %s5670_s20 = smov %s3695_s27 }
 0x354   : > { %s5671_s21 = smov %s3683_s24  ;;  %20 = sbr.rel (!%p18_p4) target bundleno = 5 (0x5), region = 105 }
 0x35b   :  { %3076 = vsyncpa [#allocation5], 1 }
 0x35c   :  { %3078 = vsyncpa [#allocation5 + $0x1], 1 }
 0x35d   :  { %3079 = vsyncpa [#allocation6], 1 }
 0x35e   :  { %3081 = vsyncpa [#allocation6 + $0x1], 1 }

</bundles_post_ra>
